<compile_context>
chip_gen: v7x
topology: tpu7x:2x2x1
jax: 0.10.0
libtpu: 0.0.40
codegen_flags: <defaults>
</compile_context>

<pallas_src>
import functools
import math

import numpy as np
import jax
import jax.numpy as jnp
from jax.experimental import pallas as pl
from jax.experimental.pallas import tpu as pltpu


# ----------------------------------------------------------------------------
# In-kernel math helpers
# ----------------------------------------------------------------------------
def _erf(x):
    # Polynomial erf (Abramowitz & Stegun 7.1.26), |err| < 1.5e-7 ~ f32 eps.
    # Reproduces nn.GELU() exact-erf semantics to within float32 rounding.
    # TODO(synk): switch to a native erf lowering if/when Mosaic guarantees one.
    a1, a2, a3, a4, a5 = 0.254829592, -0.284496736, 1.421413741, -1.453152027, 1.061405429
    p = 0.3275911
    ax = jnp.abs(x)
    t = 1.0 / (1.0 + p * ax)
    poly = ((((a5 * t + a4) * t + a3) * t + a2) * t + a1) * t
    y = 1.0 - poly * jnp.exp(-ax * ax)
    return jnp.where(x >= 0, y, -y)


def _gelu_exact(x):
    return 0.5 * x * (1.0 + _erf(x * (1.0 / math.sqrt(2.0))))


def _layernorm(x, g, b, eps):
    mu = jnp.mean(x, axis=-1, keepdims=True)
    xc = x - mu
    var = jnp.mean(xc * xc, axis=-1, keepdims=True)  # biased, like torch LayerNorm
    return xc * jax.lax.rsqrt(var + eps) * g + b


def _pick_tile(m):
    """Largest row tile <=128 dividing m with >=2 grid steps (else full m)."""
    for t in (128, 64, 32, 16, 8):
        if m % t == 0 and m // t >= 2:
            return t
    return m


# ----------------------------------------------------------------------------
# Pallas kernels
# ----------------------------------------------------------------------------
def _linear_kernel(x_ref, w_ref, b_ref, o_ref):
    acc = jnp.dot(x_ref[...], w_ref[...], preferred_element_type=jnp.float32)
    o_ref[...] = (acc + b_ref[...]).astype(o_ref.dtype)


def linear(x, w, b):
    """Row-tiled (M,K)@(K,N)+b."""
    M, K = x.shape
    N = w.shape[1]
    tm = _pick_tile(M)
    return pl.pallas_call(
        _linear_kernel,
        out_shape=jax.ShapeDtypeStruct((M, N), x.dtype),
        grid=(M // tm,),
        in_specs=[
            pl.BlockSpec((tm, K), lambda i: (i, 0)),
            pl.BlockSpec((K, N), lambda i: (0, 0)),
            pl.BlockSpec((1, N), lambda i: (0, 0)),
        ],
        out_specs=pl.BlockSpec((tm, N), lambda i: (i, 0)),
        compiler_params=pltpu.CompilerParams(dimension_semantics=("parallel",)),
    )(x, w, b.reshape(1, N))


def _win_attn_kernel(*refs, nh, scale, has_mask):
    # One batch image per grid step: all its windows & heads processed here.
    if has_mask:
        (x_ref, qw_ref, qb_ref, kw_ref, kb_ref, vw_ref, vb_ref,
         pw_ref, pb_ref, bias_ref, mask_ref, o_ref) = refs
    else:
        (x_ref, qw_ref, qb_ref, kw_ref, kb_ref, vw_ref, vb_ref,
         pw_ref, pb_ref, bias_ref, o_ref) = refs
        mask_ref = None

    nW, N, C = x_ref.shape
    hd = C // nh
    x = x_ref[...].astype(jnp.float32).reshape(nW * N, C)

    # Three lane-dense projections (no column slicing of a (.,3C) activation).
    q = (jnp.dot(x, qw_ref[...], preferred_element_type=jnp.float32)
         + qb_ref[...]).reshape(nW, N, C)
    k = (jnp.dot(x, kw_ref[...], preferred_element_type=jnp.float32)
         + kb_ref[...]).reshape(nW, N, C)
    v = (jnp.dot(x, vw_ref[...], preferred_element_type=jnp.float32)
         + vb_ref[...]).reshape(nW, N, C)

    bias = bias_ref[...]                                     # (nh, N, N)
    mask = mask_ref[...] if has_mask else None               # (nW, N, N)

    head_outs = []
    for h in range(nh):                                      # static, nh <= 4
        lo, hi = h * hd, (h + 1) * hd
        s = jnp.einsum("wqd,wkd->wqk", q[..., lo:hi], k[..., lo:hi],
                       preferred_element_type=jnp.float32) * scale
        s = s + bias[h][None]
        if has_mask:
            s = s + mask
        s = s - jnp.max(s, axis=-1, keepdims=True)
        p = jnp.exp(s)
        p = p * pl.reciprocal(jnp.sum(p, axis=-1, keepdims=True), approx=True)
        head_outs.append(jnp.einsum("wqk,wkd->wqd", p, v[..., lo:hi],
                                    preferred_element_type=jnp.float32))
    o = jnp.concatenate(head_outs, axis=-1).reshape(nW * N, C)
    y = jnp.dot(o, pw_ref[...], preferred_element_type=jnp.float32) + pb_ref[...]
    o_ref[...] = y.reshape(nW, N, C).astype(o_ref.dtype)


def window_attention(xw, p, nh, bias, mask):
    """xw: (B, nW, N, C); bias: (nh, N, N); mask: (nW, N, N) or None."""
    B, nW, N, C = xw.shape
    has_mask = mask is not None
    kern = functools.partial(_win_attn_kernel, nh=nh,
                             scale=float(C // nh) ** (-0.5), has_mask=has_mask)

    # Split fused qkv into three lane-dense (C, C) projections (trace-time).
    qkv_w, qkv_b = p["qkv_w"], p["qkv_b"]
    qw, kw, vw = qkv_w[:, 0 * C:1 * C], qkv_w[:, 1 * C:2 * C], qkv_w[:, 2 * C:3 * C]
    qb = qkv_b[0 * C:1 * C].reshape(1, C)
    kb = qkv_b[1 * C:2 * C].reshape(1, C)
    vb = qkv_b[2 * C:3 * C].reshape(1, C)

    in_specs = [
        pl.BlockSpec((None, nW, N, C), lambda b: (b, 0, 0, 0)),
        pl.BlockSpec((C, C), lambda b: (0, 0)),
        pl.BlockSpec((1, C), lambda b: (0, 0)),
        pl.BlockSpec((C, C), lambda b: (0, 0)),
        pl.BlockSpec((1, C), lambda b: (0, 0)),
        pl.BlockSpec((C, C), lambda b: (0, 0)),
        pl.BlockSpec((1, C), lambda b: (0, 0)),
        pl.BlockSpec((C, C), lambda b: (0, 0)),
        pl.BlockSpec((1, C), lambda b: (0, 0)),
        pl.BlockSpec((nh, N, N), lambda b: (0, 0, 0)),
    ]
    args = [xw, qw, qb, kw, kb, vw, vb,
            p["proj_w"], p["proj_b"].reshape(1, C), bias]
    if has_mask:
        in_specs.append(pl.BlockSpec((nW, N, N), lambda b: (0, 0, 0)))
        args.append(mask.astype(jnp.float32))

    return pl.pallas_call(
        kern,
        out_shape=jax.ShapeDtypeStruct((B, nW, N, C), xw.dtype),
        grid=(B,),
        in_specs=in_specs,
        out_specs=pl.BlockSpec((None, nW, N, C), lambda b: (b, 0, 0, 0)),
        compiler_params=pltpu.CompilerParams(dimension_semantics=("parallel",)),
    )(*args)


def _ln_mlp_kernel(sc_ref, at_ref, g_ref, b_ref, w1_ref, b1_ref, w2_ref, b2_ref,
                   o_ref, *, eps):
    # x = shortcut + attn ; out = x + mlp(norm2(x))
    x = sc_ref[...].astype(jnp.float32) + at_ref[...].astype(jnp.float32)
    h = _layernorm(x, g_ref[...], b_ref[...], eps)
    h = jnp.dot(h, w1_ref[...], preferred_element_type=jnp.float32) + b1_ref[...]
    h = _gelu_exact(h)
    h = jnp.dot(h, w2_ref[...], preferred_element_type=jnp.float32) + b2_ref[...]
    o_ref[...] = (x + h).astype(o_ref.dtype)


def ln_mlp_residual(shortcut, attn, p, eps=1e-5):
    M, C = shortcut.shape
    hid = p["mlp_w1"].shape[1]
    tm = _pick_tile(M)
    kern = functools.partial(_ln_mlp_kernel, eps=eps)
    return pl.pallas_call(
        kern,
        out_shape=jax.ShapeDtypeStruct((M, C), shortcut.dtype),
        grid=(M // tm,),
        in_specs=[
            pl.BlockSpec((tm, C), lambda i: (i, 0)),
            pl.BlockSpec((tm, C), lambda i: (i, 0)),
            pl.BlockSpec((1, C), lambda i: (0, 0)),
            pl.BlockSpec((1, C), lambda i: (0, 0)),
            pl.BlockSpec((C, hid), lambda i: (0, 0)),
            pl.BlockSpec((1, hid), lambda i: (0, 0)),
            pl.BlockSpec((hid, C), lambda i: (0, 0)),
            pl.BlockSpec((1, C), lambda i: (0, 0)),
        ],
        out_specs=pl.BlockSpec((tm, C), lambda i: (i, 0)),
        compiler_params=pltpu.CompilerParams(dimension_semantics=("parallel",)),
    )(shortcut, attn, p["norm2_g"].reshape(1, C), p["norm2_b"].reshape(1, C),
      p["mlp_w1"], p["mlp_b1"].reshape(1, hid), p["mlp_w2"], p["mlp_b2"].reshape(1, C))


def _merge_kernel(x_ref, g_ref, b_ref, w_ref, o_ref, *, eps):
    y = _layernorm(x_ref[...].astype(jnp.float32), g_ref[...], b_ref[...], eps)
    o_ref[...] = jnp.dot(y, w_ref[...],
                         preferred_element_type=jnp.float32).astype(o_ref.dtype)


def ln_reduce(xcat, p, eps=1e-5):
    M, C4 = xcat.shape
    C2 = p["red_w"].shape[1]
    tm = _pick_tile(M)
    kern = functools.partial(_merge_kernel, eps=eps)
    return pl.pallas_call(
        kern,
        out_shape=jax.ShapeDtypeStruct((M, C2), xcat.dtype),
        grid=(M // tm,),
        in_specs=[
            pl.BlockSpec((tm, C4), lambda i: (i, 0)),
            pl.BlockSpec((1, C4), lambda i: (0, 0)),
            pl.BlockSpec((1, C4), lambda i: (0, 0)),
            pl.BlockSpec((C4, C2), lambda i: (0, 0)),
        ],
        out_specs=pl.BlockSpec((tm, C2), lambda i: (i, 0)),
        compiler_params=pltpu.CompilerParams(dimension_semantics=("parallel",)),
    )(xcat, p["norm_g"].reshape(1, C4), p["norm_b"].reshape(1, C4), p["red_w"])


def _tail_kernel(x_ref, g_ref, b_ref, hw_ref, hb_ref, o_ref, *, eps):
    # per batch image: LayerNorm -> mean over tokens -> classifier head
    y = _layernorm(x_ref[...].astype(jnp.float32), g_ref[...], b_ref[...], eps)
    m = jnp.mean(y, axis=0, keepdims=True)                       # (1, C)
    o_ref[...] = (jnp.dot(m, hw_ref[...], preferred_element_type=jnp.float32)
                  + hb_ref[...]).astype(o_ref.dtype)


def norm_mean_head(x, g, b, hw, hb, eps=1e-5):
    B, L, C = x.shape
    ncls = hw.shape[1]
    kern = functools.partial(_tail_kernel, eps=eps)
    out = pl.pallas_call(
        kern,
        out_shape=jax.ShapeDtypeStruct((B, 1, ncls), x.dtype),
        grid=(B,),
        in_specs=[
            pl.BlockSpec((None, L, C), lambda i: (i, 0, 0)),
            pl.BlockSpec((1, C), lambda i: (0, 0)),
            pl.BlockSpec((1, C), lambda i: (0, 0)),
            pl.BlockSpec((C, ncls), lambda i: (0, 0)),
            pl.BlockSpec((1, ncls), lambda i: (0, 0)),
        ],
        out_specs=pl.BlockSpec((None, 1, ncls), lambda i: (i, 0, 0)),
        compiler_params=pltpu.CompilerParams(dimension_semantics=("parallel",)),
    )(x, g.reshape(1, C), b.reshape(1, C), hw, hb.reshape(1, ncls))
    return out[:, 0, :]


# ----------------------------------------------------------------------------
# Static helpers (trace-time constants)
# ----------------------------------------------------------------------------
def rel_pos_index(ws):
    coords = np.stack(np.meshgrid(np.arange(ws), np.arange(ws), indexing="ij"))
    cf = coords.reshape(2, -1)
    rel = cf[:, :, None] - cf[:, None, :]
    rel = rel.transpose(1, 2, 0).astype(np.int64)
    rel[..., 0] += ws - 1
    rel[..., 1] += ws - 1
    rel[..., 0] *= 2 * ws - 1
    return jnp.asarray(rel.sum(-1).astype(np.int32))  # (N, N)


def make_attn_mask(H, W, ws, shift):
    pad_h = math.ceil(H / ws) * ws - H
    pad_w = math.ceil(W / ws) * ws - W
    Hp, Wp = H + pad_h, W + pad_w
    mask = np.zeros((1, Hp, Wp, 1), np.float32)
    h_slices = (slice(0, -ws), slice(-ws, -shift), slice(-shift, None))
    w_slices = (slice(0, -ws), slice(-ws, -shift), slice(-shift, None))
    cnt = 0
    for hs in h_slices:
        for wsl in w_slices:
            mask[:, hs, wsl, :] = cnt
            cnt += 1
    mask = (
        mask.reshape(1, Hp // ws, ws, Wp // ws, ws, 1)
        .transpose(0, 1, 3, 2, 4, 5)
        .reshape(-1, ws * ws)
    )
    am = mask[:, None, :] - mask[:, :, None]
    am = np.where(am != 0, -100.0, 0.0).astype(np.float32)
    return jnp.asarray(am)  # (nW, N, N)


# ----------------------------------------------------------------------------
# Model forward (glue in JAX, compute in the fused Pallas kernels above)
# ----------------------------------------------------------------------------
def patch_embed_fwd(x, p, ps):
    # x is NCHW; stride==kernel conv -> im2col + tiled matmul kernel
    B, Cin, H, W = x.shape
    xp = x.reshape(B, Cin, H // ps, ps, W // ps, ps)
    xp = jnp.transpose(xp, (0, 2, 4, 1, 3, 5)).reshape(
        B * (H // ps) * (W // ps), Cin * ps * ps
    )
    out = linear(xp, p["w"], p["b"])
    return out.reshape(B, (H // ps) * (W // ps), -1)


def swin_block_fwd(x, p, nh, ws, shift, attn_mask, rel_idx):
    # NOTE: the reference torch forward never applies norm1 — reproduced here.
    B, L, C = x.shape
    H = W = int(math.sqrt(L))
    N = ws * ws
    x4 = x.reshape(B, H, W, C)
    shortcut = x4.reshape(B * L, C)

    xs = x4
    if shift > 0:
        xs = jnp.roll(xs, shift=(-shift, -shift), axis=(1, 2))
    pad_h = (ws - H % ws) % ws
    pad_w = (ws - W % ws) % ws
    if pad_h or pad_w:
        xs = jnp.pad(xs, ((0, 0), (0, pad_h), (0, pad_w), (0, 0)))
    Hp, Wp = xs.shape[1], xs.shape[2]
    nW = (Hp // ws) * (Wp // ws)

    # window partition: (B, nW, N, C) — one image's windows per grid step
    xw = xs.reshape(B, Hp // ws, ws, Wp // ws, ws, C)
    xw = jnp.transpose(xw, (0, 1, 3, 2, 4, 5)).reshape(B, nW, N, C)

    # un-broadcast relative-position bias (nh, N, N); shift mask (nW, N, N)
    bias = jnp.take(p["rpb"], rel_idx.reshape(-1), axis=0).reshape(N, N, nh)
    bias = jnp.transpose(bias, (2, 0, 1)).astype(jnp.float32)
    mask = attn_mask  # None when shift == 0 (kernel specializes, no zero-add)

    aw = window_attention(xw, p, nh, bias, mask)           # (B, nW, N, C)

    # window reverse
    aw = aw.reshape(B, Hp // ws, Wp // ws, ws, ws, C)
    xa = jnp.transpose(aw, (0, 1, 3, 2, 4, 5)).reshape(B, Hp, Wp, C)
    if shift > 0:
        xa = jnp.roll(xa, shift=(shift, shift), axis=(1, 2))
    xa = xa[:, :H, :W, :].reshape(B * L, C)

    # fused: (shortcut + attn) -> norm2 -> mlp -> + residual
    out = ln_mlp_residual(shortcut, xa, p)
    return out.reshape(B, L, C)


def patch_merging_fwd(x, p, H, W):
    B, L, C = x.shape
    x = x.reshape(B, H, W, C)
    if H % 2 == 1 or W % 2 == 1:
        x = jnp.pad(x, ((0, 0), (0, H % 2), (0, W % 2), (0, 0)))
    x0 = x[:, 0::2, 0::2, :]
    x1 = x[:, 1::2, 0::2, :]
    x2 = x[:, 0::2, 1::2, :]
    x3 = x[:, 1::2, 1::2, :]
    xcat = jnp.concatenate([x0, x1, x2, x3], axis=-1)
    Bn, Hn, Wn, C4 = xcat.shape
    y = ln_reduce(xcat.reshape(Bn * Hn * Wn, C4), p)        # fused LN + reduction
    return y.reshape(Bn, Hn * Wn, C4 // 2)


def swin_forward(x, params, cfg):
    ps, ws = cfg["patch_size"], cfg["window_size"]
    rel_idx = rel_pos_index(ws)
    x = patch_embed_fwd(x, params["patch_embed"], ps)  # pos_drop(p=0) is identity
    H = W = cfg["img_size"] // ps
    for i, nb in enumerate(cfg["depths"]):
        nh = cfg["num_heads"][i]
        for j in range(nb):
            shift = ws // 2 if (j % 2 == 1) else 0
            if min(H, W) <= ws:
                shift = 0
            mask = make_attn_mask(H, W, ws, shift) if shift > 0 else None
            x = swin_block_fwd(x, params["stages"][i][j], nh, ws, shift, mask, rel_idx)
        if i < len(cfg["depths"]) - 1:
            x = patch_merging_fwd(x, params["merges"][i], H, W)
            H = math.ceil(H / 2)
            W = math.ceil(W / 2)
    # fused final LayerNorm + token-mean + classifier head
    return norm_mean_head(x, params["norm_g"], params["norm_b"],
                          params["head_w"], params["head_b"])


# ----------------------------------------------------------------------------
# Deterministic parameter init
# ----------------------------------------------------------------------------
class KeyGen:
    def __init__(self, seed):
        self.key = jax.random.PRNGKey(seed)

    def __call__(self):
        self.key, k = jax.random.split(self.key)
        return k


def tnormal(k, shape, std=0.02):
    return (std * jax.random.truncated_normal(k, -2.0, 2.0, shape)).astype(jnp.float32)


def init_params(cfg, kg):
    f32 = jnp.float32
    Cin, ps, ed, ws = cfg["in_channels"], cfg["patch_size"], cfg["embed_dim"], cfg["window_size"]
    params = {
        "patch_embed": dict(
            w=tnormal(kg(), (Cin * ps * ps, ed)), b=jnp.zeros((ed,), f32)
        )
    }
    dim = ed
    stages, merges = [], []
    for i, nb in enumerate(cfg["depths"]):
        nh = cfg["num_heads"][i]
        hidden = int(dim * cfg["mlp_ratio"])
        blocks = []
        for _ in range(nb):
            blocks.append(
                dict(
                    qkv_w=tnormal(kg(), (dim, 3 * dim)),
                    qkv_b=jnp.zeros((3 * dim,), f32),
                    proj_w=tnormal(kg(), (dim, dim)),
                    proj_b=jnp.zeros((dim,), f32),
                    rpb=tnormal(kg(), ((2 * ws - 1) ** 2, nh)),
                    norm2_g=jnp.ones((dim,), f32),
                    norm2_b=jnp.zeros((dim,), f32),
                    mlp_w1=tnormal(kg(), (dim, hidden)),
                    mlp_b1=jnp.zeros((hidden,), f32),
                    mlp_w2=tnormal(kg(), (hidden, dim)),
                    mlp_b2=jnp.zeros((dim,), f32),
                )
            )
        stages.append(blocks)
        if i < len(cfg["depths"]) - 1:
            merges.append(
                dict(
                    norm_g=jnp.ones((4 * dim,), f32),
                    norm_b=jnp.zeros((4 * dim,), f32),
                    red_w=tnormal(kg(), (4 * dim, 2 * dim)),
                )
            )
            dim *= 2
    params["stages"] = stages
    params["merges"] = merges
    params["norm_g"] = jnp.ones((dim,), f32)
    params["norm_b"] = jnp.zeros((dim,), f32)
    params["head_w"] = tnormal(kg(), (dim, cfg["num_classes"]))
    params["head_b"] = jnp.zeros((cfg["num_classes"],), f32)
    return params


# ----------------------------------------------------------------------------
# Main
# ----------------------------------------------------------------------------
if __name__ == "__main__":
    cfg = dict(
        img_size=32,
        patch_size=4,
        in_channels=4,
        num_classes=10,
        embed_dim=32,
        depths=[2, 2],
        num_heads=[2, 4],
        window_size=4,
        mlp_ratio=2.0,
        dropout=0.0,  # dropout=0 -> all Dropout layers are identity
    )

    kg = KeyGen(0)
    params = init_params(cfg, kg)

    x = jax.random.normal(
        jax.random.PRNGKey(0), (2, cfg["in_channels"], 32, 32), jnp.float32
    )

    fwd = jax.jit(lambda inp: swin_forward(inp, params, cfg))
    logits = fwd(x)
    logits = jax.block_until_ready(logits)

    assert logits.shape == (2, cfg["num_classes"]), logits.shape
    assert bool(jnp.all(jnp.isfinite(logits)))
    print("KERNEL_OK")
</pallas_src>

<mosaic_0001>
module attributes {stable_mosaic.version = 11 : i64} {
  func.func @_linear_kernel(%arg0: i32, %arg1: memref<64x64xf32, #tpu.memory_space<vmem>>, %arg2: memref<64x32xf32, #tpu.memory_space<vmem>>, %arg3: memref<1x32xf32, #tpu.memory_space<vmem>>, %arg4: memref<64x32xf32, #tpu.memory_space<vmem>>) attributes {dimension_semantics = [#tpu.dimension_semantics<parallel>], iteration_bounds = array<i64: 2>, scalar_prefetch = 0 : i64, scratch_operands = 0 : i64, tpu.core_type = #tpu.core_type<tc>, window_params = [{transform_indices = @transform_0, window_bounds = array<i64: 64, 64>}, {pipeline_mode = #tpu.pipeline_mode<synchronous>, transform_indices = @transform_1, window_bounds = array<i64: 64, 32>}, {pipeline_mode = #tpu.pipeline_mode<synchronous>, transform_indices = @transform_2, window_bounds = array<i64: 1, 32>}, {transform_indices = @transform_3, window_bounds = array<i64: 64, 32>}]} {
    %c0 = arith.constant 0 : index
    %c0_0 = arith.constant 0 : index
    %0 = vector.load %arg1[%c0, %c0_0] : memref<64x64xf32, #tpu.memory_space<vmem>>, vector<64x64xf32>
    %c0_1 = arith.constant 0 : index
    %c0_2 = arith.constant 0 : index
    %1 = vector.load %arg2[%c0_1, %c0_2] : memref<64x32xf32, #tpu.memory_space<vmem>>, vector<64x32xf32>
    %cst = arith.constant dense<0.000000e+00> : vector<64x32xf32>
    %2 = tpu.matmul %0, %1, %cst {dimension_numbers = #tpu.dot_dimension_numbers<[1], [0], [0], [1], [0, 0, 1, 1], [], []>} : vector<64x64xf32>, vector<64x32xf32>, vector<64x32xf32> -> vector<64x32xf32>
    %c0_3 = arith.constant 0 : index
    %c0_4 = arith.constant 0 : index
    %3 = vector.load %arg3[%c0_3, %c0_4] : memref<1x32xf32, #tpu.memory_space<vmem>>, vector<1x32xf32>
    %4 = vector.broadcast %3 : vector<1x32xf32> to vector<64x32xf32>
    %5 = arith.addf %2, %4 : vector<64x32xf32>
    %c0_5 = arith.constant 0 : index
    %c0_6 = arith.constant 0 : index
    %6 = vector.load %arg4[%c0_5, %c0_6] : memref<64x32xf32, #tpu.memory_space<vmem>>, vector<64x32xf32>
    tpu.vector_store %arg4[%c0_5, %c0_6], %5 {strides = array<i32>} : memref<64x32xf32, #tpu.memory_space<vmem>>, vector<64x32xf32>,
    return
  }
  func.func @transform_0(%arg0: i32) -> (i32, i32) {
    %c0_i32 = arith.constant 0 : i32
    %c0_i32_0 = arith.constant 0 : i32
    return %arg0, %c0_i32 : i32, i32
  }
  func.func @transform_1(%arg0: i32) -> (i32, i32) {
    %c0_i32 = arith.constant 0 : i32
    %c0_i32_0 = arith.constant 0 : i32
    %c0_i32_1 = arith.constant 0 : i32
    return %c0_i32, %c0_i32_0 : i32, i32
  }
  func.func @transform_2(%arg0: i32) -> (i32, i32) {
    %c0_i32 = arith.constant 0 : i32
    %c0_i32_0 = arith.constant 0 : i32
    %c0_i32_1 = arith.constant 0 : i32
    return %c0_i32, %c0_i32_0 : i32, i32
  }
  func.func @transform_3(%arg0: i32) -> (i32, i32) {
    %c0_i32 = arith.constant 0 : i32
    %c0_i32_0 = arith.constant 0 : i32
    return %arg0, %c0_i32 : i32, i32
  }
}

module attributes {stable_mosaic.version = 11 : i64} {
  func.func @_ln_mlp_kernel(%arg0: i32, %arg1: memref<64x32xf32, #tpu.memory_space<vmem>>, %arg2: memref<64x32xf32, #tpu.memory_space<vmem>>, %arg3: memref<1x32xf32, #tpu.memory_space<vmem>>, %arg4: memref<1x32xf32, #tpu.memory_space<vmem>>, %arg5: memref<32x64xf32, #tpu.memory_space<vmem>>, %arg6: memref<1x64xf32, #tpu.memory_space<vmem>>, %arg7: memref<64x32xf32, #tpu.memory_space<vmem>>, %arg8: memref<1x32xf32, #tpu.memory_space<vmem>>, %arg9: memref<64x32xf32, #tpu.memory_space<vmem>>) attributes {dimension_semantics = [#tpu.dimension_semantics<parallel>], iteration_bounds = array<i64: 2>, scalar_prefetch = 0 : i64, scratch_operands = 0 : i64, tpu.core_type = #tpu.core_type<tc>, window_params = [{transform_indices = @transform_0, window_bounds = array<i64: 64, 32>}, {transform_indices = @transform_1, window_bounds = array<i64: 64, 32>}, {pipeline_mode = #tpu.pipeline_mode<synchronous>, transform_indices = @transform_2, window_bounds = array<i64: 1, 32>}, {pipeline_mode = #tpu.pipeline_mode<synchronous>, transform_indices = @transform_3, window_bounds = array<i64: 1, 32>}, {pipeline_mode = #tpu.pipeline_mode<synchronous>, transform_indices = @transform_4, window_bounds = array<i64: 32, 64>}, {pipeline_mode = #tpu.pipeline_mode<synchronous>, transform_indices = @transform_5, window_bounds = array<i64: 1, 64>}, {pipeline_mode = #tpu.pipeline_mode<synchronous>, transform_indices = @transform_6, window_bounds = array<i64: 64, 32>}, {pipeline_mode = #tpu.pipeline_mode<synchronous>, transform_indices = @transform_7, window_bounds = array<i64: 1, 32>}, {transform_indices = @transform_8, window_bounds = array<i64: 64, 32>}]} {
    %c0 = arith.constant 0 : index
    %c0_0 = arith.constant 0 : index
    %0 = vector.load %arg1[%c0, %c0_0] : memref<64x32xf32, #tpu.memory_space<vmem>>, vector<64x32xf32>
    %c0_1 = arith.constant 0 : index
    %c0_2 = arith.constant 0 : index
    %1 = vector.load %arg2[%c0_1, %c0_2] : memref<64x32xf32, #tpu.memory_space<vmem>>, vector<64x32xf32>
    %2 = arith.addf %0, %1 : vector<64x32xf32>
    %c0_3 = arith.constant 0 : index
    %c0_4 = arith.constant 0 : index
    %3 = vector.load %arg3[%c0_3, %c0_4] : memref<1x32xf32, #tpu.memory_space<vmem>>, vector<1x32xf32>
    %c0_5 = arith.constant 0 : index
    %c0_6 = arith.constant 0 : index
    %4 = vector.load %arg4[%c0_5, %c0_6] : memref<1x32xf32, #tpu.memory_space<vmem>>, vector<1x32xf32>
    %cst = arith.constant dense<0.000000e+00> : vector<64xf32>
    %5 = vector.multi_reduction <add>, %2, %cst [1] : vector<64x32xf32> to vector<64xf32>
    %6 = vector.shape_cast %5 : vector<64xf32> to vector<64x1xf32>
    %cst_7 = arith.constant 3.200000e+01 : f32
    %7 = vector.broadcast %cst_7 : f32 to vector<64x1xf32>
    %8 = arith.divf %6, %7 : vector<64x1xf32>
    %9 = vector.broadcast %8 : vector<64x1xf32> to vector<64x32xf32>
    %10 = arith.subf %2, %9 : vector<64x32xf32>
    %11 = arith.mulf %10, %10 : vector<64x32xf32>
    %cst_8 = arith.constant dense<0.000000e+00> : vector<64xf32>
    %12 = vector.multi_reduction <add>, %11, %cst_8 [1] : vector<64x32xf32> to vector<64xf32>
    %13 = vector.shape_cast %12 : vector<64xf32> to vector<64x1xf32>
    %cst_9 = arith.constant 3.200000e+01 : f32
    %14 = vector.broadcast %cst_9 : f32 to vector<64x1xf32>
    %15 = arith.divf %13, %14 : vector<64x1xf32>
    %cst_10 = arith.constant 9.99999974E-6 : f32
    %16 = vector.broadcast %cst_10 : f32 to vector<64x1xf32>
    %17 = arith.addf %15, %16 : vector<64x1xf32>
    %18 = math.rsqrt %17 : vector<64x1xf32>
    %19 = vector.broadcast %18 : vector<64x1xf32> to vector<64x32xf32>
    %20 = arith.mulf %10, %19 : vector<64x32xf32>
    %21 = vector.broadcast %3 : vector<1x32xf32> to vector<64x32xf32>
    %22 = arith.mulf %20, %21 : vector<64x32xf32>
    %23 = vector.broadcast %4 : vector<1x32xf32> to vector<64x32xf32>
    %24 = arith.addf %22, %23 : vector<64x32xf32>
    %c0_11 = arith.constant 0 : index
    %c0_12 = arith.constant 0 : index
    %25 = vector.load %arg5[%c0_11, %c0_12] : memref<32x64xf32, #tpu.memory_space<vmem>>, vector<32x64xf32>
    %cst_13 = arith.constant dense<0.000000e+00> : vector<64x64xf32>
    %26 = tpu.matmul %24, %25, %cst_13 {dimension_numbers = #tpu.dot_dimension_numbers<[1], [0], [0], [1], [0, 0, 1, 1], [], []>} : vector<64x32xf32>, vector<32x64xf32>, vector<64x64xf32> -> vector<64x64xf32>
    %c0_14 = arith.constant 0 : index
    %c0_15 = arith.constant 0 : index
    %27 = vector.load %arg6[%c0_14, %c0_15] : memref<1x64xf32, #tpu.memory_space<vmem>>, vector<1x64xf32>
    %28 = vector.broadcast %27 : vector<1x64xf32> to vector<64x64xf32>
    %29 = arith.addf %26, %28 : vector<64x64xf32>
    %cst_16 = arith.constant 5.000000e-01 : f32
    %30 = vector.broadcast %cst_16 : f32 to vector<64x64xf32>
    %31 = arith.mulf %30, %29 : vector<64x64xf32>
    %cst_17 = arith.constant 0.707106769 : f32
    %32 = vector.broadcast %cst_17 : f32 to vector<64x64xf32>
    %33 = arith.mulf %29, %32 : vector<64x64xf32>
    %34 = math.absf %33 : vector<64x64xf32>
    %cst_18 = arith.constant 0.327591091 : f32
    %35 = vector.broadcast %cst_18 : f32 to vector<64x64xf32>
    %36 = arith.mulf %35, %34 : vector<64x64xf32>
    %cst_19 = arith.constant 1.000000e+00 : f32
    %37 = vector.broadcast %cst_19 : f32 to vector<64x64xf32>
    %38 = arith.addf %37, %36 : vector<64x64xf32>
    %cst_20 = arith.constant 1.000000e+00 : f32
    %39 = vector.broadcast %cst_20 : f32 to vector<64x64xf32>
    %40 = arith.divf %39, %38 : vector<64x64xf32>
    %cst_21 = arith.constant 1.06140542 : f32
    %41 = vector.broadcast %cst_21 : f32 to vector<64x64xf32>
    %42 = arith.mulf %41, %40 : vector<64x64xf32>
    %cst_22 = arith.constant -1.45315206 : f32
    %43 = vector.broadcast %cst_22 : f32 to vector<64x64xf32>
    %44 = arith.addf %42, %43 : vector<64x64xf32>
    %45 = arith.mulf %44, %40 : vector<64x64xf32>
    %cst_23 = arith.constant 1.42141378 : f32
    %46 = vector.broadcast %cst_23 : f32 to vector<64x64xf32>
    %47 = arith.addf %45, %46 : vector<64x64xf32>
    %48 = arith.mulf %47, %40 : vector<64x64xf32>
    %cst_24 = arith.constant -0.284496725 : f32
    %49 = vector.broadcast %cst_24 : f32 to vector<64x64xf32>
    %50 = arith.addf %48, %49 : vector<64x64xf32>
    %51 = arith.mulf %50, %40 : vector<64x64xf32>
    %cst_25 = arith.constant 0.254829586 : f32
    %52 = vector.broadcast %cst_25 : f32 to vector<64x64xf32>
    %53 = arith.addf %51, %52 : vector<64x64xf32>
    %54 = arith.mulf %53, %40 : vector<64x64xf32>
    %cst_26 = arith.constant 0.000000e+00 : f32
    %55 = vector.broadcast %cst_26 : f32 to vector<64x64xf32>
    %56 = arith.subf %55, %34 : vector<64x64xf32>
    %57 = arith.mulf %56, %34 : vector<64x64xf32>
    %58 = math.exp %57 : vector<64x64xf32>
    %59 = arith.mulf %54, %58 : vector<64x64xf32>
    %cst_27 = arith.constant 1.000000e+00 : f32
    %60 = vector.broadcast %cst_27 : f32 to vector<64x64xf32>
    %61 = arith.subf %60, %59 : vector<64x64xf32>
    %cst_28 = arith.constant 0.000000e+00 : f32
    %62 = vector.broadcast %cst_28 : f32 to vector<64x64xf32>
    %63 = arith.cmpf oge, %33, %62 : vector<64x64xf32>
    %cst_29 = arith.constant 0.000000e+00 : f32
    %64 = vector.broadcast %cst_29 : f32 to vector<64x64xf32>
    %65 = arith.subf %64, %61 : vector<64x64xf32>
    %66 = arith.select %63, %61, %65 : vector<64x64xi1>, vector<64x64xf32>
    %cst_30 = arith.constant 1.000000e+00 : f32
    %67 = vector.broadcast %cst_30 : f32 to vector<64x64xf32>
    %68 = arith.addf %67, %66 : vector<64x64xf32>
    %69 = arith.mulf %31, %68 : vector<64x64xf32>
    %c0_31 = arith.constant 0 : index
    %c0_32 = arith.constant 0 : index
    %70 = vector.load %arg7[%c0_31, %c0_32] : memref<64x32xf32, #tpu.memory_space<vmem>>, vector<64x32xf32>
    %cst_33 = arith.constant dense<0.000000e+00> : vector<64x32xf32>
    %71 = tpu.matmul %69, %70, %cst_33 {dimension_numbers = #tpu.dot_dimension_numbers<[1], [0], [0], [1], [0, 0, 1, 1], [], []>} : vector<64x64xf32>, vector<64x32xf32>, vector<64x32xf32> -> vector<64x32xf32>
    %c0_34 = arith.constant 0 : index
    %c0_35 = arith.constant 0 : index
    %72 = vector.load %arg8[%c0_34, %c0_35] : memref<1x32xf32, #tpu.memory_space<vmem>>, vector<1x32xf32>
    %73 = vector.broadcast %72 : vector<1x32xf32> to vector<64x32xf32>
    %74 = arith.addf %71, %73 : vector<64x32xf32>
    %75 = arith.addf %2, %74 : vector<64x32xf32>
    %c0_36 = arith.constant 0 : index
    %c0_37 = arith.constant 0 : index
    %76 = vector.load %arg9[%c0_36, %c0_37] : memref<64x32xf32, #tpu.memory_space<vmem>>, vector<64x32xf32>
    tpu.vector_store %arg9[%c0_36, %c0_37], %75 {strides = array<i32>} : memref<64x32xf32, #tpu.memory_space<vmem>>, vector<64x32xf32>,
    return
  }
  func.func @transform_0(%arg0: i32) -> (i32, i32) {
    %c0_i32 = arith.constant 0 : i32
    %c0_i32_0 = arith.constant 0 : i32
    return %arg0, %c0_i32 : i32, i32
  }
  func.func @transform_1(%arg0: i32) -> (i32, i32) {
    %c0_i32 = arith.constant 0 : i32
    %c0_i32_0 = arith.constant 0 : i32
    return %arg0, %c0_i32 : i32, i32
  }
  func.func @transform_2(%arg0: i32) -> (i32, i32) {
    %c0_i32 = arith.constant 0 : i32
    %c0_i32_0 = arith.constant 0 : i32
    %c0_i32_1 = arith.constant 0 : i32
    return %c0_i32, %c0_i32_0 : i32, i32
  }
  func.func @transform_3(%arg0: i32) -> (i32, i32) {
    %c0_i32 = arith.constant 0 : i32
    %c0_i32_0 = arith.constant 0 : i32
    %c0_i32_1 = arith.constant 0 : i32
    return %c0_i32, %c0_i32_0 : i32, i32
  }
  func.func @transform_4(%arg0: i32) -> (i32, i32) {
    %c0_i32 = arith.constant 0 : i32
    %c0_i32_0 = arith.constant 0 : i32
    %c0_i32_1 = arith.constant 0 : i32
    return %c0_i32, %c0_i32_0 : i32, i32
  }
  func.func @transform_5(%arg0: i32) -> (i32, i32) {
    %c0_i32 = arith.constant 0 : i32
    %c0_i32_0 = arith.constant 0 : i32
    %c0_i32_1 = arith.constant 0 : i32
    return %c0_i32, %c0_i32_0 : i32, i32
  }
  func.func @transform_6(%arg0: i32) -> (i32, i32) {
    %c0_i32 = arith.constant 0 : i32
    %c0_i32_0 = arith.constant 0 : i32
    %c0_i32_1 = arith.constant 0 : i32
    return %c0_i32, %c0_i32_0 : i32, i32
  }
  func.func @transform_7(%arg0: i32) -> (i32, i32) {
    %c0_i32 = arith.constant 0 : i32
    %c0_i32_0 = arith.constant 0 : i32
    %c0_i32_1 = arith.constant 0 : i32
    return %c0_i32, %c0_i32_0 : i32, i32
  }
  func.func @transform_8(%arg0: i32) -> (i32, i32) {
    %c0_i32 = arith.constant 0 : i32
    %c0_i32_0 = arith.constant 0 : i32
    return %arg0, %c0_i32 : i32, i32
  }
}

module attributes {stable_mosaic.version = 11 : i64} {
  func.func @_win_attn_kernel(%arg0: i32, %arg1: memref<1x4x16x32xf32, #tpu.memory_space<vmem>>, %arg2: memref<32x32xf32, #tpu.memory_space<vmem>>, %arg3: memref<1x32xf32, #tpu.memory_space<vmem>>, %arg4: memref<32x32xf32, #tpu.memory_space<vmem>>, %arg5: memref<1x32xf32, #tpu.memory_space<vmem>>, %arg6: memref<32x32xf32, #tpu.memory_space<vmem>>, %arg7: memref<1x32xf32, #tpu.memory_space<vmem>>, %arg8: memref<32x32xf32, #tpu.memory_space<vmem>>, %arg9: memref<1x32xf32, #tpu.memory_space<vmem>>, %arg10: memref<2x16x16xf32, #tpu.memory_space<vmem>>, %arg11: memref<1x4x16x32xf32, #tpu.memory_space<vmem>>) attributes {dimension_semantics = [#tpu.dimension_semantics<parallel>], iteration_bounds = array<i64: 2>, scalar_prefetch = 0 : i64, scratch_operands = 0 : i64, tpu.core_type = #tpu.core_type<tc>, window_params = [{transform_indices = @transform_0, window_bounds = array<i64: 1, 4, 16, 32>}, {pipeline_mode = #tpu.pipeline_mode<synchronous>, transform_indices = @transform_1, window_bounds = array<i64: 32, 32>}, {pipeline_mode = #tpu.pipeline_mode<synchronous>, transform_indices = @transform_2, window_bounds = array<i64: 1, 32>}, {pipeline_mode = #tpu.pipeline_mode<synchronous>, transform_indices = @transform_3, window_bounds = array<i64: 32, 32>}, {pipeline_mode = #tpu.pipeline_mode<synchronous>, transform_indices = @transform_4, window_bounds = array<i64: 1, 32>}, {pipeline_mode = #tpu.pipeline_mode<synchronous>, transform_indices = @transform_5, window_bounds = array<i64: 32, 32>}, {pipeline_mode = #tpu.pipeline_mode<synchronous>, transform_indices = @transform_6, window_bounds = array<i64: 1, 32>}, {pipeline_mode = #tpu.pipeline_mode<synchronous>, transform_indices = @transform_7, window_bounds = array<i64: 32, 32>}, {pipeline_mode = #tpu.pipeline_mode<synchronous>, transform_indices = @transform_8, window_bounds = array<i64: 1, 32>}, {pipeline_mode = #tpu.pipeline_mode<synchronous>, transform_indices = @transform_9, window_bounds = array<i64: 2, 16, 16>}, {transform_indices = @transform_10, window_bounds = array<i64: 1, 4, 16, 32>}]} {
    %c0 = arith.constant 0 : index
    %c0_0 = arith.constant 0 : index
    %c0_1 = arith.constant 0 : index
    %c0_2 = arith.constant 0 : index
    %0 = vector.load %arg1[%c0, %c0_0, %c0_1, %c0_2] : memref<1x4x16x32xf32, #tpu.memory_space<vmem>>, vector<1x4x16x32xf32>
    %1 = vector.shape_cast %0 : vector<1x4x16x32xf32> to vector<4x16x32xf32>
    %2 = vector.shape_cast %1 : vector<4x16x32xf32> to vector<64x32xf32>
    %c0_3 = arith.constant 0 : index
    %c0_4 = arith.constant 0 : index
    %3 = vector.load %arg2[%c0_3, %c0_4] : memref<32x32xf32, #tpu.memory_space<vmem>>, vector<32x32xf32>
    %cst = arith.constant dense<0.000000e+00> : vector<64x32xf32>
    %4 = tpu.matmul %2, %3, %cst {dimension_numbers = #tpu.dot_dimension_numbers<[1], [0], [0], [1], [0, 0, 1, 1], [], []>} : vector<64x32xf32>, vector<32x32xf32>, vector<64x32xf32> -> vector<64x32xf32>
    %c0_5 = arith.constant 0 : index
    %c0_6 = arith.constant 0 : index
    %5 = vector.load %arg3[%c0_5, %c0_6] : memref<1x32xf32, #tpu.memory_space<vmem>>, vector<1x32xf32>
    %6 = vector.broadcast %5 : vector<1x32xf32> to vector<64x32xf32>
    %7 = arith.addf %4, %6 : vector<64x32xf32>
    %8 = vector.shape_cast %7 : vector<64x32xf32> to vector<4x16x32xf32>
    %c0_7 = arith.constant 0 : index
    %c0_8 = arith.constant 0 : index
    %9 = vector.load %arg4[%c0_7, %c0_8] : memref<32x32xf32, #tpu.memory_space<vmem>>, vector<32x32xf32>
    %cst_9 = arith.constant dense<0.000000e+00> : vector<64x32xf32>
    %10 = tpu.matmul %2, %9, %cst_9 {dimension_numbers = #tpu.dot_dimension_numbers<[1], [0], [0], [1], [0, 0, 1, 1], [], []>} : vector<64x32xf32>, vector<32x32xf32>, vector<64x32xf32> -> vector<64x32xf32>
    %c0_10 = arith.constant 0 : index
    %c0_11 = arith.constant 0 : index
    %11 = vector.load %arg5[%c0_10, %c0_11] : memref<1x32xf32, #tpu.memory_space<vmem>>, vector<1x32xf32>
    %12 = vector.broadcast %11 : vector<1x32xf32> to vector<64x32xf32>
    %13 = arith.addf %10, %12 : vector<64x32xf32>
    %14 = vector.shape_cast %13 : vector<64x32xf32> to vector<4x16x32xf32>
    %c0_12 = arith.constant 0 : index
    %c0_13 = arith.constant 0 : index
    %15 = vector.load %arg6[%c0_12, %c0_13] : memref<32x32xf32, #tpu.memory_space<vmem>>, vector<32x32xf32>
    %cst_14 = arith.constant dense<0.000000e+00> : vector<64x32xf32>
    %16 = tpu.matmul %2, %15, %cst_14 {dimension_numbers = #tpu.dot_dimension_numbers<[1], [0], [0], [1], [0, 0, 1, 1], [], []>} : vector<64x32xf32>, vector<32x32xf32>, vector<64x32xf32> -> vector<64x32xf32>
    %c0_15 = arith.constant 0 : index
    %c0_16 = arith.constant 0 : index
    %17 = vector.load %arg7[%c0_15, %c0_16] : memref<1x32xf32, #tpu.memory_space<vmem>>, vector<1x32xf32>
    %18 = vector.broadcast %17 : vector<1x32xf32> to vector<64x32xf32>
    %19 = arith.addf %16, %18 : vector<64x32xf32>
    %20 = vector.shape_cast %19 : vector<64x32xf32> to vector<4x16x32xf32>
    %c0_17 = arith.constant 0 : index
    %c0_18 = arith.constant 0 : index
    %c0_19 = arith.constant 0 : index
    %21 = vector.load %arg10[%c0_17, %c0_18, %c0_19] : memref<2x16x16xf32, #tpu.memory_space<vmem>>, vector<2x16x16xf32>
    %22 = vector.extract_strided_slice %8 {offsets = [0, 0, 0], sizes = [4, 16, 16], strides = [1, 1, 1]} : vector<4x16x32xf32> to vector<4x16x16xf32>
    %23 = vector.extract_strided_slice %14 {offsets = [0, 0, 0], sizes = [4, 16, 16], strides = [1, 1, 1]} : vector<4x16x32xf32> to vector<4x16x16xf32>
    "tpu.trace_start"() <{level = 10 : i32, message = "wqd,wkd->wqk"}> : () -> ()
    %cst_20 = arith.constant dense<0.000000e+00> : vector<4x16x16xf32>
    %24 = tpu.matmul %22, %23, %cst_20 {dimension_numbers = #tpu.dot_dimension_numbers<[2], [2], [1], [1], [0, 0, 0, 1, 1, 1], [0], [0]>} : vector<4x16x16xf32>, vector<4x16x16xf32>, vector<4x16x16xf32> -> vector<4x16x16xf32>
    "tpu.trace_stop"() : () -> ()
    %cst_21 = arith.constant 2.500000e-01 : f32
    %25 = vector.broadcast %cst_21 : f32 to vector<4x16x16xf32>
    %26 = arith.mulf %24, %25 : vector<4x16x16xf32>
    %27 = vector.extract_strided_slice %21 {offsets = [0, 0, 0], sizes = [1, 16, 16], strides = [1, 1, 1]} : vector<2x16x16xf32> to vector<1x16x16xf32>
    %28 = vector.shape_cast %27 : vector<1x16x16xf32> to vector<16x16xf32>
    %29 = vector.shape_cast %28 : vector<16x16xf32> to vector<1x16x16xf32>
    %30 = vector.broadcast %29 : vector<1x16x16xf32> to vector<4x16x16xf32>
    %31 = arith.addf %26, %30 : vector<4x16x16xf32>
    %cst_22 = arith.constant dense<0xFF800000> : vector<4x16xf32>
    %32 = vector.multi_reduction <maximumf>, %31, %cst_22 [2] : vector<4x16x16xf32> to vector<4x16xf32>
    %33 = vector.shape_cast %32 : vector<4x16xf32> to vector<4x16x1xf32>
    %34 = vector.broadcast %33 : vector<4x16x1xf32> to vector<4x16x16xf32>
    %35 = arith.subf %31, %34 : vector<4x16x16xf32>
    %36 = math.exp %35 : vector<4x16x16xf32>
    %cst_23 = arith.constant dense<0.000000e+00> : vector<4x16xf32>
    %37 = vector.multi_reduction <add>, %36, %cst_23 [2] : vector<4x16x16xf32> to vector<4x16xf32>
    %38 = vector.shape_cast %37 : vector<4x16xf32> to vector<4x16x1xf32>
    %39 = tpu.reciprocal %38 {approx = true} : vector<4x16x1xf32> -> vector<4x16x1xf32>
    %40 = vector.broadcast %39 : vector<4x16x1xf32> to vector<4x16x16xf32>
    %41 = arith.mulf %36, %40 : vector<4x16x16xf32>
    %42 = vector.extract_strided_slice %20 {offsets = [0, 0, 0], sizes = [4, 16, 16], strides = [1, 1, 1]} : vector<4x16x32xf32> to vector<4x16x16xf32>
    "tpu.trace_start"() <{level = 10 : i32, message = "wqk,wkd->wqd"}> : () -> ()
    %cst_24 = arith.constant dense<0.000000e+00> : vector<4x16x16xf32>
    %43 = tpu.matmul %41, %42, %cst_24 {dimension_numbers = #tpu.dot_dimension_numbers<[2], [1], [1], [2], [0, 0, 0, 1, 1, 2], [0], [0]>} : vector<4x16x16xf32>, vector<4x16x16xf32>, vector<4x16x16xf32> -> vector<4x16x16xf32>
    "tpu.trace_stop"() : () -> ()
    %44 = vector.extract_strided_slice %8 {offsets = [0, 0, 16], sizes = [4, 16, 16], strides = [1, 1, 1]} : vector<4x16x32xf32> to vector<4x16x16xf32>
    %45 = vector.extract_strided_slice %14 {offsets = [0, 0, 16], sizes = [4, 16, 16], strides = [1, 1, 1]} : vector<4x16x32xf32> to vector<4x16x16xf32>
    "tpu.trace_start"() <{level = 10 : i32, message = "wqd,wkd->wqk"}> : () -> ()
    %cst_25 = arith.constant dense<0.000000e+00> : vector<4x16x16xf32>
    %46 = tpu.matmul %44, %45, %cst_25 {dimension_numbers = #tpu.dot_dimension_numbers<[2], [2], [1], [1], [0, 0, 0, 1, 1, 1], [0], [0]>} : vector<4x16x16xf32>, vector<4x16x16xf32>, vector<4x16x16xf32> -> vector<4x16x16xf32>
    "tpu.trace_stop"() : () -> ()
    %cst_26 = arith.constant 2.500000e-01 : f32
    %47 = vector.broadcast %cst_26 : f32 to vector<4x16x16xf32>
    %48 = arith.mulf %46, %47 : vector<4x16x16xf32>
    %49 = vector.extract_strided_slice %21 {offsets = [1, 0, 0], sizes = [1, 16, 16], strides = [1, 1, 1]} : vector<2x16x16xf32> to vector<1x16x16xf32>
    %50 = vector.shape_cast %49 : vector<1x16x16xf32> to vector<16x16xf32>
    %51 = vector.shape_cast %50 : vector<16x16xf32> to vector<1x16x16xf32>
    %52 = vector.broadcast %51 : vector<1x16x16xf32> to vector<4x16x16xf32>
    %53 = arith.addf %48, %52 : vector<4x16x16xf32>
    %cst_27 = arith.constant dense<0xFF800000> : vector<4x16xf32>
    %54 = vector.multi_reduction <maximumf>, %53, %cst_27 [2] : vector<4x16x16xf32> to vector<4x16xf32>
    %55 = vector.shape_cast %54 : vector<4x16xf32> to vector<4x16x1xf32>
    %56 = vector.broadcast %55 : vector<4x16x1xf32> to vector<4x16x16xf32>
    %57 = arith.subf %53, %56 : vector<4x16x16xf32>
    %58 = math.exp %57 : vector<4x16x16xf32>
    %cst_28 = arith.constant dense<0.000000e+00> : vector<4x16xf32>
    %59 = vector.multi_reduction <add>, %58, %cst_28 [2] : vector<4x16x16xf32> to vector<4x16xf32>
    %60 = vector.shape_cast %59 : vector<4x16xf32> to vector<4x16x1xf32>
    %61 = tpu.reciprocal %60 {approx = true} : vector<4x16x1xf32> -> vector<4x16x1xf32>
    %62 = vector.broadcast %61 : vector<4x16x1xf32> to vector<4x16x16xf32>
    %63 = arith.mulf %58, %62 : vector<4x16x16xf32>
    %64 = vector.extract_strided_slice %20 {offsets = [0, 0, 16], sizes = [4, 16, 16], strides = [1, 1, 1]} : vector<4x16x32xf32> to vector<4x16x16xf32>
    "tpu.trace_start"() <{level = 10 : i32, message = "wqk,wkd->wqd"}> : () -> ()
    %cst_29 = arith.constant dense<0.000000e+00> : vector<4x16x16xf32>
    %65 = tpu.matmul %63, %64, %cst_29 {dimension_numbers = #tpu.dot_dimension_numbers<[2], [1], [1], [2], [0, 0, 0, 1, 1, 2], [0], [0]>} : vector<4x16x16xf32>, vector<4x16x16xf32>, vector<4x16x16xf32> -> vector<4x16x16xf32>
    "tpu.trace_stop"() : () -> ()
    %66 = tpu.concatenate %43, %65 in 2 : vector<4x16x16xf32>, vector<4x16x16xf32> -> vector<4x16x32xf32>
    %67 = vector.shape_cast %66 : vector<4x16x32xf32> to vector<64x32xf32>
    %c0_30 = arith.constant 0 : index
    %c0_31 = arith.constant 0 : index
    %68 = vector.load %arg8[%c0_30, %c0_31] : memref<32x32xf32, #tpu.memory_space<vmem>>, vector<32x32xf32>
    %cst_32 = arith.constant dense<0.000000e+00> : vector<64x32xf32>
    %69 = tpu.matmul %67, %68, %cst_32 {dimension_numbers = #tpu.dot_dimension_numbers<[1], [0], [0], [1], [0, 0, 1, 1], [], []>} : vector<64x32xf32>, vector<32x32xf32>, vector<64x32xf32> -> vector<64x32xf32>
    %c0_33 = arith.constant 0 : index
    %c0_34 = arith.constant 0 : index
    %70 = vector.load %arg9[%c0_33, %c0_34] : memref<1x32xf32, #tpu.memory_space<vmem>>, vector<1x32xf32>
    %71 = vector.broadcast %70 : vector<1x32xf32> to vector<64x32xf32>
    %72 = arith.addf %69, %71 : vector<64x32xf32>
    %73 = vector.shape_cast %72 : vector<64x32xf32> to vector<4x16x32xf32>
    %c0_35 = arith.constant 0 : index
    %c0_36 = arith.constant 0 : index
    %c0_37 = arith.constant 0 : index
    %c0_38 = arith.constant 0 : index
    %74 = vector.load %arg11[%c0_35, %c0_36, %c0_37, %c0_38] : memref<1x4x16x32xf32, #tpu.memory_space<vmem>>, vector<1x4x16x32xf32>
    %75 = vector.shape_cast %74 : vector<1x4x16x32xf32> to vector<4x16x32xf32>
    %76 = vector.shape_cast %73 : vector<4x16x32xf32> to vector<1x4x16x32xf32>
    tpu.vector_store %arg11[%c0_35, %c0_36, %c0_37, %c0_38], %76 {strides = array<i32>} : memref<1x4x16x32xf32, #tpu.memory_space<vmem>>, vector<1x4x16x32xf32>,
    return
  }
  func.func @transform_0(%arg0: i32) -> (i32, i32, i32, i32) {
    %c0_i32 = arith.constant 0 : i32
    %c0_i32_0 = arith.constant 0 : i32
    %c0_i32_1 = arith.constant 0 : i32
    %c0_i32_2 = arith.constant 0 : i32
    return %arg0, %c0_i32, %c0_i32_0, %c0_i32_1 : i32, i32, i32, i32
  }
  func.func @transform_1(%arg0: i32) -> (i32, i32) {
    %c0_i32 = arith.constant 0 : i32
    %c0_i32_0 = arith.constant 0 : i32
    %c0_i32_1 = arith.constant 0 : i32
    return %c0_i32, %c0_i32_0 : i32, i32
  }
  func.func @transform_2(%arg0: i32) -> (i32, i32) {
    %c0_i32 = arith.constant 0 : i32
    %c0_i32_0 = arith.constant 0 : i32
    %c0_i32_1 = arith.constant 0 : i32
    return %c0_i32, %c0_i32_0 : i32, i32
  }
  func.func @transform_3(%arg0: i32) -> (i32, i32) {
    %c0_i32 = arith.constant 0 : i32
    %c0_i32_0 = arith.constant 0 : i32
    %c0_i32_1 = arith.constant 0 : i32
    return %c0_i32, %c0_i32_0 : i32, i32
  }
  func.func @transform_4(%arg0: i32) -> (i32, i32) {
    %c0_i32 = arith.constant 0 : i32
    %c0_i32_0 = arith.constant 0 : i32
    %c0_i32_1 = arith.constant 0 : i32
    return %c0_i32, %c0_i32_0 : i32, i32
  }
  func.func @transform_5(%arg0: i32) -> (i32, i32) {
    %c0_i32 = arith.constant 0 : i32
    %c0_i32_0 = arith.constant 0 : i32
    %c0_i32_1 = arith.constant 0 : i32
    return %c0_i32, %c0_i32_0 : i32, i32
  }
  func.func @transform_6(%arg0: i32) -> (i32, i32) {
    %c0_i32 = arith.constant 0 : i32
    %c0_i32_0 = arith.constant 0 : i32
    %c0_i32_1 = arith.constant 0 : i32
    return %c0_i32, %c0_i32_0 : i32, i32
  }
  func.func @transform_7(%arg0: i32) -> (i32, i32) {
    %c0_i32 = arith.constant 0 : i32
    %c0_i32_0 = arith.constant 0 : i32
    %c0_i32_1 = arith.constant 0 : i32
    return %c0_i32, %c0_i32_0 : i32, i32
  }
  func.func @transform_8(%arg0: i32) -> (i32, i32) {
    %c0_i32 = arith.constant 0 : i32
    %c0_i32_0 = arith.constant 0 : i32
    %c0_i32_1 = arith.constant 0 : i32
    return %c0_i32, %c0_i32_0 : i32, i32
  }
  func.func @transform_9(%arg0: i32) -> (i32, i32, i32) {
    %c0_i32 = arith.constant 0 : i32
    %c0_i32_0 = arith.constant 0 : i32
    %c0_i32_1 = arith.constant 0 : i32
    %c0_i32_2 = arith.constant 0 : i32
    return %c0_i32, %c0_i32_0, %c0_i32_1 : i32, i32, i32
  }
  func.func @transform_10(%arg0: i32) -> (i32, i32, i32, i32) {
    %c0_i32 = arith.constant 0 : i32
    %c0_i32_0 = arith.constant 0 : i32
    %c0_i32_1 = arith.constant 0 : i32
    %c0_i32_2 = arith.constant 0 : i32
    return %arg0, %c0_i32, %c0_i32_0, %c0_i32_1 : i32, i32, i32, i32
  }
}

module attributes {stable_mosaic.version = 11 : i64} {
  func.func @_win_attn_kernel(%arg0: i32, %arg1: memref<1x4x16x32xf32, #tpu.memory_space<vmem>>, %arg2: memref<32x32xf32, #tpu.memory_space<vmem>>, %arg3: memref<1x32xf32, #tpu.memory_space<vmem>>, %arg4: memref<32x32xf32, #tpu.memory_space<vmem>>, %arg5: memref<1x32xf32, #tpu.memory_space<vmem>>, %arg6: memref<32x32xf32, #tpu.memory_space<vmem>>, %arg7: memref<1x32xf32, #tpu.memory_space<vmem>>, %arg8: memref<32x32xf32, #tpu.memory_space<vmem>>, %arg9: memref<1x32xf32, #tpu.memory_space<vmem>>, %arg10: memref<2x16x16xf32, #tpu.memory_space<vmem>>, %arg11: memref<4x16x16xf32, #tpu.memory_space<vmem>>, %arg12: memref<1x4x16x32xf32, #tpu.memory_space<vmem>>) attributes {dimension_semantics = [#tpu.dimension_semantics<parallel>], iteration_bounds = array<i64: 2>, scalar_prefetch = 0 : i64, scratch_operands = 0 : i64, tpu.core_type = #tpu.core_type<tc>, window_params = [{transform_indices = @transform_0, window_bounds = array<i64: 1, 4, 16, 32>}, {pipeline_mode = #tpu.pipeline_mode<synchronous>, transform_indices = @transform_1, window_bounds = array<i64: 32, 32>}, {pipeline_mode = #tpu.pipeline_mode<synchronous>, transform_indices = @transform_2, window_bounds = array<i64: 1, 32>}, {pipeline_mode = #tpu.pipeline_mode<synchronous>, transform_indices = @transform_3, window_bounds = array<i64: 32, 32>}, {pipeline_mode = #tpu.pipeline_mode<synchronous>, transform_indices = @transform_4, window_bounds = array<i64: 1, 32>}, {pipeline_mode = #tpu.pipeline_mode<synchronous>, transform_indices = @transform_5, window_bounds = array<i64: 32, 32>}, {pipeline_mode = #tpu.pipeline_mode<synchronous>, transform_indices = @transform_6, window_bounds = array<i64: 1, 32>}, {pipeline_mode = #tpu.pipeline_mode<synchronous>, transform_indices = @transform_7, window_bounds = array<i64: 32, 32>}, {pipeline_mode = #tpu.pipeline_mode<synchronous>, transform_indices = @transform_8, window_bounds = array<i64: 1, 32>}, {pipeline_mode = #tpu.pipeline_mode<synchronous>, transform_indices = @transform_9, window_bounds = array<i64: 2, 16, 16>}, {pipeline_mode = #tpu.pipeline_mode<synchronous>, transform_indices = @transform_10, window_bounds = array<i64: 4, 16, 16>}, {transform_indices = @transform_11, window_bounds = array<i64: 1, 4, 16, 32>}]} {
    %c0 = arith.constant 0 : index
    %c0_0 = arith.constant 0 : index
    %c0_1 = arith.constant 0 : index
    %c0_2 = arith.constant 0 : index
    %0 = vector.load %arg1[%c0, %c0_0, %c0_1, %c0_2] : memref<1x4x16x32xf32, #tpu.memory_space<vmem>>, vector<1x4x16x32xf32>
    %1 = vector.shape_cast %0 : vector<1x4x16x32xf32> to vector<4x16x32xf32>
    %2 = vector.shape_cast %1 : vector<4x16x32xf32> to vector<64x32xf32>
    %c0_3 = arith.constant 0 : index
    %c0_4 = arith.constant 0 : index
    %3 = vector.load %arg2[%c0_3, %c0_4] : memref<32x32xf32, #tpu.memory_space<vmem>>, vector<32x32xf32>
    %cst = arith.constant dense<0.000000e+00> : vector<64x32xf32>
    %4 = tpu.matmul %2, %3, %cst {dimension_numbers = #tpu.dot_dimension_numbers<[1], [0], [0], [1], [0, 0, 1, 1], [], []>} : vector<64x32xf32>, vector<32x32xf32>, vector<64x32xf32> -> vector<64x32xf32>
    %c0_5 = arith.constant 0 : index
    %c0_6 = arith.constant 0 : index
    %5 = vector.load %arg3[%c0_5, %c0_6] : memref<1x32xf32, #tpu.memory_space<vmem>>, vector<1x32xf32>
    %6 = vector.broadcast %5 : vector<1x32xf32> to vector<64x32xf32>
    %7 = arith.addf %4, %6 : vector<64x32xf32>
    %8 = vector.shape_cast %7 : vector<64x32xf32> to vector<4x16x32xf32>
    %c0_7 = arith.constant 0 : index
    %c0_8 = arith.constant 0 : index
    %9 = vector.load %arg4[%c0_7, %c0_8] : memref<32x32xf32, #tpu.memory_space<vmem>>, vector<32x32xf32>
    %cst_9 = arith.constant dense<0.000000e+00> : vector<64x32xf32>
    %10 = tpu.matmul %2, %9, %cst_9 {dimension_numbers = #tpu.dot_dimension_numbers<[1], [0], [0], [1], [0, 0, 1, 1], [], []>} : vector<64x32xf32>, vector<32x32xf32>, vector<64x32xf32> -> vector<64x32xf32>
    %c0_10 = arith.constant 0 : index
    %c0_11 = arith.constant 0 : index
    %11 = vector.load %arg5[%c0_10, %c0_11] : memref<1x32xf32, #tpu.memory_space<vmem>>, vector<1x32xf32>
    %12 = vector.broadcast %11 : vector<1x32xf32> to vector<64x32xf32>
    %13 = arith.addf %10, %12 : vector<64x32xf32>
    %14 = vector.shape_cast %13 : vector<64x32xf32> to vector<4x16x32xf32>
    %c0_12 = arith.constant 0 : index
    %c0_13 = arith.constant 0 : index
    %15 = vector.load %arg6[%c0_12, %c0_13] : memref<32x32xf32, #tpu.memory_space<vmem>>, vector<32x32xf32>
    %cst_14 = arith.constant dense<0.000000e+00> : vector<64x32xf32>
    %16 = tpu.matmul %2, %15, %cst_14 {dimension_numbers = #tpu.dot_dimension_numbers<[1], [0], [0], [1], [0, 0, 1, 1], [], []>} : vector<64x32xf32>, vector<32x32xf32>, vector<64x32xf32> -> vector<64x32xf32>
    %c0_15 = arith.constant 0 : index
    %c0_16 = arith.constant 0 : index
    %17 = vector.load %arg7[%c0_15, %c0_16] : memref<1x32xf32, #tpu.memory_space<vmem>>, vector<1x32xf32>
    %18 = vector.broadcast %17 : vector<1x32xf32> to vector<64x32xf32>
    %19 = arith.addf %16, %18 : vector<64x32xf32>
    %20 = vector.shape_cast %19 : vector<64x32xf32> to vector<4x16x32xf32>
    %c0_17 = arith.constant 0 : index
    %c0_18 = arith.constant 0 : index
    %c0_19 = arith.constant 0 : index
    %21 = vector.load %arg10[%c0_17, %c0_18, %c0_19] : memref<2x16x16xf32, #tpu.memory_space<vmem>>, vector<2x16x16xf32>
    %c0_20 = arith.constant 0 : index
    %c0_21 = arith.constant 0 : index
    %c0_22 = arith.constant 0 : index
    %22 = vector.load %arg11[%c0_20, %c0_21, %c0_22] : memref<4x16x16xf32, #tpu.memory_space<vmem>>, vector<4x16x16xf32>
    %23 = vector.extract_strided_slice %8 {offsets = [0, 0, 0], sizes = [4, 16, 16], strides = [1, 1, 1]} : vector<4x16x32xf32> to vector<4x16x16xf32>
    %24 = vector.extract_strided_slice %14 {offsets = [0, 0, 0], sizes = [4, 16, 16], strides = [1, 1, 1]} : vector<4x16x32xf32> to vector<4x16x16xf32>
    "tpu.trace_start"() <{level = 10 : i32, message = "wqd,wkd->wqk"}> : () -> ()
    %cst_23 = arith.constant dense<0.000000e+00> : vector<4x16x16xf32>
    %25 = tpu.matmul %23, %24, %cst_23 {dimension_numbers = #tpu.dot_dimension_numbers<[2], [2], [1], [1], [0, 0, 0, 1, 1, 1], [0], [0]>} : vector<4x16x16xf32>, vector<4x16x16xf32>, vector<4x16x16xf32> -> vector<4x16x16xf32>
    "tpu.trace_stop"() : () -> ()
    %cst_24 = arith.constant 2.500000e-01 : f32
    %26 = vector.broadcast %cst_24 : f32 to vector<4x16x16xf32>
    %27 = arith.mulf %25, %26 : vector<4x16x16xf32>
    %28 = vector.extract_strided_slice %21 {offsets = [0, 0, 0], sizes = [1, 16, 16], strides = [1, 1, 1]} : vector<2x16x16xf32> to vector<1x16x16xf32>
    %29 = vector.shape_cast %28 : vector<1x16x16xf32> to vector<16x16xf32>
    %30 = vector.shape_cast %29 : vector<16x16xf32> to vector<1x16x16xf32>
    %31 = vector.broadcast %30 : vector<1x16x16xf32> to vector<4x16x16xf32>
    %32 = arith.addf %27, %31 : vector<4x16x16xf32>
    %33 = arith.addf %32, %22 : vector<4x16x16xf32>
    %cst_25 = arith.constant dense<0xFF800000> : vector<4x16xf32>
    %34 = vector.multi_reduction <maximumf>, %33, %cst_25 [2] : vector<4x16x16xf32> to vector<4x16xf32>
    %35 = vector.shape_cast %34 : vector<4x16xf32> to vector<4x16x1xf32>
    %36 = vector.broadcast %35 : vector<4x16x1xf32> to vector<4x16x16xf32>
    %37 = arith.subf %33, %36 : vector<4x16x16xf32>
    %38 = math.exp %37 : vector<4x16x16xf32>
    %cst_26 = arith.constant dense<0.000000e+00> : vector<4x16xf32>
    %39 = vector.multi_reduction <add>, %38, %cst_26 [2] : vector<4x16x16xf32> to vector<4x16xf32>
    %40 = vector.shape_cast %39 : vector<4x16xf32> to vector<4x16x1xf32>
    %41 = tpu.reciprocal %40 {approx = true} : vector<4x16x1xf32> -> vector<4x16x1xf32>
    %42 = vector.broadcast %41 : vector<4x16x1xf32> to vector<4x16x16xf32>
    %43 = arith.mulf %38, %42 : vector<4x16x16xf32>
    %44 = vector.extract_strided_slice %20 {offsets = [0, 0, 0], sizes = [4, 16, 16], strides = [1, 1, 1]} : vector<4x16x32xf32> to vector<4x16x16xf32>
    "tpu.trace_start"() <{level = 10 : i32, message = "wqk,wkd->wqd"}> : () -> ()
    %cst_27 = arith.constant dense<0.000000e+00> : vector<4x16x16xf32>
    %45 = tpu.matmul %43, %44, %cst_27 {dimension_numbers = #tpu.dot_dimension_numbers<[2], [1], [1], [2], [0, 0, 0, 1, 1, 2], [0], [0]>} : vector<4x16x16xf32>, vector<4x16x16xf32>, vector<4x16x16xf32> -> vector<4x16x16xf32>
    "tpu.trace_stop"() : () -> ()
    %46 = vector.extract_strided_slice %8 {offsets = [0, 0, 16], sizes = [4, 16, 16], strides = [1, 1, 1]} : vector<4x16x32xf32> to vector<4x16x16xf32>
    %47 = vector.extract_strided_slice %14 {offsets = [0, 0, 16], sizes = [4, 16, 16], strides = [1, 1, 1]} : vector<4x16x32xf32> to vector<4x16x16xf32>
    "tpu.trace_start"() <{level = 10 : i32, message = "wqd,wkd->wqk"}> : () -> ()
    %cst_28 = arith.constant dense<0.000000e+00> : vector<4x16x16xf32>
    %48 = tpu.matmul %46, %47, %cst_28 {dimension_numbers = #tpu.dot_dimension_numbers<[2], [2], [1], [1], [0, 0, 0, 1, 1, 1], [0], [0]>} : vector<4x16x16xf32>, vector<4x16x16xf32>, vector<4x16x16xf32> -> vector<4x16x16xf32>
    "tpu.trace_stop"() : () -> ()
    %cst_29 = arith.constant 2.500000e-01 : f32
    %49 = vector.broadcast %cst_29 : f32 to vector<4x16x16xf32>
    %50 = arith.mulf %48, %49 : vector<4x16x16xf32>
    %51 = vector.extract_strided_slice %21 {offsets = [1, 0, 0], sizes = [1, 16, 16], strides = [1, 1, 1]} : vector<2x16x16xf32> to vector<1x16x16xf32>
    %52 = vector.shape_cast %51 : vector<1x16x16xf32> to vector<16x16xf32>
    %53 = vector.shape_cast %52 : vector<16x16xf32> to vector<1x16x16xf32>
    %54 = vector.broadcast %53 : vector<1x16x16xf32> to vector<4x16x16xf32>
    %55 = arith.addf %50, %54 : vector<4x16x16xf32>
    %56 = arith.addf %55, %22 : vector<4x16x16xf32>
    %cst_30 = arith.constant dense<0xFF800000> : vector<4x16xf32>
    %57 = vector.multi_reduction <maximumf>, %56, %cst_30 [2] : vector<4x16x16xf32> to vector<4x16xf32>
    %58 = vector.shape_cast %57 : vector<4x16xf32> to vector<4x16x1xf32>
    %59 = vector.broadcast %58 : vector<4x16x1xf32> to vector<4x16x16xf32>
    %60 = arith.subf %56, %59 : vector<4x16x16xf32>
    %61 = math.exp %60 : vector<4x16x16xf32>
    %cst_31 = arith.constant dense<0.000000e+00> : vector<4x16xf32>
    %62 = vector.multi_reduction <add>, %61, %cst_31 [2] : vector<4x16x16xf32> to vector<4x16xf32>
    %63 = vector.shape_cast %62 : vector<4x16xf32> to vector<4x16x1xf32>
    %64 = tpu.reciprocal %63 {approx = true} : vector<4x16x1xf32> -> vector<4x16x1xf32>
    %65 = vector.broadcast %64 : vector<4x16x1xf32> to vector<4x16x16xf32>
    %66 = arith.mulf %61, %65 : vector<4x16x16xf32>
    %67 = vector.extract_strided_slice %20 {offsets = [0, 0, 16], sizes = [4, 16, 16], strides = [1, 1, 1]} : vector<4x16x32xf32> to vector<4x16x16xf32>
    "tpu.trace_start"() <{level = 10 : i32, message = "wqk,wkd->wqd"}> : () -> ()
    %cst_32 = arith.constant dense<0.000000e+00> : vector<4x16x16xf32>
    %68 = tpu.matmul %66, %67, %cst_32 {dimension_numbers = #tpu.dot_dimension_numbers<[2], [1], [1], [2], [0, 0, 0, 1, 1, 2], [0], [0]>} : vector<4x16x16xf32>, vector<4x16x16xf32>, vector<4x16x16xf32> -> vector<4x16x16xf32>
    "tpu.trace_stop"() : () -> ()
    %69 = tpu.concatenate %45, %68 in 2 : vector<4x16x16xf32>, vector<4x16x16xf32> -> vector<4x16x32xf32>
    %70 = vector.shape_cast %69 : vector<4x16x32xf32> to vector<64x32xf32>
    %c0_33 = arith.constant 0 : index
    %c0_34 = arith.constant 0 : index
    %71 = vector.load %arg8[%c0_33, %c0_34] : memref<32x32xf32, #tpu.memory_space<vmem>>, vector<32x32xf32>
    %cst_35 = arith.constant dense<0.000000e+00> : vector<64x32xf32>
    %72 = tpu.matmul %70, %71, %cst_35 {dimension_numbers = #tpu.dot_dimension_numbers<[1], [0], [0], [1], [0, 0, 1, 1], [], []>} : vector<64x32xf32>, vector<32x32xf32>, vector<64x32xf32> -> vector<64x32xf32>
    %c0_36 = arith.constant 0 : index
    %c0_37 = arith.constant 0 : index
    %73 = vector.load %arg9[%c0_36, %c0_37] : memref<1x32xf32, #tpu.memory_space<vmem>>, vector<1x32xf32>
    %74 = vector.broadcast %73 : vector<1x32xf32> to vector<64x32xf32>
    %75 = arith.addf %72, %74 : vector<64x32xf32>
    %76 = vector.shape_cast %75 : vector<64x32xf32> to vector<4x16x32xf32>
    %c0_38 = arith.constant 0 : index
    %c0_39 = arith.constant 0 : index
    %c0_40 = arith.constant 0 : index
    %c0_41 = arith.constant 0 : index
    %77 = vector.load %arg12[%c0_38, %c0_39, %c0_40, %c0_41] : memref<1x4x16x32xf32, #tpu.memory_space<vmem>>, vector<1x4x16x32xf32>
    %78 = vector.shape_cast %77 : vector<1x4x16x32xf32> to vector<4x16x32xf32>
    %79 = vector.shape_cast %76 : vector<4x16x32xf32> to vector<1x4x16x32xf32>
    tpu.vector_store %arg12[%c0_38, %c0_39, %c0_40, %c0_41], %79 {strides = array<i32>} : memref<1x4x16x32xf32, #tpu.memory_space<vmem>>, vector<1x4x16x32xf32>,
    return
  }
  func.func @transform_0(%arg0: i32) -> (i32, i32, i32, i32) {
    %c0_i32 = arith.constant 0 : i32
    %c0_i32_0 = arith.constant 0 : i32
    %c0_i32_1 = arith.constant 0 : i32
    %c0_i32_2 = arith.constant 0 : i32
    return %arg0, %c0_i32, %c0_i32_0, %c0_i32_1 : i32, i32, i32, i32
  }
  func.func @transform_1(%arg0: i32) -> (i32, i32) {
    %c0_i32 = arith.constant 0 : i32
    %c0_i32_0 = arith.constant 0 : i32
    %c0_i32_1 = arith.constant 0 : i32
    return %c0_i32, %c0_i32_0 : i32, i32
  }
  func.func @transform_2(%arg0: i32) -> (i32, i32) {
    %c0_i32 = arith.constant 0 : i32
    %c0_i32_0 = arith.constant 0 : i32
    %c0_i32_1 = arith.constant 0 : i32
    return %c0_i32, %c0_i32_0 : i32, i32
  }
  func.func @transform_3(%arg0: i32) -> (i32, i32) {
    %c0_i32 = arith.constant 0 : i32
    %c0_i32_0 = arith.constant 0 : i32
    %c0_i32_1 = arith.constant 0 : i32
    return %c0_i32, %c0_i32_0 : i32, i32
  }
  func.func @transform_4(%arg0: i32) -> (i32, i32) {
    %c0_i32 = arith.constant 0 : i32
    %c0_i32_0 = arith.constant 0 : i32
    %c0_i32_1 = arith.constant 0 : i32
    return %c0_i32, %c0_i32_0 : i32, i32
  }
  func.func @transform_5(%arg0: i32) -> (i32, i32) {
    %c0_i32 = arith.constant 0 : i32
    %c0_i32_0 = arith.constant 0 : i32
    %c0_i32_1 = arith.constant 0 : i32
    return %c0_i32, %c0_i32_0 : i32, i32
  }
  func.func @transform_6(%arg0: i32) -> (i32, i32) {
    %c0_i32 = arith.constant 0 : i32
    %c0_i32_0 = arith.constant 0 : i32
    %c0_i32_1 = arith.constant 0 : i32
    return %c0_i32, %c0_i32_0 : i32, i32
  }
  func.func @transform_7(%arg0: i32) -> (i32, i32) {
    %c0_i32 = arith.constant 0 : i32
    %c0_i32_0 = arith.constant 0 : i32
    %c0_i32_1 = arith.constant 0 : i32
    return %c0_i32, %c0_i32_0 : i32, i32
  }
  func.func @transform_8(%arg0: i32) -> (i32, i32) {
    %c0_i32 = arith.constant 0 : i32
    %c0_i32_0 = arith.constant 0 : i32
    %c0_i32_1 = arith.constant 0 : i32
    return %c0_i32, %c0_i32_0 : i32, i32
  }
  func.func @transform_9(%arg0: i32) -> (i32, i32, i32) {
    %c0_i32 = arith.constant 0 : i32
    %c0_i32_0 = arith.constant 0 : i32
    %c0_i32_1 = arith.constant 0 : i32
    %c0_i32_2 = arith.constant 0 : i32
    return %c0_i32, %c0_i32_0, %c0_i32_1 : i32, i32, i32
  }
  func.func @transform_10(%arg0: i32) -> (i32, i32, i32) {
    %c0_i32 = arith.constant 0 : i32
    %c0_i32_0 = arith.constant 0 : i32
    %c0_i32_1 = arith.constant 0 : i32
    %c0_i32_2 = arith.constant 0 : i32
    return %c0_i32, %c0_i32_0, %c0_i32_1 : i32, i32, i32
  }
  func.func @transform_11(%arg0: i32) -> (i32, i32, i32, i32) {
    %c0_i32 = arith.constant 0 : i32
    %c0_i32_0 = arith.constant 0 : i32
    %c0_i32_1 = arith.constant 0 : i32
    %c0_i32_2 = arith.constant 0 : i32
    return %arg0, %c0_i32, %c0_i32_0, %c0_i32_1 : i32, i32, i32, i32
  }
}

module attributes {stable_mosaic.version = 11 : i64} {
  func.func @_win_attn_kernel(%arg0: i32, %arg1: memref<1x1x16x64xf32, #tpu.memory_space<vmem>>, %arg2: memref<64x64xf32, #tpu.memory_space<vmem>>, %arg3: memref<1x64xf32, #tpu.memory_space<vmem>>, %arg4: memref<64x64xf32, #tpu.memory_space<vmem>>, %arg5: memref<1x64xf32, #tpu.memory_space<vmem>>, %arg6: memref<64x64xf32, #tpu.memory_space<vmem>>, %arg7: memref<1x64xf32, #tpu.memory_space<vmem>>, %arg8: memref<64x64xf32, #tpu.memory_space<vmem>>, %arg9: memref<1x64xf32, #tpu.memory_space<vmem>>, %arg10: memref<4x16x16xf32, #tpu.memory_space<vmem>>, %arg11: memref<1x1x16x64xf32, #tpu.memory_space<vmem>>) attributes {dimension_semantics = [#tpu.dimension_semantics<parallel>], iteration_bounds = array<i64: 2>, scalar_prefetch = 0 : i64, scratch_operands = 0 : i64, tpu.core_type = #tpu.core_type<tc>, window_params = [{transform_indices = @transform_0, window_bounds = array<i64: 1, 1, 16, 64>}, {pipeline_mode = #tpu.pipeline_mode<synchronous>, transform_indices = @transform_1, window_bounds = array<i64: 64, 64>}, {pipeline_mode = #tpu.pipeline_mode<synchronous>, transform_indices = @transform_2, window_bounds = array<i64: 1, 64>}, {pipeline_mode = #tpu.pipeline_mode<synchronous>, transform_indices = @transform_3, window_bounds = array<i64: 64, 64>}, {pipeline_mode = #tpu.pipeline_mode<synchronous>, transform_indices = @transform_4, window_bounds = array<i64: 1, 64>}, {pipeline_mode = #tpu.pipeline_mode<synchronous>, transform_indices = @transform_5, window_bounds = array<i64: 64, 64>}, {pipeline_mode = #tpu.pipeline_mode<synchronous>, transform_indices = @transform_6, window_bounds = array<i64: 1, 64>}, {pipeline_mode = #tpu.pipeline_mode<synchronous>, transform_indices = @transform_7, window_bounds = array<i64: 64, 64>}, {pipeline_mode = #tpu.pipeline_mode<synchronous>, transform_indices = @transform_8, window_bounds = array<i64: 1, 64>}, {pipeline_mode = #tpu.pipeline_mode<synchronous>, transform_indices = @transform_9, window_bounds = array<i64: 4, 16, 16>}, {transform_indices = @transform_10, window_bounds = array<i64: 1, 1, 16, 64>}]} {
    %c0 = arith.constant 0 : index
    %c0_0 = arith.constant 0 : index
    %c0_1 = arith.constant 0 : index
    %c0_2 = arith.constant 0 : index
    %0 = vector.load %arg1[%c0, %c0_0, %c0_1, %c0_2] : memref<1x1x16x64xf32, #tpu.memory_space<vmem>>, vector<1x1x16x64xf32>
    %1 = vector.shape_cast %0 : vector<1x1x16x64xf32> to vector<1x16x64xf32>
    %2 = vector.shape_cast %1 : vector<1x16x64xf32> to vector<16x64xf32>
    %c0_3 = arith.constant 0 : index
    %c0_4 = arith.constant 0 : index
    %3 = vector.load %arg2[%c0_3, %c0_4] : memref<64x64xf32, #tpu.memory_space<vmem>>, vector<64x64xf32>
    %cst = arith.constant dense<0.000000e+00> : vector<16x64xf32>
    %4 = tpu.matmul %2, %3, %cst {dimension_numbers = #tpu.dot_dimension_numbers<[1], [0], [0], [1], [0, 0, 1, 1], [], []>} : vector<16x64xf32>, vector<64x64xf32>, vector<16x64xf32> -> vector<16x64xf32>
    %c0_5 = arith.constant 0 : index
    %c0_6 = arith.constant 0 : index
    %5 = vector.load %arg3[%c0_5, %c0_6] : memref<1x64xf32, #tpu.memory_space<vmem>>, vector<1x64xf32>
    %6 = vector.broadcast %5 : vector<1x64xf32> to vector<16x64xf32>
    %7 = arith.addf %4, %6 : vector<16x64xf32>
    %8 = vector.shape_cast %7 : vector<16x64xf32> to vector<1x16x64xf32>
    %c0_7 = arith.constant 0 : index
    %c0_8 = arith.constant 0 : index
    %9 = vector.load %arg4[%c0_7, %c0_8] : memref<64x64xf32, #tpu.memory_space<vmem>>, vector<64x64xf32>
    %cst_9 = arith.constant dense<0.000000e+00> : vector<16x64xf32>
    %10 = tpu.matmul %2, %9, %cst_9 {dimension_numbers = #tpu.dot_dimension_numbers<[1], [0], [0], [1], [0, 0, 1, 1], [], []>} : vector<16x64xf32>, vector<64x64xf32>, vector<16x64xf32> -> vector<16x64xf32>
    %c0_10 = arith.constant 0 : index
    %c0_11 = arith.constant 0 : index
    %11 = vector.load %arg5[%c0_10, %c0_11] : memref<1x64xf32, #tpu.memory_space<vmem>>, vector<1x64xf32>
    %12 = vector.broadcast %11 : vector<1x64xf32> to vector<16x64xf32>
    %13 = arith.addf %10, %12 : vector<16x64xf32>
    %14 = vector.shape_cast %13 : vector<16x64xf32> to vector<1x16x64xf32>
    %c0_12 = arith.constant 0 : index
    %c0_13 = arith.constant 0 : index
    %15 = vector.load %arg6[%c0_12, %c0_13] : memref<64x64xf32, #tpu.memory_space<vmem>>, vector<64x64xf32>
    %cst_14 = arith.constant dense<0.000000e+00> : vector<16x64xf32>
    %16 = tpu.matmul %2, %15, %cst_14 {dimension_numbers = #tpu.dot_dimension_numbers<[1], [0], [0], [1], [0, 0, 1, 1], [], []>} : vector<16x64xf32>, vector<64x64xf32>, vector<16x64xf32> -> vector<16x64xf32>
    %c0_15 = arith.constant 0 : index
    %c0_16 = arith.constant 0 : index
    %17 = vector.load %arg7[%c0_15, %c0_16] : memref<1x64xf32, #tpu.memory_space<vmem>>, vector<1x64xf32>
    %18 = vector.broadcast %17 : vector<1x64xf32> to vector<16x64xf32>
    %19 = arith.addf %16, %18 : vector<16x64xf32>
    %20 = vector.shape_cast %19 : vector<16x64xf32> to vector<1x16x64xf32>
    %c0_17 = arith.constant 0 : index
    %c0_18 = arith.constant 0 : index
    %c0_19 = arith.constant 0 : index
    %21 = vector.load %arg10[%c0_17, %c0_18, %c0_19] : memref<4x16x16xf32, #tpu.memory_space<vmem>>, vector<4x16x16xf32>
    %22 = vector.extract_strided_slice %8 {offsets = [0, 0, 0], sizes = [1, 16, 16], strides = [1, 1, 1]} : vector<1x16x64xf32> to vector<1x16x16xf32>
    %23 = vector.extract_strided_slice %14 {offsets = [0, 0, 0], sizes = [1, 16, 16], strides = [1, 1, 1]} : vector<1x16x64xf32> to vector<1x16x16xf32>
    "tpu.trace_start"() <{level = 10 : i32, message = "wqd,wkd->wqk"}> : () -> ()
    %cst_20 = arith.constant dense<0.000000e+00> : vector<1x16x16xf32>
    %24 = tpu.matmul %22, %23, %cst_20 {dimension_numbers = #tpu.dot_dimension_numbers<[2], [2], [1], [1], [0, 0, 0, 1, 1, 1], [0], [0]>} : vector<1x16x16xf32>, vector<1x16x16xf32>, vector<1x16x16xf32> -> vector<1x16x16xf32>
    "tpu.trace_stop"() : () -> ()
    %cst_21 = arith.constant 2.500000e-01 : f32
    %25 = vector.broadcast %cst_21 : f32 to vector<1x16x16xf32>
    %26 = arith.mulf %24, %25 : vector<1x16x16xf32>
    %27 = vector.extract_strided_slice %21 {offsets = [0, 0, 0], sizes = [1, 16, 16], strides = [1, 1, 1]} : vector<4x16x16xf32> to vector<1x16x16xf32>
    %28 = vector.shape_cast %27 : vector<1x16x16xf32> to vector<16x16xf32>
    %29 = vector.shape_cast %28 : vector<16x16xf32> to vector<1x16x16xf32>
    %30 = arith.addf %26, %29 : vector<1x16x16xf32>
    %cst_22 = arith.constant dense<0xFF800000> : vector<1x16xf32>
    %31 = vector.multi_reduction <maximumf>, %30, %cst_22 [2] : vector<1x16x16xf32> to vector<1x16xf32>
    %32 = vector.shape_cast %31 : vector<1x16xf32> to vector<1x16x1xf32>
    %33 = vector.broadcast %32 : vector<1x16x1xf32> to vector<1x16x16xf32>
    %34 = arith.subf %30, %33 : vector<1x16x16xf32>
    %35 = math.exp %34 : vector<1x16x16xf32>
    %cst_23 = arith.constant dense<0.000000e+00> : vector<1x16xf32>
    %36 = vector.multi_reduction <add>, %35, %cst_23 [2] : vector<1x16x16xf32> to vector<1x16xf32>
    %37 = vector.shape_cast %36 : vector<1x16xf32> to vector<1x16x1xf32>
    %38 = tpu.reciprocal %37 {approx = true} : vector<1x16x1xf32> -> vector<1x16x1xf32>
    %39 = vector.broadcast %38 : vector<1x16x1xf32> to vector<1x16x16xf32>
    %40 = arith.mulf %35, %39 : vector<1x16x16xf32>
    %41 = vector.extract_strided_slice %20 {offsets = [0, 0, 0], sizes = [1, 16, 16], strides = [1, 1, 1]} : vector<1x16x64xf32> to vector<1x16x16xf32>
    "tpu.trace_start"() <{level = 10 : i32, message = "wqk,wkd->wqd"}> : () -> ()
    %cst_24 = arith.constant dense<0.000000e+00> : vector<1x16x16xf32>
    %42 = tpu.matmul %40, %41, %cst_24 {dimension_numbers = #tpu.dot_dimension_numbers<[2], [1], [1], [2], [0, 0, 0, 1, 1, 2], [0], [0]>} : vector<1x16x16xf32>, vector<1x16x16xf32>, vector<1x16x16xf32> -> vector<1x16x16xf32>
    "tpu.trace_stop"() : () -> ()
    %43 = vector.extract_strided_slice %8 {offsets = [0, 0, 16], sizes = [1, 16, 16], strides = [1, 1, 1]} : vector<1x16x64xf32> to vector<1x16x16xf32>
    %44 = vector.extract_strided_slice %14 {offsets = [0, 0, 16], sizes = [1, 16, 16], strides = [1, 1, 1]} : vector<1x16x64xf32> to vector<1x16x16xf32>
    "tpu.trace_start"() <{level = 10 : i32, message = "wqd,wkd->wqk"}> : () -> ()
    %cst_25 = arith.constant dense<0.000000e+00> : vector<1x16x16xf32>
    %45 = tpu.matmul %43, %44, %cst_25 {dimension_numbers = #tpu.dot_dimension_numbers<[2], [2], [1], [1], [0, 0, 0, 1, 1, 1], [0], [0]>} : vector<1x16x16xf32>, vector<1x16x16xf32>, vector<1x16x16xf32> -> vector<1x16x16xf32>
    "tpu.trace_stop"() : () -> ()
    %cst_26 = arith.constant 2.500000e-01 : f32
    %46 = vector.broadcast %cst_26 : f32 to vector<1x16x16xf32>
    %47 = arith.mulf %45, %46 : vector<1x16x16xf32>
    %48 = vector.extract_strided_slice %21 {offsets = [1, 0, 0], sizes = [1, 16, 16], strides = [1, 1, 1]} : vector<4x16x16xf32> to vector<1x16x16xf32>
    %49 = vector.shape_cast %48 : vector<1x16x16xf32> to vector<16x16xf32>
    %50 = vector.shape_cast %49 : vector<16x16xf32> to vector<1x16x16xf32>
    %51 = arith.addf %47, %50 : vector<1x16x16xf32>
    %cst_27 = arith.constant dense<0xFF800000> : vector<1x16xf32>
    %52 = vector.multi_reduction <maximumf>, %51, %cst_27 [2] : vector<1x16x16xf32> to vector<1x16xf32>
    %53 = vector.shape_cast %52 : vector<1x16xf32> to vector<1x16x1xf32>
    %54 = vector.broadcast %53 : vector<1x16x1xf32> to vector<1x16x16xf32>
    %55 = arith.subf %51, %54 : vector<1x16x16xf32>
    %56 = math.exp %55 : vector<1x16x16xf32>
    %cst_28 = arith.constant dense<0.000000e+00> : vector<1x16xf32>
    %57 = vector.multi_reduction <add>, %56, %cst_28 [2] : vector<1x16x16xf32> to vector<1x16xf32>
    %58 = vector.shape_cast %57 : vector<1x16xf32> to vector<1x16x1xf32>
    %59 = tpu.reciprocal %58 {approx = true} : vector<1x16x1xf32> -> vector<1x16x1xf32>
    %60 = vector.broadcast %59 : vector<1x16x1xf32> to vector<1x16x16xf32>
    %61 = arith.mulf %56, %60 : vector<1x16x16xf32>
    %62 = vector.extract_strided_slice %20 {offsets = [0, 0, 16], sizes = [1, 16, 16], strides = [1, 1, 1]} : vector<1x16x64xf32> to vector<1x16x16xf32>
    "tpu.trace_start"() <{level = 10 : i32, message = "wqk,wkd->wqd"}> : () -> ()
    %cst_29 = arith.constant dense<0.000000e+00> : vector<1x16x16xf32>
    %63 = tpu.matmul %61, %62, %cst_29 {dimension_numbers = #tpu.dot_dimension_numbers<[2], [1], [1], [2], [0, 0, 0, 1, 1, 2], [0], [0]>} : vector<1x16x16xf32>, vector<1x16x16xf32>, vector<1x16x16xf32> -> vector<1x16x16xf32>
    "tpu.trace_stop"() : () -> ()
    %64 = vector.extract_strided_slice %8 {offsets = [0, 0, 32], sizes = [1, 16, 16], strides = [1, 1, 1]} : vector<1x16x64xf32> to vector<1x16x16xf32>
    %65 = vector.extract_strided_slice %14 {offsets = [0, 0, 32], sizes = [1, 16, 16], strides = [1, 1, 1]} : vector<1x16x64xf32> to vector<1x16x16xf32>
    "tpu.trace_start"() <{level = 10 : i32, message = "wqd,wkd->wqk"}> : () -> ()
    %cst_30 = arith.constant dense<0.000000e+00> : vector<1x16x16xf32>
    %66 = tpu.matmul %64, %65, %cst_30 {dimension_numbers = #tpu.dot_dimension_numbers<[2], [2], [1], [1], [0, 0, 0, 1, 1, 1], [0], [0]>} : vector<1x16x16xf32>, vector<1x16x16xf32>, vector<1x16x16xf32> -> vector<1x16x16xf32>
    "tpu.trace_stop"() : () -> ()
    %cst_31 = arith.constant 2.500000e-01 : f32
    %67 = vector.broadcast %cst_31 : f32 to vector<1x16x16xf32>
    %68 = arith.mulf %66, %67 : vector<1x16x16xf32>
    %69 = vector.extract_strided_slice %21 {offsets = [2, 0, 0], sizes = [1, 16, 16], strides = [1, 1, 1]} : vector<4x16x16xf32> to vector<1x16x16xf32>
    %70 = vector.shape_cast %69 : vector<1x16x16xf32> to vector<16x16xf32>
    %71 = vector.shape_cast %70 : vector<16x16xf32> to vector<1x16x16xf32>
    %72 = arith.addf %68, %71 : vector<1x16x16xf32>
    %cst_32 = arith.constant dense<0xFF800000> : vector<1x16xf32>
    %73 = vector.multi_reduction <maximumf>, %72, %cst_32 [2] : vector<1x16x16xf32> to vector<1x16xf32>
    %74 = vector.shape_cast %73 : vector<1x16xf32> to vector<1x16x1xf32>
    %75 = vector.broadcast %74 : vector<1x16x1xf32> to vector<1x16x16xf32>
    %76 = arith.subf %72, %75 : vector<1x16x16xf32>
    %77 = math.exp %76 : vector<1x16x16xf32>
    %cst_33 = arith.constant dense<0.000000e+00> : vector<1x16xf32>
    %78 = vector.multi_reduction <add>, %77, %cst_33 [2] : vector<1x16x16xf32> to vector<1x16xf32>
    %79 = vector.shape_cast %78 : vector<1x16xf32> to vector<1x16x1xf32>
    %80 = tpu.reciprocal %79 {approx = true} : vector<1x16x1xf32> -> vector<1x16x1xf32>
    %81 = vector.broadcast %80 : vector<1x16x1xf32> to vector<1x16x16xf32>
    %82 = arith.mulf %77, %81 : vector<1x16x16xf32>
    %83 = vector.extract_strided_slice %20 {offsets = [0, 0, 32], sizes = [1, 16, 16], strides = [1, 1, 1]} : vector<1x16x64xf32> to vector<1x16x16xf32>
    "tpu.trace_start"() <{level = 10 : i32, message = "wqk,wkd->wqd"}> : () -> ()
    %cst_34 = arith.constant dense<0.000000e+00> : vector<1x16x16xf32>
    %84 = tpu.matmul %82, %83, %cst_34 {dimension_numbers = #tpu.dot_dimension_numbers<[2], [1], [1], [2], [0, 0, 0, 1, 1, 2], [0], [0]>} : vector<1x16x16xf32>, vector<1x16x16xf32>, vector<1x16x16xf32> -> vector<1x16x16xf32>
    "tpu.trace_stop"() : () -> ()
    %85 = vector.extract_strided_slice %8 {offsets = [0, 0, 48], sizes = [1, 16, 16], strides = [1, 1, 1]} : vector<1x16x64xf32> to vector<1x16x16xf32>
    %86 = vector.extract_strided_slice %14 {offsets = [0, 0, 48], sizes = [1, 16, 16], strides = [1, 1, 1]} : vector<1x16x64xf32> to vector<1x16x16xf32>
    "tpu.trace_start"() <{level = 10 : i32, message = "wqd,wkd->wqk"}> : () -> ()
    %cst_35 = arith.constant dense<0.000000e+00> : vector<1x16x16xf32>
    %87 = tpu.matmul %85, %86, %cst_35 {dimension_numbers = #tpu.dot_dimension_numbers<[2], [2], [1], [1], [0, 0, 0, 1, 1, 1], [0], [0]>} : vector<1x16x16xf32>, vector<1x16x16xf32>, vector<1x16x16xf32> -> vector<1x16x16xf32>
    "tpu.trace_stop"() : () -> ()
    %cst_36 = arith.constant 2.500000e-01 : f32
    %88 = vector.broadcast %cst_36 : f32 to vector<1x16x16xf32>
    %89 = arith.mulf %87, %88 : vector<1x16x16xf32>
    %90 = vector.extract_strided_slice %21 {offsets = [3, 0, 0], sizes = [1, 16, 16], strides = [1, 1, 1]} : vector<4x16x16xf32> to vector<1x16x16xf32>
    %91 = vector.shape_cast %90 : vector<1x16x16xf32> to vector<16x16xf32>
    %92 = vector.shape_cast %91 : vector<16x16xf32> to vector<1x16x16xf32>
    %93 = arith.addf %89, %92 : vector<1x16x16xf32>
    %cst_37 = arith.constant dense<0xFF800000> : vector<1x16xf32>
    %94 = vector.multi_reduction <maximumf>, %93, %cst_37 [2] : vector<1x16x16xf32> to vector<1x16xf32>
    %95 = vector.shape_cast %94 : vector<1x16xf32> to vector<1x16x1xf32>
    %96 = vector.broadcast %95 : vector<1x16x1xf32> to vector<1x16x16xf32>
    %97 = arith.subf %93, %96 : vector<1x16x16xf32>
    %98 = math.exp %97 : vector<1x16x16xf32>
    %cst_38 = arith.constant dense<0.000000e+00> : vector<1x16xf32>
    %99 = vector.multi_reduction <add>, %98, %cst_38 [2] : vector<1x16x16xf32> to vector<1x16xf32>
    %100 = vector.shape_cast %99 : vector<1x16xf32> to vector<1x16x1xf32>
    %101 = tpu.reciprocal %100 {approx = true} : vector<1x16x1xf32> -> vector<1x16x1xf32>
    %102 = vector.broadcast %101 : vector<1x16x1xf32> to vector<1x16x16xf32>
    %103 = arith.mulf %98, %102 : vector<1x16x16xf32>
    %104 = vector.extract_strided_slice %20 {offsets = [0, 0, 48], sizes = [1, 16, 16], strides = [1, 1, 1]} : vector<1x16x64xf32> to vector<1x16x16xf32>
    "tpu.trace_start"() <{level = 10 : i32, message = "wqk,wkd->wqd"}> : () -> ()
    %cst_39 = arith.constant dense<0.000000e+00> : vector<1x16x16xf32>
    %105 = tpu.matmul %103, %104, %cst_39 {dimension_numbers = #tpu.dot_dimension_numbers<[2], [1], [1], [2], [0, 0, 0, 1, 1, 2], [0], [0]>} : vector<1x16x16xf32>, vector<1x16x16xf32>, vector<1x16x16xf32> -> vector<1x16x16xf32>
    "tpu.trace_stop"() : () -> ()
    %106 = tpu.concatenate %42, %63, %84, %105 in 2 : vector<1x16x16xf32>, vector<1x16x16xf32>, vector<1x16x16xf32>, vector<1x16x16xf32> -> vector<1x16x64xf32>
    %107 = vector.shape_cast %106 : vector<1x16x64xf32> to vector<16x64xf32>
    %c0_40 = arith.constant 0 : index
    %c0_41 = arith.constant 0 : index
    %108 = vector.load %arg8[%c0_40, %c0_41] : memref<64x64xf32, #tpu.memory_space<vmem>>, vector<64x64xf32>
    %cst_42 = arith.constant dense<0.000000e+00> : vector<16x64xf32>
    %109 = tpu.matmul %107, %108, %cst_42 {dimension_numbers = #tpu.dot_dimension_numbers<[1], [0], [0], [1], [0, 0, 1, 1], [], []>} : vector<16x64xf32>, vector<64x64xf32>, vector<16x64xf32> -> vector<16x64xf32>
    %c0_43 = arith.constant 0 : index
    %c0_44 = arith.constant 0 : index
    %110 = vector.load %arg9[%c0_43, %c0_44] : memref<1x64xf32, #tpu.memory_space<vmem>>, vector<1x64xf32>
    %111 = vector.broadcast %110 : vector<1x64xf32> to vector<16x64xf32>
    %112 = arith.addf %109, %111 : vector<16x64xf32>
    %113 = vector.shape_cast %112 : vector<16x64xf32> to vector<1x16x64xf32>
    %c0_45 = arith.constant 0 : index
    %c0_46 = arith.constant 0 : index
    %c0_47 = arith.constant 0 : index
    %c0_48 = arith.constant 0 : index
    %114 = vector.load %arg11[%c0_45, %c0_46, %c0_47, %c0_48] : memref<1x1x16x64xf32, #tpu.memory_space<vmem>>, vector<1x1x16x64xf32>
    %115 = vector.shape_cast %114 : vector<1x1x16x64xf32> to vector<1x16x64xf32>
    %116 = vector.shape_cast %113 : vector<1x16x64xf32> to vector<1x1x16x64xf32>
    tpu.vector_store %arg11[%c0_45, %c0_46, %c0_47, %c0_48], %116 {strides = array<i32>} : memref<1x1x16x64xf32, #tpu.memory_space<vmem>>, vector<1x1x16x64xf32>,
    return
  }
  func.func @transform_0(%arg0: i32) -> (i32, i32, i32, i32) {
    %c0_i32 = arith.constant 0 : i32
    %c0_i32_0 = arith.constant 0 : i32
    %c0_i32_1 = arith.constant 0 : i32
    %c0_i32_2 = arith.constant 0 : i32
    return %arg0, %c0_i32, %c0_i32_0, %c0_i32_1 : i32, i32, i32, i32
  }
  func.func @transform_1(%arg0: i32) -> (i32, i32) {
    %c0_i32 = arith.constant 0 : i32
    %c0_i32_0 = arith.constant 0 : i32
    %c0_i32_1 = arith.constant 0 : i32
    return %c0_i32, %c0_i32_0 : i32, i32
  }
  func.func @transform_2(%arg0: i32) -> (i32, i32) {
    %c0_i32 = arith.constant 0 : i32
    %c0_i32_0 = arith.constant 0 : i32
    %c0_i32_1 = arith.constant 0 : i32
    return %c0_i32, %c0_i32_0 : i32, i32
  }
  func.func @transform_3(%arg0: i32) -> (i32, i32) {
    %c0_i32 = arith.constant 0 : i32
    %c0_i32_0 = arith.constant 0 : i32
    %c0_i32_1 = arith.constant 0 : i32
    return %c0_i32, %c0_i32_0 : i32, i32
  }
  func.func @transform_4(%arg0: i32) -> (i32, i32) {
    %c0_i32 = arith.constant 0 : i32
    %c0_i32_0 = arith.constant 0 : i32
    %c0_i32_1 = arith.constant 0 : i32
    return %c0_i32, %c0_i32_0 : i32, i32
  }
  func.func @transform_5(%arg0: i32) -> (i32, i32) {
    %c0_i32 = arith.constant 0 : i32
    %c0_i32_0 = arith.constant 0 : i32
    %c0_i32_1 = arith.constant 0 : i32
    return %c0_i32, %c0_i32_0 : i32, i32
  }
  func.func @transform_6(%arg0: i32) -> (i32, i32) {
    %c0_i32 = arith.constant 0 : i32
    %c0_i32_0 = arith.constant 0 : i32
    %c0_i32_1 = arith.constant 0 : i32
    return %c0_i32, %c0_i32_0 : i32, i32
  }
  func.func @transform_7(%arg0: i32) -> (i32, i32) {
    %c0_i32 = arith.constant 0 : i32
    %c0_i32_0 = arith.constant 0 : i32
    %c0_i32_1 = arith.constant 0 : i32
    return %c0_i32, %c0_i32_0 : i32, i32
  }
  func.func @transform_8(%arg0: i32) -> (i32, i32) {
    %c0_i32 = arith.constant 0 : i32
    %c0_i32_0 = arith.constant 0 : i32
    %c0_i32_1 = arith.constant 0 : i32
    return %c0_i32, %c0_i32_0 : i32, i32
  }
  func.func @transform_9(%arg0: i32) -> (i32, i32, i32) {
    %c0_i32 = arith.constant 0 : i32
    %c0_i32_0 = arith.constant 0 : i32
    %c0_i32_1 = arith.constant 0 : i32
    %c0_i32_2 = arith.constant 0 : i32
    return %c0_i32, %c0_i32_0, %c0_i32_1 : i32, i32, i32
  }
  func.func @transform_10(%arg0: i32) -> (i32, i32, i32, i32) {
    %c0_i32 = arith.constant 0 : i32
    %c0_i32_0 = arith.constant 0 : i32
    %c0_i32_1 = arith.constant 0 : i32
    %c0_i32_2 = arith.constant 0 : i32
    return %arg0, %c0_i32, %c0_i32_0, %c0_i32_1 : i32, i32, i32, i32
  }
}

module attributes {stable_mosaic.version = 11 : i64} {
  func.func @_merge_kernel(%arg0: i32, %arg1: memref<16x128xf32, #tpu.memory_space<vmem>>, %arg2: memref<1x128xf32, #tpu.memory_space<vmem>>, %arg3: memref<1x128xf32, #tpu.memory_space<vmem>>, %arg4: memref<128x64xf32, #tpu.memory_space<vmem>>, %arg5: memref<16x64xf32, #tpu.memory_space<vmem>>) attributes {dimension_semantics = [#tpu.dimension_semantics<parallel>], iteration_bounds = array<i64: 2>, scalar_prefetch = 0 : i64, scratch_operands = 0 : i64, tpu.core_type = #tpu.core_type<tc>, window_params = [{transform_indices = @transform_0, window_bounds = array<i64: 16, 128>}, {pipeline_mode = #tpu.pipeline_mode<synchronous>, transform_indices = @transform_1, window_bounds = array<i64: 1, 128>}, {pipeline_mode = #tpu.pipeline_mode<synchronous>, transform_indices = @transform_2, window_bounds = array<i64: 1, 128>}, {pipeline_mode = #tpu.pipeline_mode<synchronous>, transform_indices = @transform_3, window_bounds = array<i64: 128, 64>}, {transform_indices = @transform_4, window_bounds = array<i64: 16, 64>}]} {
    %c0 = arith.constant 0 : index
    %c0_0 = arith.constant 0 : index
    %0 = vector.load %arg1[%c0, %c0_0] : memref<16x128xf32, #tpu.memory_space<vmem>>, vector<16x128xf32>
    %c0_1 = arith.constant 0 : index
    %c0_2 = arith.constant 0 : index
    %1 = vector.load %arg2[%c0_1, %c0_2] : memref<1x128xf32, #tpu.memory_space<vmem>>, vector<1x128xf32>
    %c0_3 = arith.constant 0 : index
    %c0_4 = arith.constant 0 : index
    %2 = vector.load %arg3[%c0_3, %c0_4] : memref<1x128xf32, #tpu.memory_space<vmem>>, vector<1x128xf32>
    %cst = arith.constant dense<0.000000e+00> : vector<16xf32>
    %3 = vector.multi_reduction <add>, %0, %cst [1] : vector<16x128xf32> to vector<16xf32>
    %4 = vector.shape_cast %3 : vector<16xf32> to vector<16x1xf32>
    %cst_5 = arith.constant 1.280000e+02 : f32
    %5 = vector.broadcast %cst_5 : f32 to vector<16x1xf32>
    %6 = arith.divf %4, %5 : vector<16x1xf32>
    %7 = vector.broadcast %6 : vector<16x1xf32> to vector<16x128xf32>
    %8 = arith.subf %0, %7 : vector<16x128xf32>
    %9 = arith.mulf %8, %8 : vector<16x128xf32>
    %cst_6 = arith.constant dense<0.000000e+00> : vector<16xf32>
    %10 = vector.multi_reduction <add>, %9, %cst_6 [1] : vector<16x128xf32> to vector<16xf32>
    %11 = vector.shape_cast %10 : vector<16xf32> to vector<16x1xf32>
    %cst_7 = arith.constant 1.280000e+02 : f32
    %12 = vector.broadcast %cst_7 : f32 to vector<16x1xf32>
    %13 = arith.divf %11, %12 : vector<16x1xf32>
    %cst_8 = arith.constant 9.99999974E-6 : f32
    %14 = vector.broadcast %cst_8 : f32 to vector<16x1xf32>
    %15 = arith.addf %13, %14 : vector<16x1xf32>
    %16 = math.rsqrt %15 : vector<16x1xf32>
    %17 = vector.broadcast %16 : vector<16x1xf32> to vector<16x128xf32>
    %18 = arith.mulf %8, %17 : vector<16x128xf32>
    %19 = vector.broadcast %1 : vector<1x128xf32> to vector<16x128xf32>
    %20 = arith.mulf %18, %19 : vector<16x128xf32>
    %21 = vector.broadcast %2 : vector<1x128xf32> to vector<16x128xf32>
    %22 = arith.addf %20, %21 : vector<16x128xf32>
    %c0_9 = arith.constant 0 : index
    %c0_10 = arith.constant 0 : index
    %23 = vector.load %arg4[%c0_9, %c0_10] : memref<128x64xf32, #tpu.memory_space<vmem>>, vector<128x64xf32>
    %cst_11 = arith.constant dense<0.000000e+00> : vector<16x64xf32>
    %24 = tpu.matmul %22, %23, %cst_11 {dimension_numbers = #tpu.dot_dimension_numbers<[1], [0], [0], [1], [0, 0, 1, 1], [], []>} : vector<16x128xf32>, vector<128x64xf32>, vector<16x64xf32> -> vector<16x64xf32>
    %c0_12 = arith.constant 0 : index
    %c0_13 = arith.constant 0 : index
    %25 = vector.load %arg5[%c0_12, %c0_13] : memref<16x64xf32, #tpu.memory_space<vmem>>, vector<16x64xf32>
    tpu.vector_store %arg5[%c0_12, %c0_13], %24 {strides = array<i32>} : memref<16x64xf32, #tpu.memory_space<vmem>>, vector<16x64xf32>,
    return
  }
  func.func @transform_0(%arg0: i32) -> (i32, i32) {
    %c0_i32 = arith.constant 0 : i32
    %c0_i32_0 = arith.constant 0 : i32
    return %arg0, %c0_i32 : i32, i32
  }
  func.func @transform_1(%arg0: i32) -> (i32, i32) {
    %c0_i32 = arith.constant 0 : i32
    %c0_i32_0 = arith.constant 0 : i32
    %c0_i32_1 = arith.constant 0 : i32
    return %c0_i32, %c0_i32_0 : i32, i32
  }
  func.func @transform_2(%arg0: i32) -> (i32, i32) {
    %c0_i32 = arith.constant 0 : i32
    %c0_i32_0 = arith.constant 0 : i32
    %c0_i32_1 = arith.constant 0 : i32
    return %c0_i32, %c0_i32_0 : i32, i32
  }
  func.func @transform_3(%arg0: i32) -> (i32, i32) {
    %c0_i32 = arith.constant 0 : i32
    %c0_i32_0 = arith.constant 0 : i32
    %c0_i32_1 = arith.constant 0 : i32
    return %c0_i32, %c0_i32_0 : i32, i32
  }
  func.func @transform_4(%arg0: i32) -> (i32, i32) {
    %c0_i32 = arith.constant 0 : i32
    %c0_i32_0 = arith.constant 0 : i32
    return %arg0, %c0_i32 : i32, i32
  }
}

module attributes {stable_mosaic.version = 11 : i64} {
  func.func @_ln_mlp_kernel(%arg0: i32, %arg1: memref<16x64xf32, #tpu.memory_space<vmem>>, %arg2: memref<16x64xf32, #tpu.memory_space<vmem>>, %arg3: memref<1x64xf32, #tpu.memory_space<vmem>>, %arg4: memref<1x64xf32, #tpu.memory_space<vmem>>, %arg5: memref<64x128xf32, #tpu.memory_space<vmem>>, %arg6: memref<1x128xf32, #tpu.memory_space<vmem>>, %arg7: memref<128x64xf32, #tpu.memory_space<vmem>>, %arg8: memref<1x64xf32, #tpu.memory_space<vmem>>, %arg9: memref<16x64xf32, #tpu.memory_space<vmem>>) attributes {dimension_semantics = [#tpu.dimension_semantics<parallel>], iteration_bounds = array<i64: 2>, scalar_prefetch = 0 : i64, scratch_operands = 0 : i64, tpu.core_type = #tpu.core_type<tc>, window_params = [{transform_indices = @transform_0, window_bounds = array<i64: 16, 64>}, {transform_indices = @transform_1, window_bounds = array<i64: 16, 64>}, {pipeline_mode = #tpu.pipeline_mode<synchronous>, transform_indices = @transform_2, window_bounds = array<i64: 1, 64>}, {pipeline_mode = #tpu.pipeline_mode<synchronous>, transform_indices = @transform_3, window_bounds = array<i64: 1, 64>}, {pipeline_mode = #tpu.pipeline_mode<synchronous>, transform_indices = @transform_4, window_bounds = array<i64: 64, 128>}, {pipeline_mode = #tpu.pipeline_mode<synchronous>, transform_indices = @transform_5, window_bounds = array<i64: 1, 128>}, {pipeline_mode = #tpu.pipeline_mode<synchronous>, transform_indices = @transform_6, window_bounds = array<i64: 128, 64>}, {pipeline_mode = #tpu.pipeline_mode<synchronous>, transform_indices = @transform_7, window_bounds = array<i64: 1, 64>}, {transform_indices = @transform_8, window_bounds = array<i64: 16, 64>}]} {
    %c0 = arith.constant 0 : index
    %c0_0 = arith.constant 0 : index
    %0 = vector.load %arg1[%c0, %c0_0] : memref<16x64xf32, #tpu.memory_space<vmem>>, vector<16x64xf32>
    %c0_1 = arith.constant 0 : index
    %c0_2 = arith.constant 0 : index
    %1 = vector.load %arg2[%c0_1, %c0_2] : memref<16x64xf32, #tpu.memory_space<vmem>>, vector<16x64xf32>
    %2 = arith.addf %0, %1 : vector<16x64xf32>
    %c0_3 = arith.constant 0 : index
    %c0_4 = arith.constant 0 : index
    %3 = vector.load %arg3[%c0_3, %c0_4] : memref<1x64xf32, #tpu.memory_space<vmem>>, vector<1x64xf32>
    %c0_5 = arith.constant 0 : index
    %c0_6 = arith.constant 0 : index
    %4 = vector.load %arg4[%c0_5, %c0_6] : memref<1x64xf32, #tpu.memory_space<vmem>>, vector<1x64xf32>
    %cst = arith.constant dense<0.000000e+00> : vector<16xf32>
    %5 = vector.multi_reduction <add>, %2, %cst [1] : vector<16x64xf32> to vector<16xf32>
    %6 = vector.shape_cast %5 : vector<16xf32> to vector<16x1xf32>
    %cst_7 = arith.constant 6.400000e+01 : f32
    %7 = vector.broadcast %cst_7 : f32 to vector<16x1xf32>
    %8 = arith.divf %6, %7 : vector<16x1xf32>
    %9 = vector.broadcast %8 : vector<16x1xf32> to vector<16x64xf32>
    %10 = arith.subf %2, %9 : vector<16x64xf32>
    %11 = arith.mulf %10, %10 : vector<16x64xf32>
    %cst_8 = arith.constant dense<0.000000e+00> : vector<16xf32>
    %12 = vector.multi_reduction <add>, %11, %cst_8 [1] : vector<16x64xf32> to vector<16xf32>
    %13 = vector.shape_cast %12 : vector<16xf32> to vector<16x1xf32>
    %cst_9 = arith.constant 6.400000e+01 : f32
    %14 = vector.broadcast %cst_9 : f32 to vector<16x1xf32>
    %15 = arith.divf %13, %14 : vector<16x1xf32>
    %cst_10 = arith.constant 9.99999974E-6 : f32
    %16 = vector.broadcast %cst_10 : f32 to vector<16x1xf32>
    %17 = arith.addf %15, %16 : vector<16x1xf32>
    %18 = math.rsqrt %17 : vector<16x1xf32>
    %19 = vector.broadcast %18 : vector<16x1xf32> to vector<16x64xf32>
    %20 = arith.mulf %10, %19 : vector<16x64xf32>
    %21 = vector.broadcast %3 : vector<1x64xf32> to vector<16x64xf32>
    %22 = arith.mulf %20, %21 : vector<16x64xf32>
    %23 = vector.broadcast %4 : vector<1x64xf32> to vector<16x64xf32>
    %24 = arith.addf %22, %23 : vector<16x64xf32>
    %c0_11 = arith.constant 0 : index
    %c0_12 = arith.constant 0 : index
    %25 = vector.load %arg5[%c0_11, %c0_12] : memref<64x128xf32, #tpu.memory_space<vmem>>, vector<64x128xf32>
    %cst_13 = arith.constant dense<0.000000e+00> : vector<16x128xf32>
    %26 = tpu.matmul %24, %25, %cst_13 {dimension_numbers = #tpu.dot_dimension_numbers<[1], [0], [0], [1], [0, 0, 1, 1], [], []>} : vector<16x64xf32>, vector<64x128xf32>, vector<16x128xf32> -> vector<16x128xf32>
    %c0_14 = arith.constant 0 : index
    %c0_15 = arith.constant 0 : index
    %27 = vector.load %arg6[%c0_14, %c0_15] : memref<1x128xf32, #tpu.memory_space<vmem>>, vector<1x128xf32>
    %28 = vector.broadcast %27 : vector<1x128xf32> to vector<16x128xf32>
    %29 = arith.addf %26, %28 : vector<16x128xf32>
    %cst_16 = arith.constant 5.000000e-01 : f32
    %30 = vector.broadcast %cst_16 : f32 to vector<16x128xf32>
    %31 = arith.mulf %30, %29 : vector<16x128xf32>
    %cst_17 = arith.constant 0.707106769 : f32
    %32 = vector.broadcast %cst_17 : f32 to vector<16x128xf32>
    %33 = arith.mulf %29, %32 : vector<16x128xf32>
    %34 = math.absf %33 : vector<16x128xf32>
    %cst_18 = arith.constant 0.327591091 : f32
    %35 = vector.broadcast %cst_18 : f32 to vector<16x128xf32>
    %36 = arith.mulf %35, %34 : vector<16x128xf32>
    %cst_19 = arith.constant 1.000000e+00 : f32
    %37 = vector.broadcast %cst_19 : f32 to vector<16x128xf32>
    %38 = arith.addf %37, %36 : vector<16x128xf32>
    %cst_20 = arith.constant 1.000000e+00 : f32
    %39 = vector.broadcast %cst_20 : f32 to vector<16x128xf32>
    %40 = arith.divf %39, %38 : vector<16x128xf32>
    %cst_21 = arith.constant 1.06140542 : f32
    %41 = vector.broadcast %cst_21 : f32 to vector<16x128xf32>
    %42 = arith.mulf %41, %40 : vector<16x128xf32>
    %cst_22 = arith.constant -1.45315206 : f32
    %43 = vector.broadcast %cst_22 : f32 to vector<16x128xf32>
    %44 = arith.addf %42, %43 : vector<16x128xf32>
    %45 = arith.mulf %44, %40 : vector<16x128xf32>
    %cst_23 = arith.constant 1.42141378 : f32
    %46 = vector.broadcast %cst_23 : f32 to vector<16x128xf32>
    %47 = arith.addf %45, %46 : vector<16x128xf32>
    %48 = arith.mulf %47, %40 : vector<16x128xf32>
    %cst_24 = arith.constant -0.284496725 : f32
    %49 = vector.broadcast %cst_24 : f32 to vector<16x128xf32>
    %50 = arith.addf %48, %49 : vector<16x128xf32>
    %51 = arith.mulf %50, %40 : vector<16x128xf32>
    %cst_25 = arith.constant 0.254829586 : f32
    %52 = vector.broadcast %cst_25 : f32 to vector<16x128xf32>
    %53 = arith.addf %51, %52 : vector<16x128xf32>
    %54 = arith.mulf %53, %40 : vector<16x128xf32>
    %cst_26 = arith.constant 0.000000e+00 : f32
    %55 = vector.broadcast %cst_26 : f32 to vector<16x128xf32>
    %56 = arith.subf %55, %34 : vector<16x128xf32>
    %57 = arith.mulf %56, %34 : vector<16x128xf32>
    %58 = math.exp %57 : vector<16x128xf32>
    %59 = arith.mulf %54, %58 : vector<16x128xf32>
    %cst_27 = arith.constant 1.000000e+00 : f32
    %60 = vector.broadcast %cst_27 : f32 to vector<16x128xf32>
    %61 = arith.subf %60, %59 : vector<16x128xf32>
    %cst_28 = arith.constant 0.000000e+00 : f32
    %62 = vector.broadcast %cst_28 : f32 to vector<16x128xf32>
    %63 = arith.cmpf oge, %33, %62 : vector<16x128xf32>
    %cst_29 = arith.constant 0.000000e+00 : f32
    %64 = vector.broadcast %cst_29 : f32 to vector<16x128xf32>
    %65 = arith.subf %64, %61 : vector<16x128xf32>
    %66 = arith.select %63, %61, %65 : vector<16x128xi1>, vector<16x128xf32>
    %cst_30 = arith.constant 1.000000e+00 : f32
    %67 = vector.broadcast %cst_30 : f32 to vector<16x128xf32>
    %68 = arith.addf %67, %66 : vector<16x128xf32>
    %69 = arith.mulf %31, %68 : vector<16x128xf32>
    %c0_31 = arith.constant 0 : index
    %c0_32 = arith.constant 0 : index
    %70 = vector.load %arg7[%c0_31, %c0_32] : memref<128x64xf32, #tpu.memory_space<vmem>>, vector<128x64xf32>
    %cst_33 = arith.constant dense<0.000000e+00> : vector<16x64xf32>
    %71 = tpu.matmul %69, %70, %cst_33 {dimension_numbers = #tpu.dot_dimension_numbers<[1], [0], [0], [1], [0, 0, 1, 1], [], []>} : vector<16x128xf32>, vector<128x64xf32>, vector<16x64xf32> -> vector<16x64xf32>
    %c0_34 = arith.constant 0 : index
    %c0_35 = arith.constant 0 : index
    %72 = vector.load %arg8[%c0_34, %c0_35] : memref<1x64xf32, #tpu.memory_space<vmem>>, vector<1x64xf32>
    %73 = vector.broadcast %72 : vector<1x64xf32> to vector<16x64xf32>
    %74 = arith.addf %71, %73 : vector<16x64xf32>
    %75 = arith.addf %2, %74 : vector<16x64xf32>
    %c0_36 = arith.constant 0 : index
    %c0_37 = arith.constant 0 : index
    %76 = vector.load %arg9[%c0_36, %c0_37] : memref<16x64xf32, #tpu.memory_space<vmem>>, vector<16x64xf32>
    tpu.vector_store %arg9[%c0_36, %c0_37], %75 {strides = array<i32>} : memref<16x64xf32, #tpu.memory_space<vmem>>, vector<16x64xf32>,
    return
  }
  func.func @transform_0(%arg0: i32) -> (i32, i32) {
    %c0_i32 = arith.constant 0 : i32
    %c0_i32_0 = arith.constant 0 : i32
    return %arg0, %c0_i32 : i32, i32
  }
  func.func @transform_1(%arg0: i32) -> (i32, i32) {
    %c0_i32 = arith.constant 0 : i32
    %c0_i32_0 = arith.constant 0 : i32
    return %arg0, %c0_i32 : i32, i32
  }
  func.func @transform_2(%arg0: i32) -> (i32, i32) {
    %c0_i32 = arith.constant 0 : i32
    %c0_i32_0 = arith.constant 0 : i32
    %c0_i32_1 = arith.constant 0 : i32
    return %c0_i32, %c0_i32_0 : i32, i32
  }
  func.func @transform_3(%arg0: i32) -> (i32, i32) {
    %c0_i32 = arith.constant 0 : i32
    %c0_i32_0 = arith.constant 0 : i32
    %c0_i32_1 = arith.constant 0 : i32
    return %c0_i32, %c0_i32_0 : i32, i32
  }
  func.func @transform_4(%arg0: i32) -> (i32, i32) {
    %c0_i32 = arith.constant 0 : i32
    %c0_i32_0 = arith.constant 0 : i32
    %c0_i32_1 = arith.constant 0 : i32
    return %c0_i32, %c0_i32_0 : i32, i32
  }
  func.func @transform_5(%arg0: i32) -> (i32, i32) {
    %c0_i32 = arith.constant 0 : i32
    %c0_i32_0 = arith.constant 0 : i32
    %c0_i32_1 = arith.constant 0 : i32
    return %c0_i32, %c0_i32_0 : i32, i32
  }
  func.func @transform_6(%arg0: i32) -> (i32, i32) {
    %c0_i32 = arith.constant 0 : i32
    %c0_i32_0 = arith.constant 0 : i32
    %c0_i32_1 = arith.constant 0 : i32
    return %c0_i32, %c0_i32_0 : i32, i32
  }
  func.func @transform_7(%arg0: i32) -> (i32, i32) {
    %c0_i32 = arith.constant 0 : i32
    %c0_i32_0 = arith.constant 0 : i32
    %c0_i32_1 = arith.constant 0 : i32
    return %c0_i32, %c0_i32_0 : i32, i32
  }
  func.func @transform_8(%arg0: i32) -> (i32, i32) {
    %c0_i32 = arith.constant 0 : i32
    %c0_i32_0 = arith.constant 0 : i32
    return %arg0, %c0_i32 : i32, i32
  }
}

module attributes {stable_mosaic.version = 11 : i64} {
  func.func @_tail_kernel(%arg0: i32, %arg1: memref<1x16x64xf32, #tpu.memory_space<vmem>>, %arg2: memref<1x64xf32, #tpu.memory_space<vmem>>, %arg3: memref<1x64xf32, #tpu.memory_space<vmem>>, %arg4: memref<64x10xf32, #tpu.memory_space<vmem>>, %arg5: memref<1x10xf32, #tpu.memory_space<vmem>>, %arg6: memref<1x1x10xf32, #tpu.memory_space<vmem>>) attributes {dimension_semantics = [#tpu.dimension_semantics<parallel>], iteration_bounds = array<i64: 2>, scalar_prefetch = 0 : i64, scratch_operands = 0 : i64, tpu.core_type = #tpu.core_type<tc>, window_params = [{transform_indices = @transform_0, window_bounds = array<i64: 1, 16, 64>}, {pipeline_mode = #tpu.pipeline_mode<synchronous>, transform_indices = @transform_1, window_bounds = array<i64: 1, 64>}, {pipeline_mode = #tpu.pipeline_mode<synchronous>, transform_indices = @transform_2, window_bounds = array<i64: 1, 64>}, {pipeline_mode = #tpu.pipeline_mode<synchronous>, transform_indices = @transform_3, window_bounds = array<i64: 64, 10>}, {pipeline_mode = #tpu.pipeline_mode<synchronous>, transform_indices = @transform_4, window_bounds = array<i64: 1, 10>}, {transform_indices = @transform_5, window_bounds = array<i64: 1, 1, 10>}]} {
    %c0 = arith.constant 0 : index
    %c0_0 = arith.constant 0 : index
    %c0_1 = arith.constant 0 : index
    %0 = vector.load %arg1[%c0, %c0_0, %c0_1] : memref<1x16x64xf32, #tpu.memory_space<vmem>>, vector<1x16x64xf32>
    %1 = vector.shape_cast %0 : vector<1x16x64xf32> to vector<16x64xf32>
    %c0_2 = arith.constant 0 : index
    %c0_3 = arith.constant 0 : index
    %2 = vector.load %arg2[%c0_2, %c0_3] : memref<1x64xf32, #tpu.memory_space<vmem>>, vector<1x64xf32>
    %c0_4 = arith.constant 0 : index
    %c0_5 = arith.constant 0 : index
    %3 = vector.load %arg3[%c0_4, %c0_5] : memref<1x64xf32, #tpu.memory_space<vmem>>, vector<1x64xf32>
    %cst = arith.constant dense<0.000000e+00> : vector<16xf32>
    %4 = vector.multi_reduction <add>, %1, %cst [1] : vector<16x64xf32> to vector<16xf32>
    %5 = vector.shape_cast %4 : vector<16xf32> to vector<16x1xf32>
    %cst_6 = arith.constant 6.400000e+01 : f32
    %6 = vector.broadcast %cst_6 : f32 to vector<16x1xf32>
    %7 = arith.divf %5, %6 : vector<16x1xf32>
    %8 = vector.broadcast %7 : vector<16x1xf32> to vector<16x64xf32>
    %9 = arith.subf %1, %8 : vector<16x64xf32>
    %10 = arith.mulf %9, %9 : vector<16x64xf32>
    %cst_7 = arith.constant dense<0.000000e+00> : vector<16xf32>
    %11 = vector.multi_reduction <add>, %10, %cst_7 [1] : vector<16x64xf32> to vector<16xf32>
    %12 = vector.shape_cast %11 : vector<16xf32> to vector<16x1xf32>
    %cst_8 = arith.constant 6.400000e+01 : f32
    %13 = vector.broadcast %cst_8 : f32 to vector<16x1xf32>
    %14 = arith.divf %12, %13 : vector<16x1xf32>
    %cst_9 = arith.constant 9.99999974E-6 : f32
    %15 = vector.broadcast %cst_9 : f32 to vector<16x1xf32>
    %16 = arith.addf %14, %15 : vector<16x1xf32>
    %17 = math.rsqrt %16 : vector<16x1xf32>
    %18 = vector.broadcast %17 : vector<16x1xf32> to vector<16x64xf32>
    %19 = arith.mulf %9, %18 : vector<16x64xf32>
    %20 = vector.broadcast %2 : vector<1x64xf32> to vector<16x64xf32>
    %21 = arith.mulf %19, %20 : vector<16x64xf32>
    %22 = vector.broadcast %3 : vector<1x64xf32> to vector<16x64xf32>
    %23 = arith.addf %21, %22 : vector<16x64xf32>
    %cst_10 = arith.constant dense<0.000000e+00> : vector<64xf32>
    %24 = vector.multi_reduction <add>, %23, %cst_10 [0] : vector<16x64xf32> to vector<64xf32>
    %25 = vector.shape_cast %24 : vector<64xf32> to vector<1x64xf32>
    %cst_11 = arith.constant 1.600000e+01 : f32
    %26 = vector.broadcast %cst_11 : f32 to vector<1x64xf32>
    %27 = arith.divf %25, %26 : vector<1x64xf32>
    %c0_12 = arith.constant 0 : index
    %c0_13 = arith.constant 0 : index
    %28 = vector.load %arg4[%c0_12, %c0_13] : memref<64x10xf32, #tpu.memory_space<vmem>>, vector<64x10xf32>
    %cst_14 = arith.constant dense<0.000000e+00> : vector<1x10xf32>
    %29 = tpu.matmul %27, %28, %cst_14 {dimension_numbers = #tpu.dot_dimension_numbers<[1], [0], [0], [1], [0, 0, 1, 1], [], []>} : vector<1x64xf32>, vector<64x10xf32>, vector<1x10xf32> -> vector<1x10xf32>
    %c0_15 = arith.constant 0 : index
    %c0_16 = arith.constant 0 : index
    %30 = vector.load %arg5[%c0_15, %c0_16] : memref<1x10xf32, #tpu.memory_space<vmem>>, vector<1x10xf32>
    %31 = arith.addf %29, %30 : vector<1x10xf32>
    %c0_17 = arith.constant 0 : index
    %c0_18 = arith.constant 0 : index
    %c0_19 = arith.constant 0 : index
    %32 = vector.load %arg6[%c0_17, %c0_18, %c0_19] : memref<1x1x10xf32, #tpu.memory_space<vmem>>, vector<1x1x10xf32>
    %33 = vector.shape_cast %32 : vector<1x1x10xf32> to vector<1x10xf32>
    %34 = vector.shape_cast %31 : vector<1x10xf32> to vector<1x1x10xf32>
    tpu.vector_store %arg6[%c0_17, %c0_18, %c0_19], %34 {strides = array<i32>} : memref<1x1x10xf32, #tpu.memory_space<vmem>>, vector<1x1x10xf32>,
    return
  }
  func.func @transform_0(%arg0: i32) -> (i32, i32, i32) {
    %c0_i32 = arith.constant 0 : i32
    %c0_i32_0 = arith.constant 0 : i32
    %c0_i32_1 = arith.constant 0 : i32
    return %arg0, %c0_i32, %c0_i32_0 : i32, i32, i32
  }
  func.func @transform_1(%arg0: i32) -> (i32, i32) {
    %c0_i32 = arith.constant 0 : i32
    %c0_i32_0 = arith.constant 0 : i32
    %c0_i32_1 = arith.constant 0 : i32
    return %c0_i32, %c0_i32_0 : i32, i32
  }
  func.func @transform_2(%arg0: i32) -> (i32, i32) {
    %c0_i32 = arith.constant 0 : i32
    %c0_i32_0 = arith.constant 0 : i32
    %c0_i32_1 = arith.constant 0 : i32
    return %c0_i32, %c0_i32_0 : i32, i32
  }
  func.func @transform_3(%arg0: i32) -> (i32, i32) {
    %c0_i32 = arith.constant 0 : i32
    %c0_i32_0 = arith.constant 0 : i32
    %c0_i32_1 = arith.constant 0 : i32
    return %c0_i32, %c0_i32_0 : i32, i32
  }
  func.func @transform_4(%arg0: i32) -> (i32, i32) {
    %c0_i32 = arith.constant 0 : i32
    %c0_i32_0 = arith.constant 0 : i32
    %c0_i32_1 = arith.constant 0 : i32
    return %c0_i32, %c0_i32_0 : i32, i32
  }
  func.func @transform_5(%arg0: i32) -> (i32, i32, i32) {
    %c0_i32 = arith.constant 0 : i32
    %c0_i32_0 = arith.constant 0 : i32
    %c0_i32_1 = arith.constant 0 : i32
    return %arg0, %c0_i32, %c0_i32_0 : i32, i32, i32
  }
}

</mosaic_0001>

<bundles_post_ra>
// kernel: _lambda_.11
= control target key start
LH: loop header
LB: loop body
LE: loop exit
PB: predicated region body
PF: predicated region fallthrough
CT: control target
= control target key end

     0   :  { %s516_s12 = smov 0   ;;  %s583_s0 = inlined_call_operand.vmem [shape: f32[128,64], index: 0, kind: input, shape index: {}]   ;;  %s584_s1 = inlined_call_operand.vmem [shape: f32[64,32], index: 1, kind: input, shape index: {}]   ;;  %s585_s2 = inlined_call_operand.vmem [shape: f32[1,32], index: 2, kind: input, shape index: {}]   ;;  %s586_s3 = inlined_call_operand.vmem [shape: f32[128,32], index: 3, kind: output, shape index: {}]  }
   0x1 LB: > { %s392_s13 = sadd.s32 4294967295, %s494_s12   ;;  %p396_p0 = scmp.ge.s32.totalorder %s494_s12, 1  ;;  %s494_s12 = sphi %s516_s12, %s13_s12  }
   0x2   : > { %p138_p1 = scmp.lt.s32.totalorder %s494_s12, 3 }
   0x4   : > { %p139_p2 = pnand %p396_p0, %p138_p1 }
   0x5   : > { %v182_v0 = vld [vmem:[%s584_s1] sm:$0xff] (!%p139_p2)  ;;  %v183_v1 = vld [vmem:[%s584_s1 + $0x8] sm:$0xff] (!%p139_p2)  ;;  %v184_v2 = vld [vmem:[%s584_s1 + $0x10] sm:$0xff] (!%p139_p2)  ;;  %s397_s20 = sshll.u32 (!%p139_p2), %s392_s13, 3  ;;  %vm197_vm0 = vcmask (!%p139_p2), 523264   ;;  %vm327_vm1 = vcmask (!%p139_p2), 261120  }
   0x6   : > { %142 = sbr.rel (%p139_p2) target bundleno = 245 (0xf5), region = 32  ;;  %v456_v3 = vpack.c.bf16 (!%p139_p2), %v183_v1, %v182_v0  ;;  %v185_v4 = vld [vmem:[%s584_s1 + $0x18] sm:$0xff] (!%p139_p2)  ;;  %p163_p3 = scmp.lt.s32.totalorder (!%p139_p2), %s397_s20, 15  ;;  %v186_v6 = vld [vmem:[%s584_s1 + $0x20] sm:$0xff] (!%p139_p2)  ;;  %v187_v7 = vld [vmem:[%s584_s1 + $0x28] sm:$0xff] (!%p139_p2) }
   0x7   : > { %v460_v5 = vpack.c.bf16 (!%p139_p2), %v185_v4, %v184_v2  ;;  %v464_v8 = vpack.c.bf16 (!%p139_p2), %v187_v7, %v186_v6  ;;  %v188_v9 = vld [vmem:[%s584_s1 + $0x30] sm:$0xff] (!%p139_p2)  ;;  %v189_v10 = vld [vmem:[%s584_s1 + $0x38] sm:$0xff] (!%p139_p2)  ;;  %v401_v20 = vld [vmem:[%s585_s2] ss:$0 sm:$0xff] (!%p139_p2) }
   0x8   : > { %457 = vmatprep.subr.bf16.mxu0 (!%p139_p2), %v456_v3  ;;  %472 = vmatprep.subr.bf16.mxu1 (!%p139_p2), %v456_v3  ;;  %v468_v13 = vpack.c.bf16 (!%p139_p2), %v189_v10, %v188_v9 }
   0x9   : > { %459 = vmatpush3.bf16.msra.mxu0 (!%p139_p2), %v456_v3  ;;  %476 = vmatpush3.bf16.msra.mxu1 (!%p139_p2), %v456_v3 }
   0xa   : > { %461 = vmatprep.subr.bf16.mxu0 (!%p139_p2), %v460_v5  ;;  %473 = vmatprep.subr.bf16.mxu1 (!%p139_p2), %v460_v5 }
   0xd   : > { %s588_s20 = smov (!%p163_p3, %s397_s20), 15  ;;  %463 = vmatpush3.bf16.msra.mxu0 %v460_v5  ;;  %477 = vmatpush3.bf16.msra.mxu1 %v460_v5 }
   0xe   : > { %s398_s27 = sshll.u32 %s588_s20, 3  ;;  %465 = vmatprep.subr.bf16.mxu0 %v464_v8  ;;  %474 = vmatprep.subr.bf16.mxu1 %v464_v8 }
   0xf   : > { %s166_s7 = scalar_lea.vmem %s583_s0, %s398_s27  ;;  %s172_s13 = scalar_lea.vmem %s586_s3, %s398_s27 }
  0x10   : > { %v174_v11 = vld [vmem:[%s166_s7] sm:$0xff]  ;;  %v175_v14 = vld [vmem:[%s166_s7 + $0x8] sm:$0xff]  ;;  %v176_v16 = vld [vmem:[%s166_s7 + $0x10] sm:$0xff] }
  0x11   : > { %v178_v12 = vld [vmem:[%s166_s7 + $0x20] sm:$0xff]  ;;  %444 = vmatprep.mubr.msk.f32.mxu0 %vm197_vm0, %v174_v11  ;;  %467 = vmatpush3.bf16.msra.mxu0 %v464_v8  ;;  %v179_v15 = vld [vmem:[%s166_s7 + $0x28] sm:$0xff]  ;;  %v180_v17 = vld [vmem:[%s166_s7 + $0x30] sm:$0xff] }
  0x12   : > { %450 = vmatprep.mubr.msk.f32.mxu1 %vm197_vm0, %v178_v12  ;;  %478 = vmatpush3.bf16.msra.mxu1 %v464_v8  ;;  %v177_v18 = vld [vmem:[%s166_s7 + $0x18] sm:$0xff] }
  0x13   : > { %469 = vmatprep.subr.bf16.mxu0 %v468_v13  ;;  %475 = vmatprep.subr.bf16.mxu1 %v468_v13  ;;  %v181_v19 = vld [vmem:[%s166_s7 + $0x38] sm:$0xff] }
  0x15   : > { %471 = vmatpush3.bf16.msra.mxu0 %v468_v13 }
  0x16   : > { %479 = vmatpush3.bf16.msra.mxu1 %v468_v13 }
  0x18   : > { %445 = vmatmul.mubr.msk.f32.vlgmr.msra.gmra.mrb[0].mxu0 %vm197_vm0, %v175_v14 }
  0x19   : > { %451 = vmatmul.mubr.msk.f32.vlgmr.msra.gmra.mrb[0].mxu1 %vm197_vm0, %v179_v15  ;;  %447 = vmatprep.mubr.msk.f32.mxu0 %vm197_vm0, %v176_v16 }
  0x1a   : > { %453 = vmatprep.mubr.msk.f32.mxu1 %vm197_vm0, %v180_v17 }
  0x1c   : > { %448 = vmatmul.mubr.msk.f32.gmra.mrb[2].mxu0 %vm197_vm0, %v177_v18 }
  0x1d   : > { %454 = vmatmul.mubr.msk.f32.gmra.mrb[2].mxu1 %vm197_vm0, %v181_v19 }
  0xeb   : > { %v446_v21 = vpop.f32.mrb[0].mxu0 }
  0xec   : > { %v452_v22 = vpop.f32.mrb[0].mxu1  ;;  %v294_v23 = vadd.f32 %v446_v21, %v401_v20  ;;  %v288_v25 = vpop.f32.mrb[1].mxu0 }
  0xed   : > { %v314_v24 = vadd.f32 %v452_v22, %v401_v20  ;;  %v308_v26 = vpop.f32.mrb[1].mxu1  ;;  %v289_v27 = vadd.f32 %v401_v20, %v288_v25 }
  0xee   : > { %v309_v28 = vadd.f32 %v401_v20, %v308_v26  ;;  %329 = vst.msk [vmem:[%s172_s13 + $0x8] sm:$0xff] %vm327_vm1, %v294_v23 }
  0xef   : > { %333 = vst.msk [vmem:[%s172_s13 + $0x28] sm:$0xff] %vm327_vm1, %v314_v24  ;;  %328 = vst.msk [vmem:[%s172_s13] sm:$0xff] %vm327_vm1, %v289_v27  ;;  %v449_v29 = vpop.f32.mrb[2].mxu0 }
  0xf0   : > { %332 = vst.msk [vmem:[%s172_s13 + $0x20] sm:$0xff] %vm327_vm1, %v309_v28  ;;  %v455_v30 = vpop.f32.mrb[2].mxu1  ;;  %v304_v31 = vadd.f32 %v449_v29, %v401_v20  ;;  %v298_v33 = vpop.f32.mrb[3].mxu0 }
  0xf1   : > { %v324_v32 = vadd.f32 %v455_v30, %v401_v20  ;;  %v318_v34 = vpop.f32.mrb[3].mxu1  ;;  %v299_v35 = vadd.f32 %v401_v20, %v298_v33 }
  0xf2   : > { %v319_v36 = vadd.f32 %v401_v20, %v318_v34  ;;  %331 = vst.msk [vmem:[%s172_s13 + $0x18] sm:$0xff] %vm327_vm1, %v304_v31 }
  0xf3   : > { %335 = vst.msk [vmem:[%s172_s13 + $0x38] sm:$0xff] %vm327_vm1, %v324_v32  ;;  %330 = vst.msk [vmem:[%s172_s13 + $0x10] sm:$0xff] %vm327_vm1, %v299_v35 }
  0xf4   : > { %334 = vst.msk [vmem:[%s172_s13 + $0x30] sm:$0xff] %vm327_vm1, %v319_v36 }
  0xf5 PF: > { %s13_s12 = sadd.s32 1, %s494_s12  }
  0xf6   : > { %p10_p4 = scmp.ge.s32.totalorder %s13_s12, 4  }
  0xf8   :  { %12 = sbr.rel (!%p10_p4) target bundleno = 1 (0x1), region = 62 }

// kernel: _lambda_.13
= control target key start
LH: loop header
LB: loop body
LE: loop exit
PB: predicated region body
PF: predicated region fallthrough
CT: control target
= control target key end

     0   :  { %s1326_s27 = smov 0   ;;  %s1646_s0 = inlined_call_operand.vmem [shape: f32[128,32], index: 0, kind: input, shape index: {}]   ;;  %s1647_s1 = inlined_call_operand.vmem [shape: f32[128,32], index: 1, kind: input, shape index: {}]   ;;  %s1648_s2 = inlined_call_operand.vmem [shape: f32[1,32], index: 2, kind: input, shape index: {}]   ;;  %s1649_s3 = inlined_call_operand.vmem [shape: f32[1,32], index: 3, kind: input, shape index: {}, may-alias: {3,7}]   ;;  %s1650_s4 = inlined_call_operand.vmem [shape: f32[32,64], index: 4, kind: input, shape index: {}]   ;;  %s1651_s5 = inlined_call_operand.vmem [shape: f32[1,64], index: 5, kind: input, shape index: {}]   ;;  %s1652_s6 = inlined_call_operand.vmem [shape: f32[64,32], index: 6, kind: input, shape index: {}]   ;;  %s1653_s7 = inlined_call_operand.vmem [shape: f32[1,32], index: 7, kind: input, shape index: {}, may-alias: {3,7}]   ;;  %s1654_s8 = inlined_call_operand.vmem [shape: f32[128,32], index: 8, kind: output, shape index: {}]  }
   0x1 LB: > { %s1076_s28 = sadd.s32 4294967295, %s1279_s27   ;;  %p1080_p0 = scmp.ge.s32.totalorder %s1279_s27, 1  ;;  %s1279_s27 = sphi %s1326_s27, %s18_s27  }
   0x2   : > { %p274_p1 = scmp.lt.s32.totalorder %s1279_s27, 3 }
   0x4   : > { %p275_p2 = pnand %p1080_p0, %p274_p1 }
   0x5   : > { %s1081_s29 = sshll.u32 (!%p275_p2), %s1076_s28, 3  ;;  %vm357_vm0 = vcmask (!%p275_p2), 261120   ;;  %vm862_vm3 = vcmask (!%p275_p2), 523264  }
   0x6   : > { %278 = sbr.rel (%p275_p2) target bundleno = 835 (0x343), region = 52  ;;  %p314_p3 = scmp.lt.s32.totalorder (!%p275_p2), %s1081_s29, 15 }
   0xd   : > { %s1656_s29 = smov (!%p314_p3, %s1081_s29), 15 }
   0xe   : > { %s1334_s30 = sshll.u32 %s1656_s29, 3 }
   0xf   : > { %s317_s11 = scalar_lea.vmem %s1646_s0, %s1334_s30  ;;  %s323_s14 = scalar_lea.vmem %s1647_s1, %s1334_s30 }
  0x10   : > { %v331_v0 = vld [vmem:[%s317_s11] sm:$0xff]  ;;  %v333_v2 = vld [vmem:[%s317_s11 + $0x10] sm:$0xff]  ;;  %v332_v5 = vld [vmem:[%s317_s11 + $0x8] sm:$0xff]  ;;  %s329_s9 = scalar_lea.vmem %s1654_s8, %s1334_s30 }
  0x11   : > { %v339_v1 = vld [vmem:[%s323_s14] sm:$0xff]  ;;  %v341_v4 = vld [vmem:[%s323_s14 + $0x10] sm:$0xff]  ;;  %v340_v6 = vld [vmem:[%s323_s14 + $0x8] sm:$0xff] }
  0x12   : > { %v1344_v3 = vadd.f32 %v339_v1, %v331_v0  ;;  %v1346_v7 = vadd.f32 %v341_v4, %v333_v2  ;;  %v1348_v8 = vadd.f32 %v340_v6, %v332_v5  ;;  %v334_v9 = vld [vmem:[%s317_s11 + $0x18] sm:$0xff]  ;;  %v335_v11 = vld [vmem:[%s317_s11 + $0x20] sm:$0xff]  ;;  %v336_v15 = vld [vmem:[%s317_s11 + $0x28] sm:$0xff] }
  0x13   : > { %v342_v10 = vld [vmem:[%s323_s14 + $0x18] sm:$0xff]  ;;  %v343_v14 = vld [vmem:[%s323_s14 + $0x20] sm:$0xff]  ;;  %v344_v16 = vld [vmem:[%s323_s14 + $0x28] sm:$0xff] }
  0x14   : > { %v358_v12 = vsel %vm357_vm0, %v1344_v3, 0.0  ;;  %v1352_v13 = vadd.f32 %v342_v10, %v334_v9  ;;  %v364_v17 = vsel %vm357_vm0, %v1346_v7, 0.0  ;;  %v361_v18 = vsel %vm357_vm0, %v1348_v8, 0.0  ;;  %v337_v22 = vld [vmem:[%s317_s11 + $0x30] sm:$0xff]  ;;  %v338_v24 = vld [vmem:[%s317_s11 + $0x38] sm:$0xff] }
  0x15   : > { %359 = vadd.xlane.f32.xlu0 %v358_v12  ;;  %365 = vadd.xlane.f32.xlu1 %v364_v17  ;;  %v1358_v19 = vadd.f32 %v343_v14, %v335_v11  ;;  %v1362_v21 = vadd.f32 %v344_v16, %v336_v15  ;;  %v345_v23 = vld [vmem:[%s323_s14 + $0x30] sm:$0xff]  ;;  %v346_v25 = vld [vmem:[%s323_s14 + $0x38] sm:$0xff]  ;;  %v491_v11 = vld [vmem:[%s1650_s4] sm:$0xff] }
  0x16   : > { %v367_v20 = vsel %vm357_vm0, %v1352_v13, 0.0  ;;  %v1366_v27 = vadd.f32 %v345_v23, %v337_v22  ;;  %v1370_v29 = vadd.f32 %v346_v25, %v338_v24  ;;  %v492_v12 = vld [vmem:[%s1650_s4 + $0x8] sm:$0xff]  ;;  %v493_v15 = vld [vmem:[%s1650_s4 + $0x10] sm:$0xff]  ;;  %v494_v16 = vld [vmem:[%s1650_s4 + $0x18] sm:$0xff] }
  0x17   : > { %v370_v26 = vsel %vm357_vm0, %v1358_v19, 0.0  ;;  %v373_v28 = vsel %vm357_vm0, %v1362_v21, 0.0  ;;  %v1185_v14 = vpack.c.bf16 %v492_v12, %v491_v11  ;;  %v1189_v17 = vpack.c.bf16 %v494_v16, %v493_v15 }
  0x18   : > { %v376_v30 = vsel %vm357_vm0, %v1366_v27, 0.0  ;;  %v379_v31 = vsel %vm357_vm0, %v1370_v29, 0.0 }
  0x19   : > { %362 = vadd.xlane.f32.xlu0 %v361_v18  ;;  %368 = vadd.xlane.f32.xlu1 %v367_v20 }
  0x1a   : > { %1186 = vmatprep.subr.bf16.mxu0 %v1185_v14 }
  0x1b   : > { %1188 = vmatpush3.bf16.msra.mxu0 %v1185_v14 }
  0x1c   : > { %1190 = vmatprep.subr.bf16.mxu0 %v1189_v17 }
  0x1d   : > { %371 = vadd.xlane.f32.xlu0 %v370_v26  ;;  %374 = vadd.xlane.f32.xlu1 %v373_v28 }
  0x1f   : > { %1192 = vmatpush3.bf16.msra.mxu0 %v1189_v17 }
  0x21   : > { %377 = vadd.xlane.f32.xlu0 %v376_v30  ;;  %380 = vadd.xlane.f32.xlu1 %v379_v31 }
  0xa2   : > { %v360_v32 = vpop.xlane.xlu0 %359  ;;  %v366_v34 = vpop.xlane.xlu1 %365 }
  0xa3   : > { %v383_v33 = vmul.f32 0.03125, %v360_v32  ;;  %v385_v35 = vmul.f32 0.03125, %v366_v34 }
  0xa5   : > { %v1377_v36 = vsub.f32 %v1344_v3, %v383_v33  ;;  %v1380_v37 = vsub.f32 %v1346_v7, %v385_v35 }
  0xa6   : > { %v363_v38 = vpop.xlane.xlu0 %362  ;;  %v369_v40 = vpop.xlane.xlu1 %368 }
  0xa7   : > { %v384_v39 = vmul.f32 0.03125, %v363_v38  ;;  %v399_v41 = vmul.f32 %v1377_v36, %v1377_v36  ;;  %v386_v42 = vmul.f32 0.03125, %v369_v40  ;;  %v401_v43 = vmul.f32 %v1380_v37, %v1380_v37 }
  0xa9   : > { %v1387_v44 = vsub.f32 %v1348_v8, %v384_v39  ;;  %v407_v45 = vsel %vm357_vm0, %v399_v41, 0.0  ;;  %v1391_v46 = vsub.f32 %v1352_v13, %v386_v42  ;;  %v413_v50 = vsel %vm357_vm0, %v401_v43, 0.0 }
  0xaa   : > { %408 = vadd.xlane.f32.xlu0 %v407_v45  ;;  %v372_v47 = vpop.xlane.xlu0 %371  ;;  %v375_v49 = vpop.xlane.xlu1 %374 }
  0xab   : > { %v387_v48 = vmul.f32 0.03125, %v372_v47  ;;  %v400_v51 = vmul.f32 %v1387_v44, %v1387_v44  ;;  %v388_v52 = vmul.f32 0.03125, %v375_v49  ;;  %v402_v53 = vmul.f32 %v1391_v46, %v1391_v46 }
  0xad   : > { %v1399_v54 = vsub.f32 %v1358_v19, %v387_v48  ;;  %v410_v55 = vsel %vm357_vm0, %v400_v51, 0.0  ;;  %v1403_v56 = vsub.f32 %v1362_v21, %v388_v52  ;;  %v416_v60 = vsel %vm357_vm0, %v402_v53, 0.0  ;;  %v1087_v48 = vld [vmem:[%s1648_s2] ss:$0 sm:$0xff] }
  0xae   : > { %414 = vadd.xlane.f32.xlu0 %v413_v50  ;;  %411 = vadd.xlane.f32.xlu1 %v410_v55  ;;  %v378_v57 = vpop.xlane.xlu0 %377  ;;  %v381_v59 = vpop.xlane.xlu1 %380  ;;  %v1088_v52 = vld [vmem:[%s1649_s3] ss:$0 sm:$0xff] }
  0xaf   : > { %v389_v58 = vmul.f32 0.03125, %v378_v57  ;;  %v403_v61 = vmul.f32 %v1399_v54, %v1399_v54  ;;  %v390_v62 = vmul.f32 0.03125, %v381_v59  ;;  %v404_v63 = vmul.f32 %v1403_v56, %v1403_v56 }
  0xb1   : > { %v1411_v0 = vsub.f32 %v1366_v27, %v389_v58  ;;  %v419_v1 = vsel %vm357_vm0, %v403_v61, 0.0  ;;  %v1415_v2 = vsub.f32 %v1370_v29, %v390_v62  ;;  %v422_v4 = vsel %vm357_vm0, %v404_v63, 0.0 }
  0xb2   : > { %417 = vadd.xlane.f32.xlu1 %v416_v60  ;;  %420 = vadd.xlane.f32.xlu0 %v419_v1 }
  0xb3   : > { %v405_v5 = vmul.f32 %v1411_v0, %v1411_v0  ;;  %v406_v6 = vmul.f32 %v1415_v2, %v1415_v2 }
  0xb5   : > { %v425_v9 = vsel %vm357_vm0, %v405_v5, 0.0  ;;  %v428_v10 = vsel %vm357_vm0, %v406_v6, 0.0 }
  0xb6   : > { %423 = vadd.xlane.f32.xlu1 %v422_v4  ;;  %426 = vadd.xlane.f32.xlu0 %v425_v9 }
  0xba   : > { %429 = vadd.xlane.f32.xlu1 %v428_v10 }
 0x137   : > { %v409_v18 = vpop.xlane.xlu0 %408 }
 0x138   : > { %v431_v20 = vmul.f32 0.03125, %v409_v18 }
 0x13a   : > { %v439_v22 = vadd.f32 1e-05, %v431_v20 }
 0x13b   : > { %v412_v23 = vpop.xlane.xlu1 %411  ;;  %v415_v24 = vpop.xlane.xlu0 %414 }
 0x13c   : > { %1225 = vrsqrt.f32 %v439_v22  ;;  %v432_v25 = vmul.f32 0.03125, %v412_v23  ;;  %v433_v26 = vmul.f32 0.03125, %v415_v24  ;;  %v848_v24 = vld [vmem:[%s1652_s6 + $0x8] sm:$0xff] }
 0x13e   : > { %v440_v28 = vadd.f32 1e-05, %v432_v25  ;;  %v441_v30 = vadd.f32 1e-05, %v433_v26  ;;  %v850_v26 = vld [vmem:[%s1652_s6 + $0x18] sm:$0xff] }
 0x13f   : > { %v418_v31 = vpop.xlane.xlu1 %417  ;;  %v421_v32 = vpop.xlane.xlu0 %420 }
 0x140   : > { %1227 = vrsqrt.f32 %v440_v28  ;;  %v434_v33 = vmul.f32 0.03125, %v418_v31  ;;  %v435_v34 = vmul.f32 0.03125, %v421_v32  ;;  %v852_v31 = vld [vmem:[%s1652_s6 + $0x28] sm:$0xff] }
 0x141   : > { %1229 = vrsqrt.f32 %v441_v30  ;;  %v851_v30 = vld [vmem:[%s1652_s6 + $0x20] sm:$0xff] }
 0x142   : > { %v442_v35 = vadd.f32 1e-05, %v434_v33  ;;  %v443_v38 = vadd.f32 1e-05, %v435_v34  ;;  %v1201_v32 = vpack.c.bf16 %v852_v31, %v851_v30  ;;  %v853_v33 = vld [vmem:[%s1652_s6 + $0x30] sm:$0xff]  ;;  %v854_v34 = vld [vmem:[%s1652_s6 + $0x38] sm:$0xff] }
 0x143   : > { %v424_v39 = vpop.xlane.xlu1 %423  ;;  %v427_v40 = vpop.xlane.xlu0 %426 }
 0x144   : > { %1231 = vrsqrt.f32 %v442_v35  ;;  %v436_v41 = vmul.f32 0.03125, %v424_v39  ;;  %v437_v42 = vmul.f32 0.03125, %v427_v40  ;;  %v1205_v35 = vpack.c.bf16 %v854_v34, %v853_v33 }
 0x145   : > { %1233 = vrsqrt.f32 %v443_v38  ;;  %v1089_v38 = vld [vmem:[%s1651_s5] ss:$0 sm:$0xff] }
 0x146   : > { %v1226_v43 = vpop.eup %1225  ;;  %v444_v45 = vadd.f32 1e-05, %v436_v41  ;;  %v445_v47 = vadd.f32 1e-05, %v437_v42 }
 0x147   : > { %v430_v49 = vpop.xlane.xlu1 %429  ;;  %v455_v50 = vmul.f32 %v1226_v43, %v1377_v36 }
 0x148   : > { %1235 = vrsqrt.f32 %v444_v45  ;;  %v438_v51 = vmul.f32 0.03125, %v430_v49 }
 0x149   : > { %1237 = vrsqrt.f32 %v445_v47  ;;  %v469_v53 = vmul.f32 %v1087_v48, %v455_v50 }
 0x14a   : > { %v1228_v55 = vpop.eup %1227  ;;  %v446_v57 = vadd.f32 1e-05, %v438_v51 }
 0x14b   : > { %v1230_v58 = vpop.eup %1229  ;;  %v483_v59 = vadd.f32 %v1088_v52, %v469_v53  ;;  %v456_v60 = vmul.f32 %v1228_v55, %v1387_v44 }
 0x14c   : > { %1239 = vrsqrt.f32 %v446_v57  ;;  %v457_v61 = vmul.f32 %v1230_v58, %v1380_v37 }
 0x14d   : > { %1145 = vmatprep.mubr.msk.f32.mxu0 %vm357_vm0, %v483_v59  ;;  %v470_v36 = vmul.f32 %v1087_v48, %v456_v60 }
 0x14e   : > { %v1232_v62 = vpop.eup %1231  ;;  %v471_v63 = vmul.f32 %v1087_v48, %v457_v61 }
 0x14f   : > { %v1234_v1 = vpop.eup %1233  ;;  %v484_v4 = vadd.f32 %v1088_v52, %v470_v36  ;;  %v458_v5 = vmul.f32 %v1232_v62, %v1391_v46 }
 0x150   : > { %v485_v6 = vadd.f32 %v1088_v52, %v471_v63  ;;  %v459_v9 = vmul.f32 %v1234_v1, %v1399_v54 }
 0x151   : > { %1146 = vmatmul.mubr.msk.f32.vlgmr.msra.gmra.mrb[0].mxu0 %vm357_vm0, %v484_v4  ;;  %v472_v10 = vmul.f32 %v1087_v48, %v458_v5 }
 0x152   : > { %v1236_v11 = vpop.eup %1235  ;;  %1148 = vmatprep.mubr.msk.f32.mxu0 %vm357_vm0, %v485_v6  ;;  %v473_v44 = vmul.f32 %v1087_v48, %v459_v9 }
 0x153   : > { %v1238_v37 = vpop.eup %1237  ;;  %v486_v12 = vadd.f32 %v1088_v52, %v472_v10  ;;  %v460_v14 = vmul.f32 %v1236_v11, %v1403_v56 }
 0x154   : > { %v487_v15 = vadd.f32 %v1088_v52, %v473_v44  ;;  %v461_v16 = vmul.f32 %v1238_v37, %v1411_v0  ;;  %v847_v0 = vld [vmem:[%s1652_s6] sm:$0xff] }
 0x155   : > { %1149 = vmatmul.mubr.msk.f32.gmra.mrb[2].mxu0 %vm357_vm0, %v486_v12  ;;  %v474_v46 = vmul.f32 %v1087_v48, %v460_v14  ;;  %v1193_v25 = vpack.c.bf16 %v848_v24, %v847_v0 }
 0x156   : > { %v1240_v17 = vpop.eup %1239  ;;  %1151 = vmatprep.mubr.msk.f32.mxu0 %vm357_vm0, %v487_v15  ;;  %v475_v54 = vmul.f32 %v1087_v48, %v461_v16 }
 0x157   : > { %v488_v18 = vadd.f32 %v1088_v52, %v474_v46  ;;  %v462_v20 = vmul.f32 %v1240_v17, %v1415_v2  ;;  %1194 = vmatprep.subr.bf16.mxu0 %v1193_v25  ;;  %1209 = vmatprep.subr.bf16.mxu1 %v1193_v25  ;;  %v849_v2 = vld [vmem:[%s1652_s6 + $0x10] sm:$0xff] }
 0x158   : > { %v489_v22 = vadd.f32 %v1088_v52, %v475_v54  ;;  %1196 = vmatpush3.bf16.msra.mxu0 %v1193_v25  ;;  %1213 = vmatpush3.bf16.msra.mxu1 %v1193_v25  ;;  %v1197_v28 = vpack.c.bf16 %v850_v26, %v849_v2 }
 0x159   : > { %1152 = vmatmul.mubr.msk.f32.gmra.mrb[4].mxu0 %vm357_vm0, %v488_v18  ;;  %v476_v23 = vmul.f32 %v1087_v48, %v462_v20 }
 0x15a   : > { %1154 = vmatprep.mubr.msk.f32.mxu0 %vm357_vm0, %v489_v22  ;;  %1198 = vmatprep.subr.bf16.mxu0 %v1197_v28 }
 0x15b   : > { %v490_v56 = vadd.f32 %v1088_v52, %v476_v23  ;;  %1210 = vmatprep.subr.bf16.mxu1 %v1197_v28 }
 0x15c   : > { %1200 = vmatpush3.bf16.msra.mxu0 %v1197_v28  ;;  %1214 = vmatpush3.bf16.msra.mxu1 %v1197_v28 }
 0x15d   : > { %1155 = vmatmul.mubr.msk.f32.gmra.mrb[6].mxu0 %vm357_vm0, %v490_v56  ;;  %1202 = vmatprep.subr.bf16.mxu0 %v1201_v32 }
 0x15e   : > { %1211 = vmatprep.subr.bf16.mxu1 %v1201_v32 }
 0x160   : > { %1204 = vmatpush3.bf16.msra.mxu0 %v1201_v32  ;;  %1215 = vmatpush3.bf16.msra.mxu1 %v1201_v32 }
 0x161   : > { %1206 = vmatprep.subr.bf16.mxu0 %v1205_v35  ;;  %1212 = vmatprep.subr.bf16.mxu1 %v1205_v35 }
 0x164   : > { %1208 = vmatpush3.bf16.msra.mxu0 %v1205_v35  ;;  %1216 = vmatpush3.bf16.msra.mxu1 %v1205_v35 }
 0x224   : > { %v1147_v39 = vpop.f32.mrb[0].mxu0 }
 0x225   : > { %v1485_v40 = vadd.f32 %v1147_v39, %v1089_v38  ;;  %v592_v41 = vpop.f32.mrb[1].mxu0 }
 0x226   : > { %v1487_v42 = vadd.f32 %v1089_v38, %v592_v41 }
 0x227   : > { %v1490_v43 = vmul.f32 0.70710677, %v1485_v40 }
 0x228   : > { %v1493_v45 = vmul.f32 0.70710677, %v1487_v42  ;;  %v1150_v47 = vpop.f32.mrb[2].mxu0 }
 0x229   : > { %v648_v48 = vand.u32 2147483647, %v1490_v43  ;;  %v1496_v49 = vadd.f32 %v1150_v47, %v1089_v38  ;;  %v602_v50 = vpop.f32.mrb[3].mxu0  ;;  %vm808_vm1 = vcmp.ge.f32.partialorder %v1490_v43, 0.0  ;;  %v632_v43 = vmul.f32 0.5, %v1485_v40 }
 0x22a   : > { %v647_v51 = vand.u32 2147483647, %v1493_v45  ;;  %v1499_v52 = vadd.f32 %v1089_v38, %v602_v50  ;;  %vm807_vm2 = vcmp.ge.f32.partialorder %v1493_v45, 0.0 }
 0x22b   : > { %v656_v53 = vmul.f32 0.3275911, %v648_v48  ;;  %v1502_v55 = vmul.f32 0.70710677, %v1496_v49  ;;  %v760_v6 = vsub.f32 0.0, %v648_v48 }
 0x22c   : > { %v655_v57 = vmul.f32 0.3275911, %v647_v51  ;;  %v1505_v58 = vmul.f32 0.70710677, %v1499_v52  ;;  %v1153_v61 = vpop.f32.mrb[4].mxu0  ;;  %v759_v14 = vsub.f32 0.0, %v647_v51 }
 0x22d   : > { %v664_v59 = vadd.f32 1.0, %v656_v53  ;;  %v650_v60 = vand.u32 2147483647, %v1502_v55  ;;  %v612_v63 = vpop.f32.mrb[5].mxu0  ;;  %v1509_v10 = vadd.f32 %v1153_v61, %v1089_v38  ;;  %v768_v16 = vmul.f32 %v760_v6, %v648_v48 }
 0x22e   : > { %v663_v36 = vadd.f32 1.0, %v655_v57  ;;  %v649_v62 = vand.u32 2147483647, %v1505_v58  ;;  %v1511_v37 = vadd.f32 %v1089_v38, %v612_v63  ;;  %v767_v26 = vmul.f32 %v759_v14, %v647_v51 }
 0x22f   : > { %1241 = vrcp.f32 %v664_v59  ;;  %v658_v1 = vmul.f32 0.3275911, %v650_v60  ;;  %v1514_v12 = vmul.f32 0.70710677, %v1509_v10  ;;  %v762_v23 = vsub.f32 0.0, %v650_v60 }
 0x230   : > { %1243 = vrcp.f32 %v663_v36  ;;  %v657_v4 = vmul.f32 0.3275911, %v649_v62  ;;  %v1156_v5 = vpop.f32.mrb[6].mxu0  ;;  %v1517_v15 = vmul.f32 0.70710677, %v1511_v37  ;;  %v761_v56 = vsub.f32 0.0, %v649_v62 }
 0x231   : > { %v666_v9 = vadd.f32 1.0, %v658_v1  ;;  %v622_v11 = vpop.f32.mrb[7].mxu0  ;;  %v652_v46 = vand.u32 2147483647, %v1514_v12  ;;  %v1520_v17 = vadd.f32 %v1156_v5, %v1089_v38  ;;  %v777_v2 = vmul.f32 1.442695, %v768_v16 }
 0x232   : > { %v665_v44 = vadd.f32 1.0, %v657_v4  ;;  %v651_v54 = vand.u32 2147483647, %v1517_v15  ;;  %v1523_v18 = vadd.f32 %v1089_v38, %v622_v11  ;;  %v770_v48 = vmul.f32 %v762_v23, %v650_v60 }
 0x233   : > { %1245 = vrcp.f32 %v666_v9  ;;  %v660_v20 = vmul.f32 0.3275911, %v652_v46  ;;  %v1526_v22 = vmul.f32 0.70710677, %v1520_v17  ;;  %v764_v33 = vsub.f32 0.0, %v652_v46 }
 0x234   : > { %1247 = vrcp.f32 %v665_v44  ;;  %v659_v0 = vmul.f32 0.3275911, %v651_v54  ;;  %v1529_v24 = vmul.f32 0.70710677, %v1523_v18  ;;  %v763_v39 = vsub.f32 0.0, %v651_v54 }
 0x235   : > { %v668_v28 = vadd.f32 1.0, %v660_v20  ;;  %v654_v30 = vand.u32 2147483647, %v1526_v22  ;;  %v769_v50 = vmul.f32 %v761_v56, %v649_v62  ;;  %v775_v63 = vmul.f32 1.442695, %v767_v26 }
 0x236   : > { %v667_v34 = vadd.f32 1.0, %v659_v0  ;;  %v653_v35 = vand.u32 2147483647, %v1529_v24  ;;  %v772_v4 = vmul.f32 %v764_v33, %v652_v46  ;;  %v771_v9 = vmul.f32 %v763_v39, %v651_v54 }
 0x237   : > { %1249 = vrcp.f32 %v668_v28  ;;  %v662_v41 = vmul.f32 0.3275911, %v654_v30  ;;  %v766_v59 = vsub.f32 0.0, %v654_v30  ;;  %v781_v44 = vmul.f32 1.442695, %v770_v48 }
 0x238   : > { %1251 = vrcp.f32 %v667_v34  ;;  %v661_v61 = vmul.f32 0.3275911, %v653_v35  ;;  %v779_v16 = vmul.f32 1.442695, %v769_v50  ;;  %v785_v54 = vmul.f32 1.442695, %v772_v4 }
 0x239   : > { %v1531_v25 = vpop.eup %1241  ;;  %v670_v57 = vadd.f32 1.0, %v662_v41  ;;  %v774_v20 = vmul.f32 %v766_v59, %v654_v30  ;;  %v783_v26 = vmul.f32 1.442695, %v771_v9  ;;  %v765_v28 = vsub.f32 0.0, %v653_v35 }
 0x23a   : > { %v1534_v31 = vpop.eup %1243  ;;  %v688_v32 = vmul.f32 1.0614054, %v1531_v25  ;;  %v669_v60 = vadd.f32 1.0, %v661_v61  ;;  %v1553_v30 = vmul.f32 0.5, %v1487_v42  ;;  %vm810_vm4 = vcmp.ge.f32.partialorder %v1502_v55, 0.0 }
 0x23b   : > { %v687_v38 = vmul.f32 1.0614054, %v1534_v31  ;;  %1253 = vrcp.f32 %v670_v57  ;;  %v789_v39 = vmul.f32 1.442695, %v774_v20  ;;  %v773_v42 = vmul.f32 %v765_v28, %v653_v35 }
 0x23c   : > { %v696_v47 = vadd.f32 -1.4531521, %v688_v32  ;;  %1255 = vpow2.f32 %v777_v2  ;;  %vm809_vm5 = vcmp.ge.f32.partialorder %v1505_v58, 0.0  ;;  %vm812_vm6 = vcmp.ge.f32.partialorder %v1514_v12, 0.0 }
 0x23d   : > { %v1539_v51 = vpop.eup %1245  ;;  %v695_v53 = vadd.f32 -1.4531521, %v687_v38  ;;  %1257 = vrcp.f32 %v669_v60  ;;  %vm811_vm7 = vcmp.ge.f32.partialorder %v1517_v15, 0.0  ;;  %v635_v58 = vmul.f32 0.5, %v1511_v37 }
 0x23e   : > { %v704_v36 = vmul.f32 %v1531_v25, %v696_v47  ;;  %v690_v1 = vmul.f32 1.0614054, %v1539_v51  ;;  %v1543_v5 = vpop.eup %1247  ;;  %1259 = vpow2.f32 %v775_v63  ;;  %vm814_vm8 = vcmp.ge.f32.partialorder %v1526_v22, 0.0 }
 0x23f   : > { %v703_v6 = vmul.f32 %v1534_v31, %v695_v53  ;;  %v689_v56 = vmul.f32 1.0614054, %v1543_v5  ;;  %1261 = vpow2.f32 %v781_v44  ;;  %v636_v15 = vmul.f32 0.5, %v1509_v10 }
 0x240   : > { %v712_v62 = vadd.f32 1.4214138, %v704_v36  ;;  %v698_v11 = vadd.f32 -1.4531521, %v690_v1  ;;  %1263 = vpow2.f32 %v779_v16  ;;  %vm813_vm9 = vcmp.ge.f32.partialorder %v1529_v24, 0.0 }
 0x241   : > { %v711_v14 = vadd.f32 1.4214138, %v703_v6  ;;  %v697_v33 = vadd.f32 -1.4531521, %v689_v56  ;;  %v1550_v34 = vpop.eup %1249  ;;  %1265 = vpow2.f32 %v785_v54  ;;  %v637_v22 = vmul.f32 0.5, %v1523_v18 }
 0x242   : > { %v720_v23 = vmul.f32 %v1531_v25, %v712_v62  ;;  %v706_v46 = vmul.f32 %v1539_v51, %v698_v11  ;;  %v1555_v41 = vpop.eup %1251  ;;  %v692_v50 = vmul.f32 1.0614054, %v1550_v34  ;;  %1267 = vpow2.f32 %v783_v26  ;;  %v1098_v24 = vld [vmem:[%s1653_s7] ss:$0 sm:$0xff] }
 0x243   : > { %v719_v0 = vmul.f32 %v1534_v31, %v711_v14  ;;  %v705_v53 = vmul.f32 %v1543_v5, %v697_v33  ;;  %v691_v59 = vmul.f32 1.0614054, %v1555_v41  ;;  %1269 = vpow2.f32 %v789_v39 }
 0x244   : > { %v728_v32 = vadd.f32 -0.28449672, %v720_v23  ;;  %v714_v2 = vadd.f32 1.4214138, %v706_v46  ;;  %v700_v63 = vadd.f32 -1.4531521, %v692_v50 }
 0x245   : > { %v727_v38 = vadd.f32 -0.28449672, %v719_v0  ;;  %v1563_v1 = vpop.eup %1253  ;;  %v699_v6 = vadd.f32 -1.4531521, %v691_v59  ;;  %v713_v9 = vadd.f32 1.4214138, %v705_v53 }
 0x246   : > { %v736_v47 = vmul.f32 %v1531_v25, %v728_v32  ;;  %v722_v48 = vmul.f32 %v1539_v51, %v714_v2  ;;  %v1256_v60 = vpop.eup %1255  ;;  %v708_v35 = vmul.f32 %v1550_v34, %v700_v63  ;;  %v694_v44 = vmul.f32 1.0614054, %v1563_v1 }
 0x247   : > { %v735_v57 = vmul.f32 %v1534_v31, %v727_v38  ;;  %v1571_v14 = vpop.eup %1257  ;;  %v707_v20 = vmul.f32 %v1555_v41, %v699_v6  ;;  %v787_v23 = vmul.f32 1.442695, %v773_v42  ;;  %v721_v46 = vmul.f32 %v1543_v5, %v713_v9 }
 0x248   : > { %v744_v61 = vadd.f32 0.2548296, %v736_v47  ;;  %v730_v36 = vadd.f32 -0.28449672, %v722_v48  ;;  %v1260_v56 = vpop.eup %1259  ;;  %v716_v54 = vadd.f32 1.4214138, %v708_v35 }
 0x249   : > { %v743_v4 = vadd.f32 0.2548296, %v735_v57  ;;  %v702_v26 = vadd.f32 -1.4531521, %v694_v44  ;;  %v715_v32 = vadd.f32 1.4214138, %v707_v20  ;;  %v1262_v38 = vpop.eup %1261  ;;  %1271 = vpow2.f32 %v787_v23 }
 0x24a   : > { %v752_v62 = vmul.f32 %v1531_v25, %v744_v61  ;;  %v738_v11 = vmul.f32 %v1539_v51, %v730_v36  ;;  %v693_v2 = vmul.f32 1.0614054, %v1571_v14  ;;  %v729_v33 = vadd.f32 -0.28449672, %v721_v46  ;;  %v1264_v50 = vpop.eup %1263 }
 0x24b   : > { %v751_v16 = vmul.f32 %v1534_v31, %v743_v4  ;;  %v724_v47 = vmul.f32 %v1550_v34, %v716_v54  ;;  %v710_v48 = vmul.f32 %v1563_v1, %v702_v26  ;;  %v723_v57 = vmul.f32 %v1555_v41, %v715_v32  ;;  %v1266_v6 = vpop.eup %1265 }
 0x24c   : > { %v792_v0 = vmul.f32 %v1256_v60, %v752_v62  ;;  %v746_v25 = vadd.f32 0.2548296, %v738_v11  ;;  %v701_v59 = vadd.f32 -1.4531521, %v693_v2  ;;  %v737_v42 = vmul.f32 %v1543_v5, %v729_v33  ;;  %v1268_v11 = vpop.eup %1267 }
 0x24d   : > { %v791_v28 = vmul.f32 %v1260_v56, %v751_v16  ;;  %v732_v63 = vadd.f32 -0.28449672, %v724_v47  ;;  %v718_v4 = vadd.f32 1.4214138, %v710_v48  ;;  %v731_v60 = vadd.f32 -0.28449672, %v723_v57  ;;  %v1270_v46 = vpop.eup %1269 }
 0x24e   : > { %v800_v39 = vsub.f32 1.0, %v792_v0  ;;  %v754_v31 = vmul.f32 %v1539_v51, %v746_v25  ;;  %v709_v51 = vmul.f32 %v1571_v14, %v701_v59  ;;  %v745_v62 = vadd.f32 0.2548296, %v737_v42 }
 0x24f   : > { %v799_v53 = vsub.f32 1.0, %v791_v28  ;;  %v740_v16 = vmul.f32 %v1550_v34, %v732_v63  ;;  %v726_v20 = vmul.f32 %v1563_v1, %v718_v4  ;;  %v739_v25 = vmul.f32 %v1555_v41, %v731_v60 }
 0x250   : > { %v816_v61 = vsub.f32 0.0, %v800_v39  ;;  %v794_v36 = vmul.f32 %v1262_v38, %v754_v31  ;;  %v717_v54 = vadd.f32 1.4214138, %v709_v51  ;;  %v753_v38 = vmul.f32 %v1543_v5, %v745_v62 }
 0x251   : > { %v815_v9 = vsub.f32 0.0, %v799_v53  ;;  %v748_v28 = vadd.f32 0.2548296, %v740_v16  ;;  %v734_v32 = vadd.f32 -0.28449672, %v726_v20 }
 0x252   : > { %v824_v35 = vsel %vm808_vm1, %v800_v39, %v816_v61  ;;  %v802_v44 = vsub.f32 1.0, %v794_v36  ;;  %v747_v2 = vadd.f32 0.2548296, %v739_v25  ;;  %v725_v33 = vmul.f32 %v1571_v14, %v717_v54 }
 0x253   : > { %v832_v56 = vadd.f32 1.0, %v824_v35  ;;  %v823_v0 = vsel %vm807_vm2, %v799_v53, %v815_v9  ;;  %v756_v45 = vmul.f32 %v1550_v34, %v748_v28  ;;  %v742_v47 = vmul.f32 %v1563_v1, %v734_v32 }
 0x254   : > { %v831_v26 = vadd.f32 1.0, %v823_v0  ;;  %v818_v31 = vsub.f32 0.0, %v802_v44  ;;  %v755_v53 = vmul.f32 %v1555_v41, %v747_v2  ;;  %v733_v57 = vadd.f32 -0.28449672, %v725_v33 }
 0x255   : > { %v840_v48 = vmul.f32 %v832_v56, %v632_v43  ;;  %v793_v59 = vmul.f32 %v1264_v50, %v753_v38  ;;  %v796_v23 = vmul.f32 %v1266_v6, %v756_v45  ;;  %v750_v42 = vadd.f32 0.2548296, %v742_v47 }
 0x256   : > { %v839_v39 = vmul.f32 %v831_v26, %v1553_v30  ;;  %v795_v40 = vmul.f32 %v1268_v11, %v755_v53  ;;  %v741_v5 = vmul.f32 %v1571_v14, %v733_v57  ;;  %v826_v34 = vsel %vm810_vm4, %v802_v44, %v818_v31  ;;  %v1272_v11 = vpop.eup %1271 }
 0x257   : > { %v801_v30 = vsub.f32 1.0, %v793_v59  ;;  %v804_v61 = vsub.f32 1.0, %v796_v23  ;;  %v758_v36 = vmul.f32 %v1563_v1, %v750_v42  ;;  %v633_v41 = vmul.f32 0.5, %v1499_v52 }
 0x258   : > { %1173 = vmatprep.mubr.msk.f32.mxu0 %vm862_vm3, %v839_v39  ;;  %v803_v63 = vsub.f32 1.0, %v795_v40  ;;  %v749_v50 = vadd.f32 0.2548296, %v741_v5  ;;  %v834_v9 = vadd.f32 1.0, %v826_v34  ;;  %v634_v44 = vmul.f32 0.5, %v1496_v49 }
 0x259   : > { %1174 = vmatmul.mubr.msk.f32.vlgmr.msra.gmra.mrb[8].mxu0 %vm862_vm3, %v840_v48  ;;  %v817_v4 = vsub.f32 0.0, %v801_v30  ;;  %v820_v55 = vsub.f32 0.0, %v804_v61  ;;  %v798_v6 = vmul.f32 %v1270_v46, %v758_v36  ;;  %v638_v2 = vmul.f32 0.5, %v1520_v17 }
 0x25a   : > { %v819_v60 = vsub.f32 0.0, %v803_v63  ;;  %v757_v51 = vmul.f32 %v1571_v14, %v749_v50  ;;  %v842_v0 = vmul.f32 %v834_v9, %v634_v44 }
 0x25b   : > { %v825_v62 = vsel %vm809_vm5, %v801_v30, %v817_v4  ;;  %v828_v35 = vsel %vm812_vm6, %v804_v61, %v820_v55  ;;  %v806_v1 = vsub.f32 1.0, %v798_v6 }
 0x25c   : > { %v833_v52 = vadd.f32 1.0, %v825_v62  ;;  %v827_v16 = vsel %vm811_vm7, %v803_v63, %v819_v60  ;;  %v797_v20 = vmul.f32 %v1272_v11, %v757_v51  ;;  %v836_v25 = vadd.f32 1.0, %v828_v35 }
 0x25d   : > { %v835_v12 = vadd.f32 1.0, %v827_v16  ;;  %v822_v56 = vsub.f32 0.0, %v806_v1 }
 0x25e   : > { %v841_v46 = vmul.f32 %v833_v52, %v633_v41  ;;  %v805_v14 = vsub.f32 1.0, %v797_v20  ;;  %v844_v49 = vmul.f32 %v836_v25, %v636_v15 }
 0x25f   : > { %v843_v54 = vmul.f32 %v835_v12, %v635_v58  ;;  %v830_v26 = vsel %vm814_vm8, %v806_v1, %v822_v56 }
 0x260   : > { %1176 = vmatprep.mubr.msk.f32.mxu1 %vm862_vm3, %v841_v46  ;;  %v821_v28 = vsub.f32 0.0, %v805_v14  ;;  %v838_v37 = vadd.f32 1.0, %v830_v26 }
 0x261   : > { %1177 = vmatmul.mubr.msk.f32.vlgmr.msra.gmra.mrb[0].mxu1 %vm862_vm3, %v842_v0 }
 0x262   : > { %1179 = vmatprep.mubr.msk.f32.mxu1 %vm862_vm3, %v843_v54  ;;  %v829_v32 = vsel %vm813_vm9, %v805_v14, %v821_v28  ;;  %v846_v10 = vmul.f32 %v838_v37, %v638_v2 }
 0x263   : > { %v837_v43 = vadd.f32 1.0, %v829_v32 }
 0x265   : > { %1180 = vmatmul.mubr.msk.f32.gmra.mrb[2].mxu1 %vm862_vm3, %v844_v49  ;;  %v845_v33 = vmul.f32 %v837_v43, %v637_v22 }
 0x267   : > { %1182 = vmatprep.mubr.msk.f32.mxu1 %vm862_vm3, %v845_v33 }
 0x269   : > { %1183 = vmatmul.mubr.msk.f32.gmra.mrb[4].mxu1 %vm862_vm3, %v846_v10 }
 0x32c   : > { %v1175_v38 = vpop.f32.mrb[8].mxu0 }
 0x32d   : > { %v959_v39 = vadd.f32 %v1175_v38, %v1098_v24  ;;  %v953_v31 = vpop.f32.mrb[9].mxu0 }
 0x32e   : > { %v954_v17 = vadd.f32 %v1098_v24, %v953_v31 }
 0x32f   : > { %v993_v18 = vadd.f32 %v959_v39, %v1348_v8 }
 0x330   : > { %v992_v45 = vadd.f32 %v954_v17, %v1344_v3 }
 0x331   : > { %1001 = vst.msk [vmem:[%s329_s9 + $0x8] sm:$0xff] %vm357_vm0, %v993_v18 }
 0x332   : > { %1000 = vst.msk [vmem:[%s329_s9] sm:$0xff] %vm357_vm0, %v992_v45 }
 0x334   : > { %v1178_v47 = vpop.f32.mrb[0].mxu1 }
 0x335   : > { %v969_v48 = vadd.f32 %v1178_v47, %v1098_v24  ;;  %v963_v53 = vpop.f32.mrb[1].mxu1 }
 0x336   : > { %v964_v57 = vadd.f32 %v1098_v24, %v963_v53 }
 0x337   : > { %v995_v59 = vadd.f32 %v969_v48, %v1352_v13 }
 0x338   : > { %v994_v23 = vadd.f32 %v964_v57, %v1346_v7  ;;  %v1181_v42 = vpop.f32.mrb[2].mxu1 }
 0x339   : > { %1003 = vst.msk [vmem:[%s329_s9 + $0x18] sm:$0xff] %vm357_vm0, %v995_v59  ;;  %v979_v40 = vadd.f32 %v1181_v42, %v1098_v24  ;;  %v973_v5 = vpop.f32.mrb[3].mxu1 }
 0x33a   : > { %1002 = vst.msk [vmem:[%s329_s9 + $0x10] sm:$0xff] %vm357_vm0, %v994_v23  ;;  %v974_v3 = vadd.f32 %v1098_v24, %v973_v5 }
 0x33b   : > { %v997_v8 = vadd.f32 %v979_v40, %v1362_v21 }
 0x33c   : > { %v996_v30 = vadd.f32 %v974_v3, %v1358_v19  ;;  %v1184_v34 = vpop.f32.mrb[4].mxu1 }
 0x33d   : > { %1005 = vst.msk [vmem:[%s329_s9 + $0x28] sm:$0xff] %vm357_vm0, %v997_v8  ;;  %v989_v61 = vadd.f32 %v1184_v34, %v1098_v24  ;;  %v983_v36 = vpop.f32.mrb[5].mxu1 }
 0x33e   : > { %1004 = vst.msk [vmem:[%s329_s9 + $0x20] sm:$0xff] %vm357_vm0, %v996_v30  ;;  %v984_v7 = vadd.f32 %v1098_v24, %v983_v36 }
 0x33f   : > { %v999_v13 = vadd.f32 %v989_v61, %v1370_v29 }
 0x340   : > { %v998_v41 = vadd.f32 %v984_v7, %v1366_v27 }
 0x341   : > { %1007 = vst.msk [vmem:[%s329_s9 + $0x38] sm:$0xff] %vm357_vm0, %v999_v13 }
 0x342   : > { %1006 = vst.msk [vmem:[%s329_s9 + $0x30] sm:$0xff] %vm357_vm0, %v998_v41 }
 0x343 PF: > { %s18_s27 = sadd.s32 1, %s1279_s27  }
 0x344   : > { %p15_p4 = scmp.ge.s32.totalorder %s18_s27, 4  }
 0x346   :  { %17 = sbr.rel (!%p15_p4) target bundleno = 1 (0x1), region = 85 }

// kernel: _lambda_.12
= control target key start
LH: loop header
LB: loop body
LE: loop exit
PB: predicated region body
PF: predicated region fallthrough
CT: control target
= control target key end

     0   :  { %s3285_s13 = smov 0   ;;  %s3731_s0 = inlined_call_operand.vmem [shape: f32[2,4,16,32], index: 0, kind: input, shape index: {}]   ;;  %s3732_s1 = inlined_call_operand.vmem [shape: f32[32,32], index: 1, kind: input, shape index: {}]   ;;  %s3733_s2 = inlined_call_operand.vmem [shape: f32[1,32], index: 2, kind: input, shape index: {}, may-alias: {2,4,6,8}]   ;;  %s3734_s3 = inlined_call_operand.vmem [shape: f32[32,32], index: 3, kind: input, shape index: {}]   ;;  %s3735_s4 = inlined_call_operand.vmem [shape: f32[1,32], index: 4, kind: input, shape index: {}, may-alias: {2,4,6,8}]   ;;  %s3736_s5 = inlined_call_operand.vmem [shape: f32[32,32], index: 5, kind: input, shape index: {}]   ;;  %s3737_s6 = inlined_call_operand.vmem [shape: f32[1,32], index: 6, kind: input, shape index: {}, may-alias: {2,4,6,8}]   ;;  %s3738_s7 = inlined_call_operand.vmem [shape: f32[32,32], index: 7, kind: input, shape index: {}]   ;;  %s3739_s8 = inlined_call_operand.vmem [shape: f32[1,32], index: 8, kind: input, shape index: {}, may-alias: {2,4,6,8}]   ;;  %s3740_s9 = inlined_call_operand.vmem [shape: f32[2,16,16], index: 9, kind: input, shape index: {}]   ;;  %s3741_s10 = inlined_call_operand.vmem [shape: f32[2,4,16,32], index: 10, kind: output, shape index: {}]  }
   0x1 LB: > { %s2589_s14 = sadd.s32 4294967295, %s3226_s13   ;;  %p2593_p0 = scmp.ge.s32.totalorder %s3226_s13, 1  ;;  %s3226_s13 = sphi %s3285_s13, %s20_s13  }
   0x2   : > { %p312_p1 = scmp.lt.s32.totalorder %s3226_s13, 3 }
   0x4   : > { %p313_p2 = pnand %p2593_p0, %p312_p1 }
   0x5   : > { %v368_v0 = vld [vmem:[%s3732_s1] sm:$0xff] (!%p313_p2)  ;;  %v369_v1 = vld [vmem:[%s3732_s1 + $0x8] sm:$0xff] (!%p313_p2)  ;;  %v370_v2 = vld [vmem:[%s3732_s1 + $0x10] sm:$0xff] (!%p313_p2)  ;;  %p350_p3 = scmp.lt.s32.totalorder (!%p313_p2), %s2589_s14, 1  ;;  %vm379_vm0 = vcmask (!%p313_p2), 261120   ;;  %vm745_vm1 = vcmask (!%p313_p2), 130048  }
   0x6   : > { %316 = sbr.rel (%p313_p2) target bundleno = 1911 (0x777), region = 60  ;;  %v2990_v3 = vpack.c.bf16 (!%p313_p2), %v369_v1, %v368_v0  ;;  %v371_v4 = vld [vmem:[%s3732_s1 + $0x18] sm:$0xff] (!%p313_p2)  ;;  %v509_v6 = vld [vmem:[%s3734_s3] sm:$0xff] (!%p313_p2)  ;;  %v510_v7 = vld [vmem:[%s3734_s3 + $0x8] sm:$0xff] (!%p313_p2)  ;;  %s3228_s18 = smov (!%p313_p2), 112  }
   0x7   : > { %v2994_v5 = vpack.c.bf16 (!%p313_p2), %v371_v4, %v370_v2  ;;  %v625_v8 = vld [vmem:[%s3736_s5] sm:$0xff] (!%p313_p2)  ;;  %v626_v9 = vld [vmem:[%s3736_s5 + $0x8] sm:$0xff] (!%p313_p2)  ;;  %v2998_v10 = vpack.c.bf16 (!%p313_p2), %v510_v7, %v509_v6  ;;  %v511_v12 = vld [vmem:[%s3734_s3 + $0x10] sm:$0xff] (!%p313_p2)  ;;  %s3229_s12 = smov (!%p313_p2), 16  }
   0x8   : > { %3102 = vmatprep.subr.bf16.mxu1 (!%p313_p2), %v2990_v3  ;;  %2991 = vmatprep.subr.bf16.mxu0 (!%p313_p2), %v2990_v3  ;;  %v512_v13 = vld [vmem:[%s3734_s3 + $0x18] sm:$0xff] (!%p313_p2)  ;;  %v3006_v14 = vpack.c.bf16 (!%p313_p2), %v626_v9, %v625_v8  ;;  %v627_v20 = vld [vmem:[%s3736_s5 + $0x10] sm:$0xff] (!%p313_p2)  ;;  %v2598_v26 = vld [vmem:[%s3733_s2] ss:$0 sm:$0xff] (!%p313_p2) }
   0x9   : > { %3104 = vmatpush3.bf16.msra.mxu1 (!%p313_p2), %v2990_v3  ;;  %2993 = vmatpush3.bf16.msra.mxu0 (!%p313_p2), %v2990_v3  ;;  %v3002_v18 = vpack.c.bf16 (!%p313_p2), %v512_v13, %v511_v12  ;;  %v628_v21 = vld [vmem:[%s3736_s5 + $0x18] sm:$0xff] (!%p313_p2)  ;;  %v2607_v37 = vld [vmem:[%s3735_s4] ss:$0 sm:$0xff] (!%p313_p2)  ;;  %vm3381_vm2 = vmpackc.low (!%p313_p2), %vm745_vm1, %vm745_vm1 }
   0xa   : > { %3103 = vmatprep.subr.bf16.mxu1 (!%p313_p2), %v2994_v5  ;;  %2995 = vmatprep.subr.bf16.mxu0 (!%p313_p2), %v2994_v5  ;;  %v3010_v24 = vpack.c.bf16 (!%p313_p2), %v628_v21, %v627_v20  ;;  %v2616_v6 = vld [vmem:[%s3737_s6] ss:$0 sm:$0xff] (!%p313_p2) }
   0xd   : > { %s3745_s14 = smov (!%p350_p3, %s2589_s14), 1  ;;  %3105 = vmatpush3.bf16.msra.mxu1 %v2994_v5  ;;  %2997 = vmatpush3.bf16.msra.mxu0 %v2994_v5 }
   0xe   : > { %s2684_s11 = sshll.u32 %s3745_s14, 6  ;;  %2999 = vmatprep.subr.bf16.mxu1 %v2998_v10  ;;  %3007 = vmatprep.subr.bf16.mxu0 %v3006_v14 }
   0xf   : > { %s354_s16 = scalar_lea.vmem %s3731_s0, %s2684_s11  ;;  %s359_s19 = scalar_lea.vmem %s3741_s10, %s2684_s11 }
  0x10   : > { %v364_v11 = vld [vmem:[%s354_s16 + $0x20] sm:$0xff]  ;;  %v365_v15 = vld [vmem:[%s354_s16 + $0x28] sm:$0xff]  ;;  %v366_v17 = vld [vmem:[%s354_s16 + $0x30] sm:$0xff] }
  0x11   : > { %2812 = vmatprep.mubr.msk.f32.mxu1 %vm379_vm0, %v364_v11  ;;  %v360_v16 = vld [vmem:[%s354_s16] sm:$0xff]  ;;  %v361_v19 = vld [vmem:[%s354_s16 + $0x8] sm:$0xff]  ;;  %v367_v22 = vld [vmem:[%s354_s16 + $0x38] sm:$0xff] }
  0x12   : > { %2806 = vmatprep.mubr.msk.f32.mxu0 %vm379_vm0, %v360_v16  ;;  %2813 = vmatmul.mubr.msk.f32.vlgmr.msra.gmra.mrb[0].mxu1 %vm379_vm0, %v365_v15  ;;  %v362_v23 = vld [vmem:[%s354_s16 + $0x10] sm:$0xff]  ;;  %v363_v25 = vld [vmem:[%s354_s16 + $0x18] sm:$0xff] }
  0x13   : > { %2807 = vmatmul.mubr.msk.f32.vlgmr.msra.gmra.mrb[0].mxu0 %vm379_vm0, %v361_v19  ;;  %3001 = vmatpush3.bf16.msra.mxu1 %v2998_v10 }
  0x14   : > { %2815 = vmatprep.mubr.msk.f32.mxu1 %vm379_vm0, %v366_v17  ;;  %3003 = vmatprep.subr.bf16.mxu1 %v3002_v18 }
  0x15   : > { %2809 = vmatprep.mubr.msk.f32.mxu0 %vm379_vm0, %v362_v23  ;;  %3009 = vmatpush3.bf16.msra.mxu0 %v3006_v14 }
  0x16   : > { %2816 = vmatmul.mubr.msk.f32.gmra.mrb[2].mxu1 %vm379_vm0, %v367_v22  ;;  %3011 = vmatprep.subr.bf16.mxu0 %v3010_v24 }
  0x17   : > { %2810 = vmatmul.mubr.msk.f32.gmra.mrb[2].mxu0 %vm379_vm0, %v363_v25  ;;  %3005 = vmatpush3.bf16.msra.mxu1 %v3002_v18 }
  0x18   : > { %2826 = vmatprep.mubr.msk.f32.mxu1 %vm379_vm0, %v360_v16  ;;  %2846 = vmatprep.mubr.msk.f32.mxu0 %vm379_vm0, %v360_v16 }
  0x19   : > { %3013 = vmatpush3.bf16.msra.mxu0 %v3010_v24 }
  0x1a   : > { %2827 = vmatmul.mubr.msk.f32.vlgmr.msra.gmra.mrb[4].mxu1 %vm379_vm0, %v361_v19 }
  0x1b   : > { %2829 = vmatprep.mubr.msk.f32.mxu1 %vm379_vm0, %v362_v23 }
  0x1c   : > { %2847 = vmatmul.mubr.msk.f32.vlgmr.msra.gmra.mrb[4].mxu0 %vm379_vm0, %v361_v19 }
  0x1d   : > { %2849 = vmatprep.mubr.msk.f32.mxu0 %vm379_vm0, %v362_v23 }
  0x1e   : > { %2830 = vmatmul.mubr.msk.f32.gmra.mrb[6].mxu1 %vm379_vm0, %v363_v25 }
  0x1f   : > { %2832 = vmatprep.mubr.msk.f32.mxu1 %vm379_vm0, %v364_v11 }
  0x20   : > { %2850 = vmatmul.mubr.msk.f32.gmra.mrb[6].mxu0 %vm379_vm0, %v363_v25 }
  0x21   : > { %2852 = vmatprep.mubr.msk.f32.mxu0 %vm379_vm0, %v364_v11 }
  0x22   : > { %2833 = vmatmul.mubr.msk.f32.gmra.mrb[8].mxu1 %vm379_vm0, %v365_v15 }
  0x23   : > { %2835 = vmatprep.mubr.msk.f32.mxu1 %vm379_vm0, %v366_v17 }
  0x24   : > { %2853 = vmatmul.mubr.msk.f32.gmra.mrb[8].mxu0 %vm379_vm0, %v365_v15 }
  0x25   : > { %2855 = vmatprep.mubr.msk.f32.mxu0 %vm379_vm0, %v366_v17 }
  0x26   : > { %2836 = vmatmul.mubr.msk.f32.gmra.mrb[10].mxu1 %vm379_vm0, %v367_v22 }
  0x28   : > { %2856 = vmatmul.mubr.msk.f32.gmra.mrb[10].mxu0 %vm379_vm0, %v367_v22 }
  0xe5   : > { %v2814_v27 = vpop.f32.mrb[0].mxu1 }
  0xe6   : > { %v2808_v28 = vpop.f32.mrb[0].mxu0  ;;  %v490_v29 = vpop.f32.mrb[1].mxu1  ;;  %v3435_v2 = vadd.f32 %v2814_v27, %v2598_v26 }
  0xe7   : > { %v470_v30 = vpop.f32.mrb[1].mxu0  ;;  %v3364_v31 = vadd.f32 %v2598_v26, %v490_v29  ;;  %v3403_v55 = vadd.f32 %v2808_v28, %v2598_v26 }
  0xe8   : > { %v3366_v32 = vadd.f32 %v2598_v26, %v470_v30 }
  0xe9   : > { %v2817_v33 = vpop.f32.mrb[2].mxu1  ;;  %2876 = vmatprep.mubr.msk.f32.mxu0 %vm745_vm1, %v3364_v31 }
  0xea   : > { %2862 = vmatprep.mubr.msk.f32.mxu1 %vm745_vm1, %v3366_v32  ;;  %v2811_v34 = vpop.f32.mrb[2].mxu0  ;;  %v500_v35 = vpop.f32.mrb[3].mxu1  ;;  %v3449_v5 = vadd.f32 %v2817_v33, %v2598_v26 }
  0xeb   : > { %v480_v36 = vpop.f32.mrb[3].mxu0  ;;  %v3437_v3 = vadd.f32 %v2811_v34, %v2598_v26  ;;  %v3439_v4 = vadd.f32 %v2598_v26, %v500_v35  ;;  %v741_v34 = vld [vmem:[%s3740_s9] sm:$0xff] }
  0xec   : > { %v3413_v60 = vadd.f32 %v2598_v26, %v480_v36 }
  0xed   : > { %v2828_v38 = vpop.f32.mrb[4].mxu1 }
  0xee   : > { %v3375_v39 = vadd.f32 %v2828_v38, %v2607_v37  ;;  %v586_v40 = vpop.f32.mrb[5].mxu1 }
  0xef   : > { %v3377_v41 = vadd.f32 %v2607_v37, %v586_v40  ;;  %v2848_v42 = vpop.f32.mrb[4].mxu0 }
  0xf0   : > { %v3456_v7 = vadd.f32 %v2848_v42, %v2616_v6  ;;  %v702_v8 = vpop.f32.mrb[5].mxu0 }
  0xf1   : > { %v3116_v44 = vpack.i.bf16 %v3375_v39, %v3377_v41  ;;  %v3014_v45 = vpack.c.bf16 %v3375_v39, %v3377_v41  ;;  %v2831_v46 = vpop.f32.mrb[6].mxu1  ;;  %v3458_v9 = vadd.f32 %v2616_v6, %v702_v8 }
  0xf2   : > { %v3389_v47 = vadd.f32 %v2831_v46, %v2607_v37  ;;  %v596_v48 = vpop.f32.mrb[7].mxu1 }
  0xf3   : > { %3016 = vmatprep.subr.msk.bf16.mxu1 %vm3381_vm2, %v3014_v45  ;;  %v3393_v49 = vadd.f32 %v2607_v37, %v596_v48  ;;  %v3136_v10 = vpack.i.bf16 %v3456_v7, %v3458_v9  ;;  %v3038_v11 = vpack.c.bf16 %v3456_v7, %v3458_v9  ;;  %v2851_v12 = vpop.f32.mrb[6].mxu0 }
  0xf4   : > { %3019 = vmatpush3.bf16.xpose.msk.msra.mxu1 %vm3381_vm2, %v3014_v45  ;;  %v3464_v13 = vadd.f32 %v2851_v12, %v2616_v6  ;;  %v712_v14 = vpop.f32.mrb[7].mxu0 }
  0xf5   : > { %v3121_v50 = vpack.i.bf16 %v3389_v47, %v3393_v49  ;;  %v3020_v51 = vpack.c.bf16 %v3389_v47, %v3393_v49  ;;  %v2834_v52 = vpop.f32.mrb[8].mxu1  ;;  %v3466_v15 = vadd.f32 %v2616_v6, %v712_v14 }
  0xf6   : > { %v3401_v53 = vadd.f32 %v2834_v52, %v2607_v37  ;;  %v606_v54 = vpop.f32.mrb[9].mxu1 }
  0xf7   : > { %v3405_v56 = vadd.f32 %v2607_v37, %v606_v54  ;;  %3022 = vmatprep.subr.msk.bf16.mxu1 %vm3381_vm2, %v3020_v51  ;;  %v2854_v16 = vpop.f32.mrb[8].mxu0  ;;  %v3141_v19 = vpack.i.bf16 %v3464_v13, %v3466_v15  ;;  %v3042_v20 = vpack.c.bf16 %v3464_v13, %v3466_v15 }
  0xf8   : > { %v3468_v17 = vadd.f32 %v2854_v16, %v2616_v6  ;;  %v722_v18 = vpop.f32.mrb[9].mxu0 }
  0xf9   : > { %v3126_v57 = vpack.i.bf16 %v3401_v53, %v3405_v56  ;;  %v3026_v58 = vpack.c.bf16 %v3401_v53, %v3405_v56  ;;  %v2837_v59 = vpop.f32.mrb[10].mxu1  ;;  %v3474_v21 = vadd.f32 %v2616_v6, %v722_v18 }
  0xfa   : > { %v3415_v61 = vadd.f32 %v2837_v59, %v2607_v37  ;;  %v616_v62 = vpop.f32.mrb[11].mxu1 }
  0xfb   : > { %2863 = vmatmul.mubr.msk.f32.vlgmr.msra.gmra.mrb[12].mxu1 %vm745_vm1, %v3403_v55  ;;  %3028 = vmatprep.subr.msk.bf16.mxu0 %vm3381_vm2, %v3026_v58  ;;  %v3421_v63 = vadd.f32 %v2607_v37, %v616_v62  ;;  %v2857_v22 = vpop.f32.mrb[10].mxu0  ;;  %v3146_v25 = vpack.i.bf16 %v3468_v17, %v3474_v21  ;;  %v3482_v26 = vpack.c.bf16 %v3468_v17, %v3474_v21  ;;  %v742_v37 = vld [vmem:[%s3740_s9 + $0x8] sm:$0xff] }
  0xfc   : > { %3025 = vmatpush3.bf16.xpose.msk.msra.mxu1 %vm3381_vm2, %v3020_v51  ;;  %3031 = vmatpush3.bf16.xpose.msk.msra.mxu0 %vm3381_vm2, %v3026_v58  ;;  %v3476_v23 = vadd.f32 %v2857_v22, %v2616_v6  ;;  %v732_v24 = vpop.f32.mrb[11].mxu0 }
  0xfd   : > { %v3131_v0 = vpack.i.bf16 %v3415_v61, %v3421_v63  ;;  %v3032_v1 = vpack.c.bf16 %v3415_v61, %v3421_v63  ;;  %2869 = vmatprep.mubr.msk.f32.mxu1 %vm745_vm1, %v3413_v60  ;;  %3039 = vmatprep.subr.bf16.mxu0 %v3038_v11  ;;  %v3484_v27 = vadd.f32 %v2616_v6, %v732_v24 }
  0xff   : > { %3034 = vmatprep.subr.msk.bf16.mxu1 %vm3381_vm2, %v3032_v1  ;;  %v3151_v28 = vpack.i.bf16 %v3476_v23, %v3484_v27  ;;  %v3490_v29 = vpack.c.bf16 %v3476_v23, %v3484_v27 }
 0x103   : > { %2870 = vmatmul.mubr.msk.f32.vlgmr.msra.gmra.mrb[14].mxu1 %vm745_vm1, %v3437_v3  ;;  %2877 = vmatmul.mubr.msk.f32.vlgmr.msra.gmra.mrb[12].mxu0 %vm745_vm1, %v3435_v2 }
 0x104   : > { %3037 = vmatpush3.bf16.xpose.msk.msra.mxu1 %vm3381_vm2, %v3032_v1  ;;  %2883 = vmatprep.mubr.msk.f32.mxu1 %vm745_vm1, %v3439_v4 }
 0x105   : > { %3041 = vmatpush3.bf16.msra.mxu0 %v3038_v11  ;;  %3043 = vmatprep.subr.bf16.mxu1 %v3042_v20 }
 0x106   : > { %3047 = vmatprep.subr.bf16.mxu0 %v3482_v26 }
 0x10b   : > { %2884 = vmatmul.mubr.msk.f32.vlgmr.msra.gmra.mrb[16].mxu1 %vm745_vm1, %v3449_v5 }
 0x10c   : > { %3045 = vmatpush3.bf16.msra.mxu1 %v3042_v20 }
 0x10d   : > { %3051 = vmatprep.subr.bf16.mxu1 %v3490_v29 }
 0x1ce   : > { %v2864_v30 = vpop.f32.mrb[12].mxu1 }
 0x1cf   : > { %v824_v33 = vpop.f32.mrb[13].mxu1  ;;  %v1095_v35 = vmul.f32 0.25, %v2864_v30 }
 0x1d0   : > { %v1094_v36 = vmul.f32 0.25, %v824_v33 }
 0x1d1   : > { %v1103_v42 = vadd.f32 %v1095_v35, %v742_v37 }
 0x1d2   : > { %v1102_v38 = vadd.f32 %v1094_v36, %v741_v34 }
 0x1d3   : > { %v1113_v59 = vsel %vm745_vm1, %v1103_v42, -inf }
 0x1d4   : > { %v1110_v40 = vsel %vm745_vm1, %v1102_v38, -inf }
 0x1d5   : > { %1111 = vmax.xlane.f32.xlu0 %v1110_v40 }
 0x1d6   : > { %v2871_v45 = vpop.f32.mrb[14].mxu1  ;;  %v2878_v46 = vpop.f32.mrb[12].mxu0 }
 0x1d7   : > { %v911_v48 = vpop.f32.mrb[15].mxu1  ;;  %v998_v51 = vpop.f32.mrb[13].mxu0  ;;  %v1097_v52 = vmul.f32 0.25, %v2871_v45  ;;  %v1099_v6 = vmul.f32 0.25, %v2878_v46 }
 0x1d8   : > { %v1096_v54 = vmul.f32 0.25, %v911_v48  ;;  %v1098_v58 = vmul.f32 0.25, %v998_v51 }
 0x1d9   : > { %1114 = vmax.xlane.f32.xlu0 %v1113_v59  ;;  %v1105_v12 = vadd.f32 %v1097_v52, %v742_v37  ;;  %v1107_v24 = vadd.f32 %v1099_v6, %v742_v37 }
 0x1da   : > { %v1106_v62 = vadd.f32 %v1098_v58, %v741_v34  ;;  %v1104_v1 = vadd.f32 %v1096_v54, %v741_v34 }
 0x1db   : > { %v1119_v22 = vsel %vm745_vm1, %v1105_v12, -inf  ;;  %v1125_v33 = vsel %vm745_vm1, %v1107_v24, -inf }
 0x1dc   : > { %v1122_v8 = vsel %vm745_vm1, %v1106_v62, -inf  ;;  %v1116_v11 = vsel %vm745_vm1, %v1104_v1, -inf }
 0x1dd   : > { %1123 = vmax.xlane.f32.xlu0 %v1122_v8  ;;  %1117 = vmax.xlane.f32.xlu1 %v1116_v11 }
 0x1de   : > { %v2885_v14 = vpop.f32.mrb[16].mxu1 }
 0x1df   : > { %v1085_v16 = vpop.f32.mrb[17].mxu1  ;;  %v1101_v18 = vmul.f32 0.25, %v2885_v14 }
 0x1e0   : > { %v1100_v20 = vmul.f32 0.25, %v1085_v16 }
 0x1e1   : > { %1120 = vmax.xlane.f32.xlu1 %v1119_v22  ;;  %v1109_v36 = vadd.f32 %v1101_v18, %v742_v37 }
 0x1e2   : > { %v1108_v30 = vadd.f32 %v1100_v20, %v741_v34 }
 0x1e3   : > { %v1131_v40 = vsel %vm745_vm1, %v1109_v36, -inf }
 0x1e4   : > { %v1128_v35 = vsel %vm745_vm1, %v1108_v30, -inf }
 0x1e5   : > { %1126 = vmax.xlane.f32.xlu1 %v1125_v33  ;;  %1129 = vmax.xlane.f32.xlu0 %v1128_v35 }
 0x1e9   : > { %1132 = vmax.xlane.f32.xlu1 %v1131_v40 }
 0x1fa   : > { %3122 = vrot.lane.b32.xlu1 %v3121_v50, %s3228_s18 }
 0x1fb   : > { %3117 = vrot.lane.b32.xlu0 %v3116_v44, %s3228_s18 }
 0x1fe   : > { %3127 = vrot.lane.b32.xlu1 %v3126_v57, %s3228_s18 }
 0x202   : > { %1522 = vrot.lane.b32.xlu1 %v3366_v32, %s3228_s18 }
 0x262   : > { %v1112_v34 = vpop.xlane.xlu0 %1111 }
 0x263   : > { %v1134_v37 = vsub.f32 %v1102_v38, %v1112_v34 }
 0x265   : > { %v1142_v45 = vmul.f32 1.442695, %v1134_v37 }
 0x266   : > { %v1115_v46 = vpop.xlane.xlu0 %1114 }
 0x267   : > { %3156 = vpow2.f32 %v1142_v45  ;;  %v1135_v47 = vsub.f32 %v1103_v42, %v1115_v46 }
 0x269   : > { %v1144_v49 = vmul.f32 1.442695, %v1135_v47 }
 0x26a   : > { %v1124_v50 = vpop.xlane.xlu0 %1123  ;;  %v1118_v48 = vpop.xlane.xlu1 %1117 }
 0x26b   : > { %3158 = vpow2.f32 %v1144_v49  ;;  %v1138_v39 = vsub.f32 %v1106_v62, %v1124_v50  ;;  %v1136_v41 = vsub.f32 %v1104_v1, %v1118_v48 }
 0x26d   : > { %v1146_v44 = vmul.f32 1.442695, %v1136_v41  ;;  %v1150_v51 = vmul.f32 1.442695, %v1138_v39 }
 0x26e   : > { %v1121_v52 = vpop.xlane.xlu1 %1120 }
 0x26f   : > { %v1137_v53 = vsub.f32 %v1105_v12, %v1121_v52  ;;  %3160 = vpow2.f32 %v1146_v44 }
 0x270   : > { %3162 = vpow2.f32 %v1150_v51 }
 0x271   : > { %v3157_v56 = vpop.eup %3156  ;;  %v1148_v57 = vmul.f32 1.442695, %v1137_v53 }
 0x272   : > { %v1127_v32 = vpop.xlane.xlu1 %1126  ;;  %v1130_v38 = vpop.xlane.xlu0 %1129  ;;  %v1158_v54 = vsel %vm745_vm1, %v3157_v56, 0.0 }
 0x273   : > { %3164 = vpow2.f32 %v1148_v57  ;;  %v1139_v42 = vsub.f32 %v1107_v24, %v1127_v32  ;;  %v1140_v58 = vsub.f32 %v1108_v30, %v1130_v38  ;;  %1159 = vadd.xlane.f32.xlu0 %v1158_v54 }
 0x275   : > { %v3159_v59 = vpop.eup %3158  ;;  %v1152_v6 = vmul.f32 1.442695, %v1139_v42  ;;  %v1154_v62 = vmul.f32 1.442695, %v1140_v58 }
 0x276   : > { %v1133_v1 = vpop.xlane.xlu1 %1132  ;;  %v1161_v8 = vsel %vm745_vm1, %v3159_v59, 0.0  ;;  %v3118_v63 = vpop.permute.xlu0 %3117 }
 0x277   : > { %3166 = vpow2.f32 %v1152_v6  ;;  %v1141_v11 = vsub.f32 %v1109_v36, %v1133_v1  ;;  %1162 = vadd.xlane.f32.xlu1 %v1161_v8  ;;  %v3120_v47 = vunpack.i.h.bf16 %v3118_v63 }
 0x278   : > { %3168 = vpow2.f32 %v1154_v62 }
 0x279   : > { %v1156_v12 = vmul.f32 1.442695, %v1141_v11  ;;  %v3161_v14 = vpop.eup %3160 }
 0x27a   : > { %v1164_v16 = vsel %vm745_vm1, %v3161_v14, 0.0  ;;  %v3525_v18 = vpop.eup %3162  ;;  %v3123_v61 = vpop.permute.xlu1 %3122 }
 0x27b   : > { %3170 = vpow2.f32 %v1156_v12  ;;  %1165 = vadd.xlane.f32.xlu0 %v1164_v16  ;;  %v1170_v24 = vsel %vm745_vm1, %v3525_v18, 0.0  ;;  %v3125_v52 = vunpack.i.h.bf16 %v3123_v61  ;;  %v3124_v53 = vunpack.i.l.bf16 %v3123_v61 }
 0x27d   : > { %v3165_v20 = vpop.eup %3164  ;;  %v3060_v42 = vpack.c.bf16 %v3125_v52, %v3124_v53 }
 0x27e   : > { %v1167_v22 = vsel %vm745_vm1, %v3165_v20, 0.0 }
 0x27f   : > { %1168 = vadd.xlane.f32.xlu1 %v1167_v22  ;;  %1171 = vadd.xlane.f32.xlu0 %v1170_v24 }
 0x281   : > { %v3530_v30 = vpop.eup %3166 }
 0x282   : > { %v3532_v33 = vpop.eup %3168  ;;  %v1173_v35 = vsel %vm745_vm1, %v3530_v30, 0.0 }
 0x283   : > { %1174 = vadd.xlane.f32.xlu1 %v1173_v35  ;;  %v1176_v36 = vsel %vm745_vm1, %v3532_v33, 0.0 }
 0x284   : > { %1177 = vadd.xlane.f32.xlu0 %v1176_v36 }
 0x285   : > { %v3538_v40 = vpop.eup %3170 }
 0x286   : > { %v1179_v34 = vsel %vm745_vm1, %v3538_v40, 0.0 }
 0x287   : > { %1180 = vadd.xlane.f32.xlu1 %v1179_v34 }
 0x298   : > { %3132 = vrot.lane.b32.xlu1 %v3131_v0, %s3228_s18 }
 0x29a   : > { %1524 = vrot.lane.b32.xlu0 %v3403_v55, %s3228_s18  ;;  %v3128_v55 = vpop.permute.xlu1 %3127 }
 0x29b   : > { %v3130_v58 = vunpack.i.h.bf16 %v3128_v55 }
 0x29c   : > { %1615 = vrot.lane.b32.xlu1 %v3437_v3, %s3228_s18 }
 0x29e   : > { %1613 = vrot.lane.b32.xlu0 %v3413_v60, %s3228_s18  ;;  %v1523_v0 = vpop.permute.xlu1 %1522 }
 0x2a0   : > { %1706 = vrot.lane.b32.xlu1 %v3435_v2, %s3228_s18 }
 0x2a2   : > { %1704 = vrot.lane.b32.xlu0 %v3364_v31, %s3228_s18 }
 0x2a4   : > { %1797 = vrot.lane.b32.xlu1 %v3449_v5, %s3228_s18  ;;  %v3119_v5 = vunpack.i.l.bf16 %v3118_v63 }
 0x2a6   : > { %1795 = vrot.lane.b32.xlu0 %v3439_v4, %s3228_s18  ;;  %v3054_v39 = vpack.c.bf16 %v3120_v47, %v3119_v5 }
 0x300   : > { %v1160_v3 = vpop.xlane.xlu0 %1159 }
 0x301   : > { %3172 = vrcp.f32 %v1160_v3 }
 0x304   : > { %v1163_v37 = vpop.xlane.xlu1 %1162 }
 0x305   : > { %3174 = vrcp.f32 %v1163_v37  ;;  %v744_v37 = vld [vmem:[%s3740_s9 + $0x18] sm:$0xff] }
 0x308   : > { %v1166_v60 = vpop.xlane.xlu0 %1165 }
 0x309   : > { %3176 = vrcp.f32 %v1166_v60 }
 0x30b   : > { %v3173_v2 = vpop.eup %3172 }
 0x30c   : > { %v1169_v45 = vpop.xlane.xlu1 %1168  ;;  %v1190_v46 = vmul.f32 %v3173_v2, %v3157_v56  ;;  %v1172_v31 = vpop.xlane.xlu0 %1171 }
 0x30d   : > { %3178 = vrcp.f32 %v1169_v45  ;;  %v743_v45 = vld [vmem:[%s3740_s9 + $0x10] sm:$0xff] }
 0x30e   : > { %3180 = vrcp.f32 %v1172_v31  ;;  %2890 = vmatprep.mubr.msk.f32.mxu0 %vm745_vm1, %v1190_v46 }
 0x30f   : > { %v3175_v4 = vpop.eup %3174 }
 0x310   : > { %v1191_v49 = vmul.f32 %v3175_v4, %v3159_v59  ;;  %v1175_v50 = vpop.xlane.xlu1 %1174 }
 0x311   : > { %3182 = vrcp.f32 %v1175_v50  ;;  %v1178_v48 = vpop.xlane.xlu0 %1177 }
 0x312   : > { %3184 = vrcp.f32 %v1178_v48  ;;  %2891 = vmatmul.mubr.msk.f32.vlgmr.msra.gmra.mrb[14].mxu0 %vm745_vm1, %v1191_v49 }
 0x313   : > { %3049 = vmatpush3.bf16.msra.mxu0 %v3482_v26  ;;  %v3177_v41 = vpop.eup %3176  ;;  %v3129_v26 = vunpack.i.l.bf16 %v3128_v55 }
 0x314   : > { %3056 = vmatprep.subr.msk.bf16.mxu0 %vm3381_vm2, %v3054_v39  ;;  %v1181_v44 = vpop.xlane.xlu1 %1180  ;;  %v1192_v51 = vmul.f32 %v3177_v41, %v3161_v14 }
 0x315   : > { %3186 = vrcp.f32 %v1181_v44  ;;  %v1525_v38 = vpop.permute.xlu0 %1524  ;;  %v3066_v11 = vpack.c.bf16 %v3130_v58, %v3129_v26 }
 0x316   : > { %2897 = vmatprep.mubr.msk.f32.mxu1 %vm745_vm1, %v1192_v51 }
 0x317   : > { %v3179_v56 = vpop.eup %3178 }
 0x318   : > { %v3181_v57 = vpop.eup %3180  ;;  %v1193_v32 = vmul.f32 %v3179_v56, %v3165_v20  ;;  %v3133_v1 = vpop.permute.xlu1 %3132 }
 0x319   : > { %v1194_v54 = vmul.f32 %v3181_v57, %v3525_v18  ;;  %v3135_v14 = vunpack.i.h.bf16 %v3133_v1  ;;  %v3134_v16 = vunpack.i.l.bf16 %v3133_v1  ;;  %v1614_v18 = vpop.permute.xlu0 %1613 }
 0x31a   : > { %2898 = vmatmul.mubr.msk.f32.vlgmr.msra.gmra.mrb[18].mxu1 %vm745_vm1, %v1193_v32 }
 0x31b   : > { %v3183_v59 = vpop.eup %3182  ;;  %2904 = vmatprep.mubr.msk.f32.mxu0 %vm745_vm1, %v1194_v54  ;;  %3053 = vmatpush3.bf16.msra.mxu1 %v3490_v29  ;;  %v3072_v20 = vpack.c.bf16 %v3135_v14, %v3134_v16 }
 0x31c   : > { %v3185_v6 = vpop.eup %3184  ;;  %v1195_v62 = vmul.f32 %v3183_v59, %v3530_v30  ;;  %3062 = vmatprep.subr.msk.bf16.mxu1 %vm3381_vm2, %v3060_v42  ;;  %v1616_v24 = vpop.permute.xlu1 %1615 }
 0x31d   : > { %v1196_v8 = vmul.f32 %v3185_v6, %v3532_v33  ;;  %v1705_v22 = vpop.permute.xlu0 %1704 }
 0x31e   : > { %2905 = vmatmul.mubr.msk.f32.vlgmr.msra.gmra.mrb[16].mxu0 %vm745_vm1, %v1195_v62 }
 0x31f   : > { %v3187_v12 = vpop.eup %3186  ;;  %2911 = vmatprep.mubr.msk.f32.mxu1 %vm745_vm1, %v1196_v8  ;;  %3059 = vmatpush3.bf16.xpose.msk.msra.mxu0 %vm3381_vm2, %v3054_v39 }
 0x320   : > { %v1197_v29 = vmul.f32 %v3187_v12, %v3538_v40  ;;  %2918 = vmatprep.mubr.msk.f32.mxu0 %vm745_vm1, %v1523_v0  ;;  %3068 = vmatprep.subr.msk.bf16.mxu0 %vm3381_vm2, %v3066_v11  ;;  %v1707_v33 = vpop.permute.xlu1 %1706 }
 0x321   : > { %v1796_v30 = vpop.permute.xlu0 %1795 }
 0x322   : > { %2912 = vmatmul.mubr.msk.f32.vlgmr.msra.gmra.mrb[20].mxu1 %vm745_vm1, %v1197_v29 }
 0x323   : > { %2925 = vmatprep.mubr.msk.f32.mxu1 %vm745_vm1, %v1614_v18 }
 0x324   : > { %3065 = vmatpush3.bf16.xpose.msk.msra.mxu1 %vm3381_vm2, %v3060_v42  ;;  %v1798_v35 = vpop.permute.xlu1 %1797 }
 0x325   : > { %3074 = vmatprep.subr.msk.bf16.mxu1 %vm3381_vm2, %v3072_v20 }
 0x326   : > { %2919 = vmatmul.mubr.msk.f32.vlgmr.msra.gmra.mrb[18].mxu0 %vm745_vm1, %v1525_v38 }
 0x327   : > { %3071 = vmatpush3.bf16.xpose.msk.msra.mxu0 %vm3381_vm2, %v3066_v11  ;;  %2932 = vmatprep.mubr.msk.f32.mxu0 %vm745_vm1, %v1705_v22 }
 0x32b   : > { %2926 = vmatmul.mubr.msk.f32.vlgmr.msra.gmra.mrb[22].mxu1 %vm745_vm1, %v1616_v24 }
 0x32c   : > { %3077 = vmatpush3.bf16.xpose.msk.msra.mxu1 %vm3381_vm2, %v3072_v20  ;;  %2939 = vmatprep.mubr.msk.f32.mxu1 %vm745_vm1, %v1796_v30 }
 0x32e   : > { %2933 = vmatmul.mubr.msk.f32.vlgmr.msra.gmra.mrb[20].mxu0 %vm745_vm1, %v1707_v33 }
 0x333   : > { %2940 = vmatmul.mubr.msk.f32.vlgmr.msra.gmra.mrb[24].mxu1 %vm745_vm1, %v1798_v35 }
 0x3e5   : > { %v3598_v36 = vpop.f32.mrb[14].mxu0 }
 0x3e6   : > { %v3600_v40 = vpop.f32.mrb[15].mxu0 }
 0x3ed   : > { %v3602_v34 = vpop.f32.mrb[18].mxu1 }
 0x3ee   : > { %v3604_v61 = vpop.f32.mrb[19].mxu1 }
 0x3f1   : > { %v3606_v55 = vpop.f32.mrb[16].mxu0 }
 0x3f2   : > { %v3608_v63 = vpop.f32.mrb[17].mxu0 }
 0x3f5   : > { %v3610_v43 = vpop.f32.mrb[20].mxu1 }
 0x3f6   : > { %v3612_v0 = vpop.f32.mrb[21].mxu1 }
 0x3f9   : > { %v2920_v3 = vpop.f32.mrb[18].mxu0 }
 0x3fa   : > { %v1887_v60 = vmul.f32 0.25, %v2920_v3  ;;  %v1604_v2 = vpop.f32.mrb[19].mxu0 }
 0x3fb   : > { %v1886_v46 = vmul.f32 0.25, %v1604_v2 }
 0x3fc   : > { %v1895_v31 = vadd.f32 %v1887_v60, %v744_v37 }
 0x3fd   : > { %v1894_v47 = vadd.f32 %v1886_v46, %v743_v45 }
 0x3fe   : > { %v2927_v5 = vpop.f32.mrb[22].mxu1  ;;  %v1905_v4 = vsel %vm745_vm1, %v1895_v31, -inf }
 0x3ff   : > { %v1889_v49 = vmul.f32 0.25, %v2927_v5  ;;  %v1695_v50 = vpop.f32.mrb[23].mxu1  ;;  %1906 = vmax.xlane.f32.xlu1 %v1905_v4  ;;  %v1902_v48 = vsel %vm745_vm1, %v1894_v47, -inf }
 0x400   : > { %v1888_v39 = vmul.f32 0.25, %v1695_v50  ;;  %1903 = vmax.xlane.f32.xlu0 %v1902_v48 }
 0x401   : > { %v2934_v41 = vpop.f32.mrb[20].mxu0  ;;  %v1897_v44 = vadd.f32 %v1889_v49, %v744_v37 }
 0x402   : > { %v1891_v51 = vmul.f32 0.25, %v2934_v41  ;;  %v1786_v52 = vpop.f32.mrb[21].mxu0  ;;  %v1896_v57 = vadd.f32 %v1888_v39, %v743_v45 }
 0x403   : > { %v1890_v53 = vmul.f32 0.25, %v1786_v52  ;;  %v1911_v56 = vsel %vm745_vm1, %v1897_v44, -inf }
 0x404   : > { %1912 = vmax.xlane.f32.xlu0 %v1911_v56  ;;  %v1899_v32 = vadd.f32 %v1891_v51, %v744_v37  ;;  %v1908_v26 = vsel %vm745_vm1, %v1896_v57, -inf }
 0x405   : > { %v1898_v59 = vadd.f32 %v1890_v53, %v743_v45 }
 0x406   : > { %v2941_v38 = vpop.f32.mrb[24].mxu1  ;;  %v1917_v54 = vsel %vm745_vm1, %v1899_v32, -inf }
 0x407   : > { %v1893_v42 = vmul.f32 0.25, %v2941_v38  ;;  %v1877_v58 = vpop.f32.mrb[25].mxu1  ;;  %1918 = vmax.xlane.f32.xlu1 %v1917_v54  ;;  %v1914_v8 = vsel %vm745_vm1, %v1898_v59, -inf }
 0x408   : > { %v1892_v6 = vmul.f32 0.25, %v1877_v58  ;;  %1909 = vmax.xlane.f32.xlu0 %v1908_v26 }
 0x409   : > { %v1901_v62 = vadd.f32 %v1893_v42, %v744_v37 }
 0x40a   : > { %v1900_v11 = vadd.f32 %v1892_v6, %v743_v45 }
 0x40b   : > { %v1923_v1 = vsel %vm745_vm1, %v1901_v62, -inf }
 0x40c   : > { %1924 = vmax.xlane.f32.xlu1 %v1923_v1  ;;  %1915 = vmax.xlane.f32.xlu0 %v1914_v8  ;;  %v1920_v12 = vsel %vm745_vm1, %v1900_v11, -inf }
 0x410   : > { %1921 = vmax.xlane.f32.xlu0 %v1920_v12 }
 0x48c   : > { %v1907_v14 = vpop.xlane.xlu1 %1906 }
 0x48d   : > { %v1927_v16 = vsub.f32 %v1895_v31, %v1907_v14  ;;  %v1904_v18 = vpop.xlane.xlu0 %1903 }
 0x48e   : > { %v1926_v29 = vsub.f32 %v1894_v47, %v1904_v18 }
 0x48f   : > { %v1936_v20 = vmul.f32 1.442695, %v1927_v16 }
 0x490   : > { %v1934_v22 = vmul.f32 1.442695, %v1926_v29 }
 0x491   : > { %3188 = vpow2.f32 %v1936_v20  ;;  %v1913_v24 = vpop.xlane.xlu0 %1912 }
 0x492   : > { %3190 = vpow2.f32 %v1934_v22  ;;  %v1929_v30 = vsub.f32 %v1897_v44, %v1913_v24 }
 0x494   : > { %v1940_v33 = vmul.f32 1.442695, %v1929_v30  ;;  %v1919_v35 = vpop.xlane.xlu1 %1918 }
 0x495   : > { %v1931_v3 = vsub.f32 %v1899_v32, %v1919_v35  ;;  %v1910_v37 = vpop.xlane.xlu0 %1909 }
 0x496   : > { %3192 = vpow2.f32 %v1940_v33  ;;  %v1928_v60 = vsub.f32 %v1896_v57, %v1910_v37 }
 0x497   : > { %v1944_v2 = vmul.f32 1.442695, %v1931_v3 }
 0x498   : > { %v1938_v45 = vmul.f32 1.442695, %v1928_v60 }
 0x499   : > { %3194 = vpow2.f32 %v1944_v2  ;;  %v1925_v46 = vpop.xlane.xlu1 %1924  ;;  %v1916_v5 = vpop.xlane.xlu0 %1915 }
 0x49a   : > { %3196 = vpow2.f32 %v1938_v45  ;;  %v1933_v31 = vsub.f32 %v1901_v62, %v1925_v46  ;;  %v1930_v47 = vsub.f32 %v1898_v59, %v1916_v5 }
 0x49b   : > { %v3628_v4 = vpop.eup %3188 }
 0x49c   : > { %v3191_v49 = vpop.eup %3190  ;;  %v1948_v50 = vmul.f32 1.442695, %v1933_v31  ;;  %v1942_v48 = vmul.f32 1.442695, %v1930_v47  ;;  %v1953_v39 = vsel %vm745_vm1, %v3628_v4, 0.0 }
 0x49d   : > { %1954 = vadd.xlane.f32.xlu1 %v1953_v39  ;;  %v1922_v41 = vpop.xlane.xlu0 %1921  ;;  %v1950_v44 = vsel %vm745_vm1, %v3191_v49, 0.0 }
 0x49e   : > { %3198 = vpow2.f32 %v1948_v50  ;;  %v1932_v51 = vsub.f32 %v1900_v11, %v1922_v41  ;;  %1951 = vadd.xlane.f32.xlu0 %v1950_v44  ;;  %v2387_v44 = vld [vmem:[%s3738_s7 + $0x8] sm:$0xff] }
 0x49f   : > { %3200 = vpow2.f32 %v1942_v48 }
 0x4a0   : > { %v3193_v52 = vpop.eup %3192  ;;  %v1946_v53 = vmul.f32 1.442695, %v1932_v51  ;;  %v2388_v51 = vld [vmem:[%s3738_s7 + $0x10] sm:$0xff] }
 0x4a1   : > { %v1959_v56 = vsel %vm745_vm1, %v3193_v52, 0.0 }
 0x4a2   : > { %3202 = vpow2.f32 %v1946_v53  ;;  %1960 = vadd.xlane.f32.xlu1 %v1959_v56  ;;  %v2389_v53 = vld [vmem:[%s3738_s7 + $0x18] sm:$0xff] }
 0x4a3   : > { %v3634_v57 = vpop.eup %3194  ;;  %v3098_v56 = vpack.c.bf16 %v2389_v53, %v2388_v51 }
 0x4a4   : > { %v3197_v32 = vpop.eup %3196  ;;  %v1965_v38 = vsel %vm745_vm1, %v3634_v57, 0.0 }
 0x4a5   : > { %v1956_v54 = vsel %vm745_vm1, %v3197_v32, 0.0 }
 0x4a6   : > { %1966 = vadd.xlane.f32.xlu1 %v1965_v38  ;;  %1957 = vadd.xlane.f32.xlu0 %v1956_v54 }
 0x4a8   : > { %v3639_v42 = vpop.eup %3198 }
 0x4a9   : > { %v3641_v58 = vpop.eup %3200  ;;  %v1971_v26 = vsel %vm745_vm1, %v3639_v42, 0.0 }
 0x4aa   : > { %1972 = vadd.xlane.f32.xlu1 %v1971_v26  ;;  %v1962_v59 = vsel %vm745_vm1, %v3641_v58, 0.0 }
 0x4ab   : > { %1963 = vadd.xlane.f32.xlu0 %v1962_v59 }
 0x4ac   : > { %v3203_v6 = vpop.eup %3202 }
 0x4ad   : > { %v1968_v62 = vsel %vm745_vm1, %v3203_v6, 0.0 }
 0x4af   : > { %1969 = vadd.xlane.f32.xlu0 %v1968_v62 }
 0x4bb   : > { %3142 = vrot.lane.b32.xlu1 %v3141_v19, %s3228_s18 }
 0x4bf   : > { %3147 = vrot.lane.b32.xlu1 %v3146_v25, %s3228_s18 }
 0x4c3   : > { %3152 = vrot.lane.b32.xlu1 %v3151_v28, %s3228_s18 }
 0x4c5   : > { %3137 = vrot.lane.b32.xlu0 %v3136_v10, %s3228_s18 }
 0x52a   : > { %v1955_v1 = vpop.xlane.xlu1 %1954 }
 0x52b   : > { %v1952_v8 = vpop.xlane.xlu0 %1951 }
 0x52c   : > { %3204 = vrcp.f32 %v1952_v8 }
 0x52f   : > { %v1961_v13 = vpop.xlane.xlu1 %1960 }
 0x530   : > { %3206 = vrcp.f32 %v1961_v13 }
 0x533   : > { %v1967_v15 = vpop.xlane.xlu1 %1966  ;;  %v1958_v19 = vpop.xlane.xlu0 %1957 }
 0x534   : > { %3208 = vrcp.f32 %v1958_v19 }
 0x535   : > { %3210 = vrcp.f32 %v1955_v1 }
 0x536   : > { %v3205_v17 = vpop.eup %3204 }
 0x537   : > { %v1973_v21 = vpop.xlane.xlu1 %1972  ;;  %v1982_v25 = vmul.f32 %v3205_v17, %v3191_v49 }
 0x538   : > { %v1964_v11 = vpop.xlane.xlu0 %1963 }
 0x539   : > { %2946 = vmatprep.mubr.msk.f32.mxu0 %vm745_vm1, %v1982_v25  ;;  %3212 = vrcp.f32 %v1964_v11 }
 0x53a   : > { %3214 = vrcp.f32 %v1973_v21  ;;  %v3207_v27 = vpop.eup %3206 }
 0x53b   : > { %v3143_v23 = vpop.permute.xlu1 %3142  ;;  %v1985_v30 = vmul.f32 %v3207_v27, %v3193_v52 }
 0x53c   : > { %v3145_v7 = vunpack.i.h.bf16 %v3143_v23  ;;  %v3144_v9 = vunpack.i.l.bf16 %v3143_v23  ;;  %v1970_v10 = vpop.xlane.xlu0 %1969 }
 0x53d   : > { %3216 = vrcp.f32 %v1970_v10 }
 0x53e   : > { %3218 = vrcp.f32 %v1967_v15  ;;  %v3082_v28 = vpack.c.bf16 %v3145_v7, %v3144_v9  ;;  %v3209_v12 = vpop.eup %3208 }
 0x53f   : > { %v3148_v14 = vpop.permute.xlu1 %3147  ;;  %v1984_v18 = vmul.f32 %v3209_v12, %v3197_v32  ;;  %v3211_v3 = vpop.eup %3210 }
 0x540   : > { %v3138_v16 = vpop.permute.xlu0 %3137  ;;  %3083 = vmatprep.subr.bf16.mxu1 %v3082_v28  ;;  %v3150_v29 = vunpack.i.h.bf16 %v3148_v14  ;;  %v3149_v20 = vunpack.i.l.bf16 %v3148_v14  ;;  %v1983_v47 = vmul.f32 %v3211_v3, %v3628_v4  ;;  %v2386_v4 = vld [vmem:[%s3738_s7] sm:$0xff] }
 0x541   : > { %v3140_v22 = vunpack.i.h.bf16 %v3138_v16  ;;  %v3139_v24 = vunpack.i.l.bf16 %v3138_v16  ;;  %3085 = vmatpush3.bf16.msra.mxu1 %v3082_v28  ;;  %2953 = vmatprep.mubr.msk.f32.mxu1 %vm745_vm1, %v1984_v18  ;;  %v3094_v52 = vpack.c.bf16 %v2387_v44, %v2386_v4 }
 0x542   : > { %v3086_v45 = vpack.c.bf16 %v3150_v29, %v3149_v20 }
 0x543   : > { %v3078_v33 = vpack.c.bf16 %v3140_v22, %v3139_v24  ;;  %v3153_v35 = vpop.permute.xlu1 %3152  ;;  %v3213_v2 = vpop.eup %3212 }
 0x544   : > { %v3155_v37 = vunpack.i.h.bf16 %v3153_v35  ;;  %v3154_v60 = vunpack.i.l.bf16 %v3153_v35  ;;  %2954 = vmatmul.mubr.msk.f32.vlgmr.msra.gmra.mrb[26].mxu1 %vm745_vm1, %v1985_v30  ;;  %v3215_v46 = vpop.eup %3214  ;;  %v1986_v50 = vmul.f32 %v3213_v2, %v3641_v58 }
 0x545   : > { %3079 = vmatprep.subr.bf16.mxu0 %v3078_v33  ;;  %v1989_v39 = vmul.f32 %v3215_v46, %v3639_v42 }
 0x546   : > { %v3090_v5 = vpack.c.bf16 %v3155_v37, %v3154_v60  ;;  %3081 = vmatpush3.bf16.msra.mxu0 %v3078_v33 }
 0x547   : > { %v3217_v31 = vpop.eup %3216  ;;  %3087 = vmatprep.subr.bf16.mxu0 %v3086_v45 }
 0x548   : > { %v3219_v49 = vpop.eup %3218  ;;  %3091 = vmatprep.subr.bf16.mxu1 %v3090_v5  ;;  %v1988_v48 = vmul.f32 %v3217_v31, %v3203_v6 }
 0x549   : > { %2947 = vmatmul.mubr.msk.f32.vlgmr.msra.gmra.mrb[22].mxu0 %vm745_vm1, %v1983_v47  ;;  %3093 = vmatpush3.bf16.msra.mxu1 %v3090_v5  ;;  %v1987_v41 = vmul.f32 %v3219_v49, %v3634_v57 }
 0x54a   : > { %3089 = vmatpush3.bf16.msra.mxu0 %v3086_v45  ;;  %2960 = vmatprep.mubr.msk.f32.mxu0 %vm745_vm1, %v1986_v50 }
 0x54b   : > { %2967 = vmatprep.mubr.msk.f32.mxu1 %vm745_vm1, %v1988_v48  ;;  %3095 = vmatprep.subr.bf16.mxu0 %v3094_v52 }
 0x54c   : > { %2968 = vmatmul.mubr.msk.f32.vlgmr.msra.gmra.mrb[28].mxu1 %vm745_vm1, %v1989_v39 }
 0x54d   : > { %2961 = vmatmul.mubr.msk.f32.vlgmr.msra.gmra.mrb[24].mxu0 %vm745_vm1, %v1987_v41 }
 0x54e   : > { %3097 = vmatpush3.bf16.msra.mxu0 %v3094_v52 }
 0x54f   : > { %3099 = vmatprep.subr.bf16.mxu0 %v3098_v56 }
 0x552   : > { %3101 = vmatpush3.bf16.msra.mxu0 %v3098_v56 }
 0x617   : > { %v2955_v57 = vpop.f32.mrb[26].mxu1 }
 0x618   : > { %v2159_v32 = vpop.f32.mrb[27].mxu1 }
 0x61c   : > { %v2948_v38 = vpop.f32.mrb[22].mxu0 }
 0x61d   : > { %2356 = vrot.lane.b32.xlu1 %v2948_v38, %s3229_s12  ;;  %v2070_v54 = vpop.f32.mrb[23].mxu0 }
 0x61e   : > { %2354 = vrot.lane.b32.xlu0 %v2070_v54, %s3229_s12 }
 0x61f   : > { %v2969_v42 = vpop.f32.mrb[28].mxu1 }
 0x620   : > { %v2962_v58 = vpop.f32.mrb[24].mxu0  ;;  %v2337_v26 = vpop.f32.mrb[29].mxu1 }
 0x621   : > { %2360 = vrot.lane.b32.xlu1 %v2955_v57, %s3229_s12  ;;  %v2248_v59 = vpop.f32.mrb[25].mxu0 }
 0x622   : > { %2358 = vrot.lane.b32.xlu0 %v2159_v32, %s3229_s12 }
 0x625   : > { %2364 = vrot.lane.b32.xlu1 %v2962_v58, %s3229_s12 }
 0x626   : > { %2362 = vrot.lane.b32.xlu0 %v2248_v59, %s3229_s12 }
 0x629   : > { %2368 = vrot.lane.b32.xlu1 %v2969_v42, %s3229_s12 }
 0x62a   : > { %2366 = vrot.lane.b32.xlu0 %v2337_v26, %s3229_s12 }
 0x68f   : > { %v2357_v6 = vpop.permute.xlu1 %2356 }
 0x690   : > { %v2355_v62 = vpop.permute.xlu0 %2354  ;;  %v2379_v8 = vsel %vm745_vm1, %v3598_v36, %v2357_v6 }
 0x691   : > { %v2378_v1 = vsel %vm745_vm1, %v3600_v40, %v2355_v62 }
 0x692   : > { %2978 = vmatprep.mubr.msk.f32.mxu0 %vm379_vm0, %v2378_v1 }
 0x693   : > { %v2361_v13 = vpop.permute.xlu1 %2360  ;;  %2979 = vmatmul.mubr.msk.f32.vlgmr.msra.gmra.mrb[26].mxu0 %vm379_vm0, %v2379_v8 }
 0x694   : > { %v2359_v15 = vpop.permute.xlu0 %2358  ;;  %v2381_v17 = vsel %vm745_vm1, %v3602_v34, %v2361_v13 }
 0x695   : > { %v2380_v19 = vsel %vm745_vm1, %v3604_v61, %v2359_v15 }
 0x696   : > { %2981 = vmatprep.mubr.msk.f32.mxu0 %vm379_vm0, %v2380_v19 }
 0x697   : > { %2982 = vmatmul.mubr.msk.f32.gmra.mrb[28].mxu0 %vm379_vm0, %v2381_v17  ;;  %v2365_v40 = vpop.permute.xlu1 %2364 }
 0x698   : > { %v2363_v21 = vpop.permute.xlu0 %2362  ;;  %v2383_v25 = vsel %vm745_vm1, %v3606_v55, %v2365_v40  ;;  %v2673_v55 = vld [vmem:[%s3739_s8] ss:$0 sm:$0xff] }
 0x699   : > { %v2382_v36 = vsel %vm745_vm1, %v3608_v63, %v2363_v21 }
 0x69a   : > { %2984 = vmatprep.mubr.msk.f32.mxu0 %vm379_vm0, %v2382_v36 }
 0x69b   : > { %v2369_v11 = vpop.permute.xlu1 %2368  ;;  %2985 = vmatmul.mubr.msk.f32.gmra.mrb[30].mxu0 %vm379_vm0, %v2383_v25 }
 0x69c   : > { %v2367_v61 = vpop.permute.xlu0 %2366  ;;  %v2385_v23 = vsel %vm745_vm1, %v3610_v43, %v2369_v11 }
 0x69d   : > { %v2384_v34 = vsel %vm745_vm1, %v3612_v0, %v2367_v61 }
 0x69e   : > { %2987 = vmatprep.mubr.msk.f32.mxu0 %vm379_vm0, %v2384_v34 }
 0x69f   : > { %2988 = vmatmul.mubr.msk.f32.gmra.mrb[32].mxu0 %vm379_vm0, %v2385_v23 }
 0x766   : > { %v2980_v63 = vpop.f32.mrb[26].mxu0 }
 0x767   : > { %v2493_v7 = vadd.f32 %v2980_v63, %v2673_v55  ;;  %v2487_v9 = vpop.f32.mrb[27].mxu0 }
 0x768   : > { %v2488_v0 = vadd.f32 %v2673_v55, %v2487_v9 }
 0x769   : > { %2527 = vst.msk [vmem:[%s359_s19 + $0x8] sm:$0xff] %vm379_vm0, %v2493_v7 }
 0x76a   : > { %2526 = vst.msk [vmem:[%s359_s19] sm:$0xff] %vm379_vm0, %v2488_v0  ;;  %v2983_v43 = vpop.f32.mrb[28].mxu0 }
 0x76b   : > { %v2503_v10 = vadd.f32 %v2983_v43, %v2673_v55  ;;  %v2497_v27 = vpop.f32.mrb[29].mxu0 }
 0x76c   : > { %v2498_v28 = vadd.f32 %v2673_v55, %v2497_v27 }
 0x76d   : > { %2529 = vst.msk [vmem:[%s359_s19 + $0x18] sm:$0xff] %vm379_vm0, %v2503_v10 }
 0x76e   : > { %2528 = vst.msk [vmem:[%s359_s19 + $0x10] sm:$0xff] %vm379_vm0, %v2498_v28  ;;  %v2986_v12 = vpop.f32.mrb[30].mxu0 }
 0x76f   : > { %v2513_v14 = vadd.f32 %v2986_v12, %v2673_v55  ;;  %v2507_v16 = vpop.f32.mrb[31].mxu0 }
 0x770   : > { %v2508_v18 = vadd.f32 %v2673_v55, %v2507_v16 }
 0x771   : > { %2531 = vst.msk [vmem:[%s359_s19 + $0x28] sm:$0xff] %vm379_vm0, %v2513_v14 }
 0x772   : > { %2530 = vst.msk [vmem:[%s359_s19 + $0x20] sm:$0xff] %vm379_vm0, %v2508_v18  ;;  %v2989_v29 = vpop.f32.mrb[32].mxu0 }
 0x773   : > { %v2523_v20 = vadd.f32 %v2989_v29, %v2673_v55  ;;  %v2517_v22 = vpop.f32.mrb[33].mxu0 }
 0x774   : > { %v2518_v24 = vadd.f32 %v2673_v55, %v2517_v22 }
 0x775   : > { %2533 = vst.msk [vmem:[%s359_s19 + $0x38] sm:$0xff] %vm379_vm0, %v2523_v20 }
 0x776   : > { %2532 = vst.msk [vmem:[%s359_s19 + $0x30] sm:$0xff] %vm379_vm0, %v2518_v24 }
 0x777 PF: > { %s20_s13 = sadd.s32 1, %s3226_s13  }
 0x778   : > { %p17_p4 = scmp.ge.s32.totalorder %s20_s13, 4  }
 0x77a   :  { %19 = sbr.rel (!%p17_p4) target bundleno = 1 (0x1), region = 90 }

// kernel: _lambda_.14
= control target key start
LH: loop header
LB: loop body
LE: loop exit
PB: predicated region body
PF: predicated region fallthrough
CT: control target
= control target key end

     0   :  { %s3341_s17 = smov 0   ;;  %s3843_s0 = inlined_call_operand.vmem [shape: f32[2,4,16,32], index: 0, kind: input, shape index: {}]   ;;  %s3844_s1 = inlined_call_operand.vmem [shape: f32[32,32], index: 1, kind: input, shape index: {}]   ;;  %s3845_s2 = inlined_call_operand.vmem [shape: f32[1,32], index: 2, kind: input, shape index: {}, may-alias: {2,4,6,8}]   ;;  %s3846_s3 = inlined_call_operand.vmem [shape: f32[32,32], index: 3, kind: input, shape index: {}]   ;;  %s3847_s4 = inlined_call_operand.vmem [shape: f32[1,32], index: 4, kind: input, shape index: {}, may-alias: {2,4,6,8}]   ;;  %s3848_s5 = inlined_call_operand.vmem [shape: f32[32,32], index: 5, kind: input, shape index: {}]   ;;  %s3849_s6 = inlined_call_operand.vmem [shape: f32[1,32], index: 6, kind: input, shape index: {}, may-alias: {2,4,6,8}]   ;;  %s3850_s7 = inlined_call_operand.vmem [shape: f32[32,32], index: 7, kind: input, shape index: {}]   ;;  %s3851_s8 = inlined_call_operand.vmem [shape: f32[1,32], index: 8, kind: input, shape index: {}, may-alias: {2,4,6,8}]   ;;  %s3852_s9 = inlined_call_operand.vmem [shape: f32[2,16,16], index: 9, kind: input, shape index: {}]   ;;  %s3853_s10 = inlined_call_operand.vmem [shape: f32[4,16,16], index: 10, kind: input, shape index: {}]   ;;  %s3854_s11 = inlined_call_operand.vmem [shape: f32[2,4,16,32], index: 11, kind: output, shape index: {}]  }
   0x1 LB: > { %s2640_s18 = sadd.s32 4294967295, %s3277_s17   ;;  %p2644_p0 = scmp.ge.s32.totalorder %s3277_s17, 1  ;;  %s3277_s17 = sphi %s3341_s17, %s21_s17  }
   0x2   : > { %p337_p1 = scmp.lt.s32.totalorder %s3277_s17, 3 }
   0x4   : > { %p338_p2 = pnand %p2644_p0, %p337_p1 }
   0x5   : > { %v395_v0 = vld [vmem:[%s3844_s1] sm:$0xff] (!%p338_p2)  ;;  %v396_v1 = vld [vmem:[%s3844_s1 + $0x8] sm:$0xff] (!%p338_p2)  ;;  %v397_v2 = vld [vmem:[%s3844_s1 + $0x10] sm:$0xff] (!%p338_p2)  ;;  %p377_p3 = scmp.lt.s32.totalorder (!%p338_p2), %s2640_s18, 1  ;;  %vm406_vm0 = vcmask (!%p338_p2), 261120   ;;  %vm780_vm1 = vcmask (!%p338_p2), 130048  }
   0x6   : > { %341 = sbr.rel (%p338_p2) target bundleno = 1915 (0x77b), region = 64  ;;  %v3041_v3 = vpack.c.bf16 (!%p338_p2), %v396_v1, %v395_v0  ;;  %v398_v4 = vld [vmem:[%s3844_s1 + $0x18] sm:$0xff] (!%p338_p2)  ;;  %v536_v6 = vld [vmem:[%s3846_s3] sm:$0xff] (!%p338_p2)  ;;  %v537_v7 = vld [vmem:[%s3846_s3 + $0x8] sm:$0xff] (!%p338_p2)  ;;  %s3279_s24 = smov (!%p338_p2), 112  }
   0x7   : > { %v3045_v5 = vpack.c.bf16 (!%p338_p2), %v398_v4, %v397_v2  ;;  %v652_v8 = vld [vmem:[%s3848_s5] sm:$0xff] (!%p338_p2)  ;;  %v653_v9 = vld [vmem:[%s3848_s5 + $0x8] sm:$0xff] (!%p338_p2)  ;;  %v3049_v10 = vpack.c.bf16 (!%p338_p2), %v537_v7, %v536_v6  ;;  %v538_v12 = vld [vmem:[%s3846_s3 + $0x10] sm:$0xff] (!%p338_p2) }
   0x8   : > { %3153 = vmatprep.subr.bf16.mxu1 (!%p338_p2), %v3041_v3  ;;  %3042 = vmatprep.subr.bf16.mxu0 (!%p338_p2), %v3041_v3  ;;  %v539_v13 = vld [vmem:[%s3846_s3 + $0x18] sm:$0xff] (!%p338_p2)  ;;  %v3057_v14 = vpack.c.bf16 (!%p338_p2), %v653_v9, %v652_v8  ;;  %v654_v20 = vld [vmem:[%s3848_s5 + $0x10] sm:$0xff] (!%p338_p2)  ;;  %v2649_v26 = vld [vmem:[%s3845_s2] ss:$0 sm:$0xff] (!%p338_p2) }
   0x9   : > { %3155 = vmatpush3.bf16.msra.mxu1 (!%p338_p2), %v3041_v3  ;;  %3044 = vmatpush3.bf16.msra.mxu0 (!%p338_p2), %v3041_v3  ;;  %v3053_v18 = vpack.c.bf16 (!%p338_p2), %v539_v13, %v538_v12  ;;  %v655_v21 = vld [vmem:[%s3848_s5 + $0x18] sm:$0xff] (!%p338_p2)  ;;  %v2658_v37 = vld [vmem:[%s3847_s4] ss:$0 sm:$0xff] (!%p338_p2)  ;;  %vm3437_vm2 = vmpackc.low (!%p338_p2), %vm780_vm1, %vm780_vm1 }
   0xa   : > { %3154 = vmatprep.subr.bf16.mxu1 (!%p338_p2), %v3045_v5  ;;  %3046 = vmatprep.subr.bf16.mxu0 (!%p338_p2), %v3045_v5  ;;  %v3061_v24 = vpack.c.bf16 (!%p338_p2), %v655_v21, %v654_v20  ;;  %v2667_v6 = vld [vmem:[%s3849_s6] ss:$0 sm:$0xff] (!%p338_p2) }
   0xd   : > { %s3858_s18 = smov (!%p377_p3, %s2640_s18), 1  ;;  %3156 = vmatpush3.bf16.msra.mxu1 %v3045_v5  ;;  %3048 = vmatpush3.bf16.msra.mxu0 %v3045_v5 }
   0xe   : > { %s2735_s16 = sshll.u32 %s3858_s18, 6  ;;  %3050 = vmatprep.subr.bf16.mxu1 %v3049_v10  ;;  %3058 = vmatprep.subr.bf16.mxu0 %v3057_v14 }
   0xf   : > { %s381_s21 = scalar_lea.vmem %s3843_s0, %s2735_s16  ;;  %s386_s26 = scalar_lea.vmem %s3854_s11, %s2735_s16 }
  0x10   : > { %v391_v11 = vld [vmem:[%s381_s21 + $0x20] sm:$0xff]  ;;  %v392_v15 = vld [vmem:[%s381_s21 + $0x28] sm:$0xff]  ;;  %v393_v17 = vld [vmem:[%s381_s21 + $0x30] sm:$0xff] }
  0x11   : > { %2863 = vmatprep.mubr.msk.f32.mxu1 %vm406_vm0, %v391_v11  ;;  %v387_v16 = vld [vmem:[%s381_s21] sm:$0xff]  ;;  %v388_v19 = vld [vmem:[%s381_s21 + $0x8] sm:$0xff]  ;;  %v394_v22 = vld [vmem:[%s381_s21 + $0x38] sm:$0xff] }
  0x12   : > { %2857 = vmatprep.mubr.msk.f32.mxu0 %vm406_vm0, %v387_v16  ;;  %2864 = vmatmul.mubr.msk.f32.vlgmr.msra.gmra.mrb[0].mxu1 %vm406_vm0, %v392_v15  ;;  %v389_v23 = vld [vmem:[%s381_s21 + $0x10] sm:$0xff]  ;;  %v390_v25 = vld [vmem:[%s381_s21 + $0x18] sm:$0xff]  ;;  %s3280_s21 = smov 16  }
  0x13   : > { %2858 = vmatmul.mubr.msk.f32.vlgmr.msra.gmra.mrb[0].mxu0 %vm406_vm0, %v388_v19  ;;  %3052 = vmatpush3.bf16.msra.mxu1 %v3049_v10 }
  0x14   : > { %2866 = vmatprep.mubr.msk.f32.mxu1 %vm406_vm0, %v393_v17  ;;  %3054 = vmatprep.subr.bf16.mxu1 %v3053_v18 }
  0x15   : > { %2860 = vmatprep.mubr.msk.f32.mxu0 %vm406_vm0, %v389_v23  ;;  %3060 = vmatpush3.bf16.msra.mxu0 %v3057_v14 }
  0x16   : > { %2867 = vmatmul.mubr.msk.f32.gmra.mrb[2].mxu1 %vm406_vm0, %v394_v22  ;;  %3062 = vmatprep.subr.bf16.mxu0 %v3061_v24 }
  0x17   : > { %2861 = vmatmul.mubr.msk.f32.gmra.mrb[2].mxu0 %vm406_vm0, %v390_v25  ;;  %3056 = vmatpush3.bf16.msra.mxu1 %v3053_v18 }
  0x18   : > { %2877 = vmatprep.mubr.msk.f32.mxu1 %vm406_vm0, %v387_v16  ;;  %2897 = vmatprep.mubr.msk.f32.mxu0 %vm406_vm0, %v387_v16 }
  0x19   : > { %3064 = vmatpush3.bf16.msra.mxu0 %v3061_v24 }
  0x1a   : > { %2878 = vmatmul.mubr.msk.f32.vlgmr.msra.gmra.mrb[4].mxu1 %vm406_vm0, %v388_v19 }
  0x1b   : > { %2880 = vmatprep.mubr.msk.f32.mxu1 %vm406_vm0, %v389_v23 }
  0x1c   : > { %2898 = vmatmul.mubr.msk.f32.vlgmr.msra.gmra.mrb[4].mxu0 %vm406_vm0, %v388_v19 }
  0x1d   : > { %2900 = vmatprep.mubr.msk.f32.mxu0 %vm406_vm0, %v389_v23 }
  0x1e   : > { %2881 = vmatmul.mubr.msk.f32.gmra.mrb[6].mxu1 %vm406_vm0, %v390_v25 }
  0x1f   : > { %2883 = vmatprep.mubr.msk.f32.mxu1 %vm406_vm0, %v391_v11 }
  0x20   : > { %2901 = vmatmul.mubr.msk.f32.gmra.mrb[6].mxu0 %vm406_vm0, %v390_v25 }
  0x21   : > { %2903 = vmatprep.mubr.msk.f32.mxu0 %vm406_vm0, %v391_v11 }
  0x22   : > { %2884 = vmatmul.mubr.msk.f32.gmra.mrb[8].mxu1 %vm406_vm0, %v392_v15 }
  0x23   : > { %2886 = vmatprep.mubr.msk.f32.mxu1 %vm406_vm0, %v393_v17 }
  0x24   : > { %2904 = vmatmul.mubr.msk.f32.gmra.mrb[8].mxu0 %vm406_vm0, %v392_v15 }
  0x25   : > { %2906 = vmatprep.mubr.msk.f32.mxu0 %vm406_vm0, %v393_v17 }
  0x26   : > { %2887 = vmatmul.mubr.msk.f32.gmra.mrb[10].mxu1 %vm406_vm0, %v394_v22 }
  0x28   : > { %2907 = vmatmul.mubr.msk.f32.gmra.mrb[10].mxu0 %vm406_vm0, %v394_v22 }
  0xe5   : > { %v2865_v27 = vpop.f32.mrb[0].mxu1 }
  0xe6   : > { %v2859_v28 = vpop.f32.mrb[0].mxu0  ;;  %v517_v29 = vpop.f32.mrb[1].mxu1  ;;  %v3491_v2 = vadd.f32 %v2865_v27, %v2649_v26 }
  0xe7   : > { %v497_v30 = vpop.f32.mrb[1].mxu0  ;;  %v3420_v31 = vadd.f32 %v2649_v26, %v517_v29  ;;  %v3459_v55 = vadd.f32 %v2859_v28, %v2649_v26 }
  0xe8   : > { %v3422_v32 = vadd.f32 %v2649_v26, %v497_v30  ;;  %v769_v30 = vld [vmem:[%s3852_s9 + $0x8] sm:$0xff] }
  0xe9   : > { %v2868_v33 = vpop.f32.mrb[2].mxu1  ;;  %2927 = vmatprep.mubr.msk.f32.mxu0 %vm780_vm1, %v3420_v31 }
  0xea   : > { %2913 = vmatprep.mubr.msk.f32.mxu1 %vm780_vm1, %v3422_v32  ;;  %v2862_v34 = vpop.f32.mrb[2].mxu0  ;;  %v527_v35 = vpop.f32.mrb[3].mxu1  ;;  %v3505_v5 = vadd.f32 %v2868_v33, %v2649_v26 }
  0xeb   : > { %v507_v36 = vpop.f32.mrb[3].mxu0  ;;  %v3493_v3 = vadd.f32 %v2862_v34, %v2649_v26  ;;  %v3495_v4 = vadd.f32 %v2649_v26, %v527_v35  ;;  %v768_v35 = vld [vmem:[%s3852_s9] sm:$0xff] }
  0xec   : > { %v3469_v60 = vadd.f32 %v2649_v26, %v507_v36 }
  0xed   : > { %v2879_v38 = vpop.f32.mrb[4].mxu1 }
  0xee   : > { %v3431_v39 = vadd.f32 %v2879_v38, %v2658_v37  ;;  %v613_v40 = vpop.f32.mrb[5].mxu1 }
  0xef   : > { %v3433_v41 = vadd.f32 %v2658_v37, %v613_v40  ;;  %v2899_v42 = vpop.f32.mrb[4].mxu0  ;;  %v3559_v40 = vld [vmem:[%s3853_s10] sm:$0xff] }
  0xf0   : > { %v3512_v7 = vadd.f32 %v2899_v42, %v2667_v6  ;;  %v729_v8 = vpop.f32.mrb[5].mxu0 }
  0xf1   : > { %v3167_v44 = vpack.i.bf16 %v3431_v39, %v3433_v41  ;;  %v3065_v45 = vpack.c.bf16 %v3431_v39, %v3433_v41  ;;  %v2882_v46 = vpop.f32.mrb[6].mxu1  ;;  %v3514_v9 = vadd.f32 %v2667_v6, %v729_v8 }
  0xf2   : > { %v3445_v47 = vadd.f32 %v2882_v46, %v2658_v37  ;;  %v623_v48 = vpop.f32.mrb[7].mxu1 }
  0xf3   : > { %3067 = vmatprep.subr.msk.bf16.mxu1 %vm3437_vm2, %v3065_v45  ;;  %v3449_v49 = vadd.f32 %v2658_v37, %v623_v48  ;;  %v3089_v10 = vpack.c.bf16 %v3512_v7, %v3514_v9  ;;  %v2902_v11 = vpop.f32.mrb[6].mxu0  ;;  %v3187_v12 = vpack.i.bf16 %v3512_v7, %v3514_v9 }
  0xf4   : > { %3070 = vmatpush3.bf16.xpose.msk.msra.mxu1 %vm3437_vm2, %v3065_v45  ;;  %v739_v13 = vpop.f32.mrb[7].mxu0  ;;  %v3520_v14 = vadd.f32 %v2902_v11, %v2667_v6  ;;  %v3564_v45 = vld [vmem:[%s3853_s10 + $0x8] sm:$0xff]  ;;  %v3578_v11 = vld [vmem:[%s3853_s10 + $0x10] sm:$0xff] }
  0xf5   : > { %v3172_v50 = vpack.i.bf16 %v3445_v47, %v3449_v49  ;;  %v3071_v51 = vpack.c.bf16 %v3445_v47, %v3449_v49  ;;  %v2885_v52 = vpop.f32.mrb[8].mxu1  ;;  %v3522_v15 = vadd.f32 %v2667_v6, %v739_v13 }
  0xf6   : > { %v3457_v53 = vadd.f32 %v2885_v52, %v2658_v37  ;;  %v633_v54 = vpop.f32.mrb[9].mxu1 }
  0xf7   : > { %v3461_v56 = vadd.f32 %v2658_v37, %v633_v54  ;;  %3073 = vmatprep.subr.msk.bf16.mxu1 %vm3437_vm2, %v3071_v51  ;;  %v2905_v16 = vpop.f32.mrb[8].mxu0  ;;  %v3192_v17 = vpack.i.bf16 %v3520_v14, %v3522_v15  ;;  %v3093_v18 = vpack.c.bf16 %v3520_v14, %v3522_v15 }
  0xf8   : > { %v3528_v19 = vadd.f32 %v2905_v16, %v2667_v6  ;;  %v749_v20 = vpop.f32.mrb[9].mxu0 }
  0xf9   : > { %v3177_v57 = vpack.i.bf16 %v3457_v53, %v3461_v56  ;;  %v3077_v58 = vpack.c.bf16 %v3457_v53, %v3461_v56  ;;  %v2888_v59 = vpop.f32.mrb[10].mxu1  ;;  %v3530_v21 = vadd.f32 %v2667_v6, %v749_v20 }
  0xfa   : > { %v3471_v61 = vadd.f32 %v2888_v59, %v2658_v37  ;;  %v643_v62 = vpop.f32.mrb[11].mxu1 }
  0xfb   : > { %2914 = vmatmul.mubr.msk.f32.vlgmr.msra.gmra.mrb[12].mxu1 %vm780_vm1, %v3459_v55  ;;  %3079 = vmatprep.subr.msk.bf16.mxu0 %vm3437_vm2, %v3077_v58  ;;  %v3477_v63 = vadd.f32 %v2658_v37, %v643_v62  ;;  %v2908_v22 = vpop.f32.mrb[10].mxu0  ;;  %v3197_v25 = vpack.i.bf16 %v3528_v19, %v3530_v21  ;;  %v3538_v26 = vpack.c.bf16 %v3528_v19, %v3530_v21 }
  0xfc   : > { %3076 = vmatpush3.bf16.xpose.msk.msra.mxu1 %vm3437_vm2, %v3071_v51  ;;  %3082 = vmatpush3.bf16.xpose.msk.msra.mxu0 %vm3437_vm2, %v3077_v58  ;;  %v3532_v23 = vadd.f32 %v2908_v22, %v2667_v6  ;;  %v759_v24 = vpop.f32.mrb[11].mxu0  ;;  %v3583_v22 = vld [vmem:[%s3853_s10 + $0x18] sm:$0xff] }
  0xfd   : > { %v3182_v0 = vpack.i.bf16 %v3471_v61, %v3477_v63  ;;  %v3083_v1 = vpack.c.bf16 %v3471_v61, %v3477_v63  ;;  %2920 = vmatprep.mubr.msk.f32.mxu1 %vm780_vm1, %v3469_v60  ;;  %3090 = vmatprep.subr.bf16.mxu0 %v3089_v10  ;;  %v3540_v27 = vadd.f32 %v2667_v6, %v759_v24 }
  0xff   : > { %3085 = vmatprep.subr.msk.bf16.mxu1 %vm3437_vm2, %v3083_v1  ;;  %v3202_v28 = vpack.i.bf16 %v3532_v23, %v3540_v27  ;;  %v3546_v29 = vpack.c.bf16 %v3532_v23, %v3540_v27 }
 0x103   : > { %2921 = vmatmul.mubr.msk.f32.vlgmr.msra.gmra.mrb[14].mxu1 %vm780_vm1, %v3493_v3  ;;  %2928 = vmatmul.mubr.msk.f32.vlgmr.msra.gmra.mrb[12].mxu0 %vm780_vm1, %v3491_v2 }
 0x104   : > { %3088 = vmatpush3.bf16.xpose.msk.msra.mxu1 %vm3437_vm2, %v3083_v1  ;;  %2934 = vmatprep.mubr.msk.f32.mxu1 %vm780_vm1, %v3495_v4 }
 0x105   : > { %3092 = vmatpush3.bf16.msra.mxu0 %v3089_v10  ;;  %3094 = vmatprep.subr.bf16.mxu1 %v3093_v18  ;;  %v3573_v10 = vld [vmem:[%s3853_s10 + $0x20] sm:$0xff] }
 0x106   : > { %3098 = vmatprep.subr.bf16.mxu0 %v3538_v26 }
 0x10b   : > { %2935 = vmatmul.mubr.msk.f32.vlgmr.msra.gmra.mrb[16].mxu1 %vm780_vm1, %v3505_v5 }
 0x10c   : > { %3096 = vmatpush3.bf16.msra.mxu1 %v3093_v18 }
 0x10d   : > { %3102 = vmatprep.subr.bf16.mxu1 %v3546_v29 }
 0x1ce   : > { %v2915_v33 = vpop.f32.mrb[12].mxu1 }
 0x1cf   : > { %v1130_v34 = vmul.f32 0.25, %v2915_v33  ;;  %v859_v36 = vpop.f32.mrb[13].mxu1 }
 0x1d0   : > { %v1129_v37 = vmul.f32 0.25, %v859_v36 }
 0x1d1   : > { %v1138_v38 = vadd.f32 %v1130_v34, %v769_v30 }
 0x1d2   : > { %v1137_v42 = vadd.f32 %v1129_v37, %v768_v35 }
 0x1d3   : > { %v1146_v48 = vadd.f32 %v1138_v38, %v3564_v45 }
 0x1d4   : > { %v1145_v46 = vadd.f32 %v1137_v42, %v3559_v40 }
 0x1d5   : > { %v1156_v8 = vsel %vm780_vm1, %v1146_v48, -inf }
 0x1d6   : > { %v2922_v51 = vpop.f32.mrb[14].mxu1  ;;  %v2929_v52 = vpop.f32.mrb[12].mxu0  ;;  %v1153_v54 = vsel %vm780_vm1, %v1145_v46, -inf }
 0x1d7   : > { %v1132_v58 = vmul.f32 0.25, %v2922_v51  ;;  %v1033_v59 = vpop.f32.mrb[13].mxu0  ;;  %1154 = vmax.xlane.f32.xlu0 %v1153_v54  ;;  %v946_v62 = vpop.f32.mrb[15].mxu1  ;;  %v1134_v16 = vmul.f32 0.25, %v2929_v52  ;;  %v3593_v54 = vld [vmem:[%s3853_s10 + $0x28] sm:$0xff] }
 0x1d8   : > { %v1133_v1 = vmul.f32 0.25, %v1033_v59  ;;  %v1131_v6 = vmul.f32 0.25, %v946_v62  ;;  %v3598_v59 = vld [vmem:[%s3853_s10 + $0x30] sm:$0xff] }
 0x1d9   : > { %v1140_v13 = vadd.f32 %v1132_v58, %v769_v30  ;;  %v1142_v34 = vadd.f32 %v1134_v16, %v769_v30 }
 0x1da   : > { %v1141_v18 = vadd.f32 %v1133_v1, %v768_v35  ;;  %v1139_v20 = vadd.f32 %v1131_v6, %v768_v35 }
 0x1db   : > { %1157 = vmax.xlane.f32.xlu0 %v1156_v8  ;;  %v1148_v42 = vadd.f32 %v1140_v13, %v3583_v22  ;;  %v1150_v8 = vadd.f32 %v1142_v34, %v3593_v54  ;;  %v3605_v13 = vld [vmem:[%s3853_s10 + $0x38] sm:$0xff] }
 0x1dc   : > { %v1149_v24 = vadd.f32 %v1141_v18, %v3573_v10  ;;  %v1147_v33 = vadd.f32 %v1139_v20, %v3578_v11 }
 0x1dd   : > { %v1162_v6 = vsel %vm780_vm1, %v1148_v42, -inf  ;;  %v1168_v18 = vsel %vm780_vm1, %v1150_v8, -inf }
 0x1de   : > { %v2936_v36 = vpop.f32.mrb[16].mxu1  ;;  %v1165_v37 = vsel %vm780_vm1, %v1149_v24, -inf  ;;  %v1159_v38 = vsel %vm780_vm1, %v1147_v33, -inf }
 0x1df   : > { %v1136_v51 = vmul.f32 0.25, %v2936_v36  ;;  %1166 = vmax.xlane.f32.xlu0 %v1165_v37  ;;  %1160 = vmax.xlane.f32.xlu1 %v1159_v38  ;;  %v1120_v52 = vpop.f32.mrb[17].mxu1 }
 0x1e0   : > { %v1135_v58 = vmul.f32 0.25, %v1120_v52 }
 0x1e1   : > { %v1144_v62 = vadd.f32 %v1136_v51, %v769_v30 }
 0x1e2   : > { %v1143_v1 = vadd.f32 %v1135_v58, %v768_v35 }
 0x1e3   : > { %1163 = vmax.xlane.f32.xlu1 %v1162_v6  ;;  %v1152_v36 = vadd.f32 %v1144_v62, %v3605_v13 }
 0x1e4   : > { %v1151_v16 = vadd.f32 %v1143_v1, %v3598_v59 }
 0x1e5   : > { %v1174_v30 = vsel %vm780_vm1, %v1152_v36, -inf }
 0x1e6   : > { %v1171_v20 = vsel %vm780_vm1, %v1151_v16, -inf }
 0x1e7   : > { %1169 = vmax.xlane.f32.xlu1 %v1168_v18  ;;  %1172 = vmax.xlane.f32.xlu0 %v1171_v20 }
 0x1eb   : > { %1175 = vmax.xlane.f32.xlu1 %v1174_v30 }
 0x1fc   : > { %3173 = vrot.lane.b32.xlu1 %v3172_v50, %s3279_s24 }
 0x1fd   : > { %3168 = vrot.lane.b32.xlu0 %v3167_v44, %s3279_s24 }
 0x200   : > { %3178 = vrot.lane.b32.xlu1 %v3177_v57, %s3279_s24 }
 0x204   : > { %1565 = vrot.lane.b32.xlu1 %v3422_v32, %s3279_s24 }
 0x264   : > { %v1155_v35 = vpop.xlane.xlu0 %1154 }
 0x265   : > { %v1177_v34 = vsub.f32 %v1145_v46, %v1155_v35 }
 0x267   : > { %v1185_v37 = vmul.f32 1.442695, %v1177_v34 }
 0x268   : > { %v1158_v38 = vpop.xlane.xlu0 %1157 }
 0x269   : > { %3207 = vpow2.f32 %v1185_v37  ;;  %v1178_v47 = vsub.f32 %v1146_v48, %v1158_v38 }
 0x26b   : > { %v1187_v49 = vmul.f32 1.442695, %v1178_v47 }
 0x26c   : > { %v1167_v50 = vpop.xlane.xlu0 %1166  ;;  %v1161_v51 = vpop.xlane.xlu1 %1160 }
 0x26d   : > { %3209 = vpow2.f32 %v1187_v49  ;;  %v1181_v39 = vsub.f32 %v1149_v24, %v1167_v50  ;;  %v1179_v41 = vsub.f32 %v1147_v33, %v1161_v51 }
 0x26f   : > { %v1189_v44 = vmul.f32 1.442695, %v1179_v41  ;;  %v1193_v52 = vmul.f32 1.442695, %v1181_v39 }
 0x270   : > { %v1164_v58 = vpop.xlane.xlu1 %1163 }
 0x271   : > { %v1180_v53 = vsub.f32 %v1148_v42, %v1164_v58  ;;  %3211 = vpow2.f32 %v1189_v44 }
 0x272   : > { %3213 = vpow2.f32 %v1193_v52 }
 0x273   : > { %v3208_v56 = vpop.eup %3207  ;;  %v1191_v57 = vmul.f32 1.442695, %v1180_v53 }
 0x274   : > { %v1170_v32 = vpop.xlane.xlu1 %1169  ;;  %v1173_v46 = vpop.xlane.xlu0 %1172  ;;  %v1201_v62 = vsel %vm780_vm1, %v3208_v56, 0.0 }
 0x275   : > { %3215 = vpow2.f32 %v1191_v57  ;;  %v1182_v48 = vsub.f32 %v1150_v8, %v1170_v32  ;;  %v1183_v1 = vsub.f32 %v1151_v16, %v1173_v46  ;;  %1202 = vadd.xlane.f32.xlu0 %v1201_v62 }
 0x277   : > { %v3210_v6 = vpop.eup %3209  ;;  %v1195_v18 = vmul.f32 1.442695, %v1182_v48  ;;  %v1197_v24 = vmul.f32 1.442695, %v1183_v1 }
 0x278   : > { %v1176_v33 = vpop.xlane.xlu1 %1175  ;;  %v1204_v20 = vsel %vm780_vm1, %v3210_v6, 0.0  ;;  %v3169_v63 = vpop.permute.xlu0 %3168 }
 0x279   : > { %3217 = vpow2.f32 %v1195_v18  ;;  %v1184_v42 = vsub.f32 %v1152_v36, %v1176_v33  ;;  %1205 = vadd.xlane.f32.xlu1 %v1204_v20  ;;  %v3171_v58 = vunpack.i.h.bf16 %v3169_v63 }
 0x27a   : > { %3219 = vpow2.f32 %v1197_v24 }
 0x27b   : > { %v1199_v30 = vmul.f32 1.442695, %v1184_v42  ;;  %v3212_v35 = vpop.eup %3211 }
 0x27c   : > { %v1207_v34 = vsel %vm780_vm1, %v3212_v35, 0.0  ;;  %v3629_v37 = vpop.eup %3213  ;;  %v3174_v61 = vpop.permute.xlu1 %3173 }
 0x27d   : > { %3221 = vpow2.f32 %v1199_v30  ;;  %1208 = vadd.xlane.f32.xlu0 %v1207_v34  ;;  %v1213_v38 = vsel %vm780_vm1, %v3629_v37, 0.0  ;;  %v3176_v1 = vunpack.i.h.bf16 %v3174_v61  ;;  %v3175_v18 = vunpack.i.l.bf16 %v3174_v61 }
 0x27f   : > { %v3216_v8 = vpop.eup %3215  ;;  %v3111_v30 = vpack.c.bf16 %v3176_v1, %v3175_v18 }
 0x280   : > { %v1210_v16 = vsel %vm780_vm1, %v3216_v8, 0.0 }
 0x281   : > { %1211 = vadd.xlane.f32.xlu1 %v1210_v16  ;;  %1214 = vadd.xlane.f32.xlu0 %v1213_v38 }
 0x283   : > { %v3634_v47 = vpop.eup %3217 }
 0x284   : > { %v3636_v36 = vpop.eup %3219  ;;  %v1216_v49 = vsel %vm780_vm1, %v3634_v47, 0.0 }
 0x285   : > { %1217 = vadd.xlane.f32.xlu1 %v1216_v49  ;;  %v1219_v50 = vsel %vm780_vm1, %v3636_v36, 0.0 }
 0x286   : > { %1220 = vadd.xlane.f32.xlu0 %v1219_v50 }
 0x287   : > { %v3642_v51 = vpop.eup %3221 }
 0x288   : > { %v1222_v39 = vsel %vm780_vm1, %v3642_v51, 0.0 }
 0x289   : > { %1223 = vadd.xlane.f32.xlu1 %v1222_v39 }
 0x29a   : > { %3183 = vrot.lane.b32.xlu1 %v3182_v0, %s3279_s24 }
 0x29c   : > { %1567 = vrot.lane.b32.xlu0 %v3459_v55, %s3279_s24  ;;  %v3179_v55 = vpop.permute.xlu1 %3178 }
 0x29d   : > { %v3181_v34 = vunpack.i.h.bf16 %v3179_v55 }
 0x29e   : > { %1658 = vrot.lane.b32.xlu1 %v3493_v3, %s3279_s24 }
 0x2a0   : > { %1656 = vrot.lane.b32.xlu0 %v3469_v60, %s3279_s24  ;;  %v1566_v0 = vpop.permute.xlu1 %1565 }
 0x2a2   : > { %1749 = vrot.lane.b32.xlu1 %v3491_v2, %s3279_s24 }
 0x2a4   : > { %1747 = vrot.lane.b32.xlu0 %v3420_v31, %s3279_s24 }
 0x2a6   : > { %1840 = vrot.lane.b32.xlu1 %v3505_v5, %s3279_s24  ;;  %v3170_v5 = vunpack.i.l.bf16 %v3169_v63 }
 0x2a8   : > { %1838 = vrot.lane.b32.xlu0 %v3495_v4, %s3279_s24  ;;  %v3105_v46 = vpack.c.bf16 %v3171_v58, %v3170_v5  ;;  %v771_v5 = vld [vmem:[%s3852_s9 + $0x18] sm:$0xff] }
 0x302   : > { %v1203_v3 = vpop.xlane.xlu0 %1202 }
 0x303   : > { %3223 = vrcp.f32 %v1203_v3 }
 0x306   : > { %v1206_v41 = vpop.xlane.xlu1 %1205 }
 0x307   : > { %3225 = vrcp.f32 %v1206_v41 }
 0x30a   : > { %v1209_v60 = vpop.xlane.xlu0 %1208 }
 0x30b   : > { %3227 = vrcp.f32 %v1209_v60 }
 0x30d   : > { %v3224_v2 = vpop.eup %3223 }
 0x30e   : > { %v1212_v44 = vpop.xlane.xlu1 %1211  ;;  %v1233_v52 = vmul.f32 %v3224_v2, %v3208_v56  ;;  %v1215_v31 = vpop.xlane.xlu0 %1214 }
 0x30f   : > { %3229 = vrcp.f32 %v1212_v44 }
 0x310   : > { %3231 = vrcp.f32 %v1215_v31  ;;  %2941 = vmatprep.mubr.msk.f32.mxu0 %vm780_vm1, %v1233_v52 }
 0x311   : > { %v3226_v4 = vpop.eup %3225 }
 0x312   : > { %v1234_v53 = vmul.f32 %v3226_v4, %v3210_v6  ;;  %v1218_v57 = vpop.xlane.xlu1 %1217 }
 0x313   : > { %3233 = vrcp.f32 %v1218_v57  ;;  %v1221_v32 = vpop.xlane.xlu0 %1220  ;;  %v770_v57 = vld [vmem:[%s3852_s9 + $0x10] sm:$0xff] }
 0x314   : > { %3235 = vrcp.f32 %v1221_v32  ;;  %2942 = vmatmul.mubr.msk.f32.vlgmr.msra.gmra.mrb[14].mxu0 %vm780_vm1, %v1234_v53 }
 0x315   : > { %3100 = vmatpush3.bf16.msra.mxu0 %v3538_v26  ;;  %v3228_v62 = vpop.eup %3227  ;;  %v3180_v26 = vunpack.i.l.bf16 %v3179_v55 }
 0x316   : > { %3107 = vmatprep.subr.msk.bf16.mxu0 %vm3437_vm2, %v3105_v46  ;;  %v1224_v56 = vpop.xlane.xlu1 %1223  ;;  %v1235_v48 = vmul.f32 %v3228_v62, %v3212_v35 }
 0x317   : > { %3237 = vrcp.f32 %v1224_v56  ;;  %v1568_v20 = vpop.permute.xlu0 %1567 }
 0x318   : > { %2948 = vmatprep.mubr.msk.f32.mxu1 %vm780_vm1, %v1235_v48 }
 0x319   : > { %v3230_v24 = vpop.eup %3229 }
 0x31a   : > { %v3232_v6 = vpop.eup %3231  ;;  %v1236_v33 = vmul.f32 %v3230_v24, %v3216_v8  ;;  %v3184_v49 = vpop.permute.xlu1 %3183 }
 0x31b   : > { %v1237_v42 = vmul.f32 %v3232_v6, %v3629_v37  ;;  %v3117_v37 = vpack.c.bf16 %v3181_v34, %v3180_v26  ;;  %v3186_v39 = vunpack.i.h.bf16 %v3184_v49  ;;  %v3185_v61 = vunpack.i.l.bf16 %v3184_v49  ;;  %v1657_v55 = vpop.permute.xlu0 %1656 }
 0x31c   : > { %2949 = vmatmul.mubr.msk.f32.vlgmr.msra.gmra.mrb[18].mxu1 %vm780_vm1, %v1236_v33 }
 0x31d   : > { %v3234_v16 = vpop.eup %3233  ;;  %2955 = vmatprep.mubr.msk.f32.mxu0 %vm780_vm1, %v1237_v42  ;;  %3104 = vmatpush3.bf16.msra.mxu1 %v3546_v29 }
 0x31e   : > { %v3236_v35 = vpop.eup %3235  ;;  %v1238_v38 = vmul.f32 %v3234_v16, %v3634_v47  ;;  %3113 = vmatprep.subr.msk.bf16.mxu1 %vm3437_vm2, %v3111_v30  ;;  %v3123_v47 = vpack.c.bf16 %v3186_v39, %v3185_v61  ;;  %v1659_v63 = vpop.permute.xlu1 %1658 }
 0x31f   : > { %v1239_v8 = vmul.f32 %v3236_v35, %v3636_v36  ;;  %v1748_v36 = vpop.permute.xlu0 %1747 }
 0x320   : > { %2956 = vmatmul.mubr.msk.f32.vlgmr.msra.gmra.mrb[16].mxu0 %vm780_vm1, %v1238_v38 }
 0x321   : > { %v3238_v50 = vpop.eup %3237  ;;  %2962 = vmatprep.mubr.msk.f32.mxu1 %vm780_vm1, %v1239_v8  ;;  %3110 = vmatpush3.bf16.xpose.msk.msra.mxu0 %vm3437_vm2, %v3105_v46 }
 0x322   : > { %v1240_v29 = vmul.f32 %v3238_v50, %v3642_v51  ;;  %2969 = vmatprep.mubr.msk.f32.mxu0 %vm780_vm1, %v1566_v0  ;;  %3119 = vmatprep.subr.msk.bf16.mxu0 %vm3437_vm2, %v3117_v37  ;;  %v1750_v0 = vpop.permute.xlu1 %1749 }
 0x323   : > { %v1839_v51 = vpop.permute.xlu0 %1838 }
 0x324   : > { %2963 = vmatmul.mubr.msk.f32.vlgmr.msra.gmra.mrb[20].mxu1 %vm780_vm1, %v1240_v29 }
 0x325   : > { %2976 = vmatprep.mubr.msk.f32.mxu1 %vm780_vm1, %v1657_v55 }
 0x326   : > { %3116 = vmatpush3.bf16.xpose.msk.msra.mxu1 %vm3437_vm2, %v3111_v30  ;;  %v1841_v3 = vpop.permute.xlu1 %1840 }
 0x327   : > { %3125 = vmatprep.subr.msk.bf16.mxu1 %vm3437_vm2, %v3123_v47 }
 0x328   : > { %2970 = vmatmul.mubr.msk.f32.vlgmr.msra.gmra.mrb[18].mxu0 %vm780_vm1, %v1568_v20 }
 0x329   : > { %3122 = vmatpush3.bf16.xpose.msk.msra.mxu0 %vm3437_vm2, %v3117_v37  ;;  %2983 = vmatprep.mubr.msk.f32.mxu0 %vm780_vm1, %v1748_v36 }
 0x32d   : > { %2977 = vmatmul.mubr.msk.f32.vlgmr.msra.gmra.mrb[22].mxu1 %vm780_vm1, %v1659_v63 }
 0x32e   : > { %3128 = vmatpush3.bf16.xpose.msk.msra.mxu1 %vm3437_vm2, %v3123_v47  ;;  %2990 = vmatprep.mubr.msk.f32.mxu1 %vm780_vm1, %v1839_v51 }
 0x330   : > { %2984 = vmatmul.mubr.msk.f32.vlgmr.msra.gmra.mrb[20].mxu0 %vm780_vm1, %v1750_v0 }
 0x335   : > { %2991 = vmatmul.mubr.msk.f32.vlgmr.msra.gmra.mrb[24].mxu1 %vm780_vm1, %v1841_v3 }
 0x3e7   : > { %v3702_v41 = vpop.f32.mrb[14].mxu0 }
 0x3e8   : > { %v3704_v60 = vpop.f32.mrb[15].mxu0 }
 0x3ef   : > { %v3706_v2 = vpop.f32.mrb[18].mxu1 }
 0x3f0   : > { %v3708_v44 = vpop.f32.mrb[19].mxu1 }
 0x3f3   : > { %v3710_v52 = vpop.f32.mrb[16].mxu0 }
 0x3f4   : > { %v3712_v31 = vpop.f32.mrb[17].mxu0 }
 0x3f7   : > { %v3714_v43 = vpop.f32.mrb[20].mxu1 }
 0x3f8   : > { %v3716_v58 = vpop.f32.mrb[21].mxu1 }
 0x3fb   : > { %v2971_v4 = vpop.f32.mrb[18].mxu0 }
 0x3fc   : > { %v1930_v53 = vmul.f32 0.25, %v2971_v4  ;;  %v1647_v32 = vpop.f32.mrb[19].mxu0 }
 0x3fd   : > { %v1929_v46 = vmul.f32 0.25, %v1647_v32 }
 0x3fe   : > { %v1938_v62 = vadd.f32 %v1930_v53, %v771_v5 }
 0x3ff   : > { %v1937_v56 = vadd.f32 %v1929_v46, %v770_v57 }
 0x400   : > { %v2978_v48 = vpop.f32.mrb[22].mxu1  ;;  %v1946_v1 = vadd.f32 %v1938_v62, %v3564_v45 }
 0x401   : > { %v1932_v18 = vmul.f32 0.25, %v2978_v48  ;;  %v1738_v24 = vpop.f32.mrb[23].mxu1  ;;  %v1945_v6 = vadd.f32 %v1937_v56, %v3559_v40 }
 0x402   : > { %v1931_v33 = vmul.f32 0.25, %v1738_v24  ;;  %v1956_v20 = vsel %vm780_vm1, %v1946_v1, -inf }
 0x403   : > { %v1940_v42 = vadd.f32 %v1932_v18, %v771_v5  ;;  %1957 = vmax.xlane.f32.xlu1 %v1956_v20  ;;  %v2985_v30 = vpop.f32.mrb[20].mxu0  ;;  %v1953_v34 = vsel %vm780_vm1, %v1945_v6, -inf }
 0x404   : > { %v1939_v26 = vadd.f32 %v1931_v33, %v770_v57  ;;  %v1934_v16 = vmul.f32 0.25, %v2985_v30  ;;  %1954 = vmax.xlane.f32.xlu0 %v1953_v34  ;;  %v1829_v35 = vpop.f32.mrb[21].mxu0 }
 0x405   : > { %v1933_v38 = vmul.f32 0.25, %v1829_v35  ;;  %v1948_v49 = vadd.f32 %v1940_v42, %v3583_v22 }
 0x406   : > { %v1942_v45 = vadd.f32 %v1934_v16, %v771_v5  ;;  %v1947_v40 = vadd.f32 %v1939_v26, %v3578_v11 }
 0x407   : > { %v1941_v8 = vadd.f32 %v1933_v38, %v770_v57  ;;  %v1962_v37 = vsel %vm780_vm1, %v1948_v49, -inf }
 0x408   : > { %v2992_v50 = vpop.f32.mrb[24].mxu1  ;;  %1963 = vmax.xlane.f32.xlu0 %v1962_v37  ;;  %v1950_v39 = vadd.f32 %v1942_v45, %v3593_v54  ;;  %v1959_v63 = vsel %vm780_vm1, %v1947_v40, -inf }
 0x409   : > { %v1936_v61 = vmul.f32 0.25, %v2992_v50  ;;  %v1920_v55 = vpop.f32.mrb[25].mxu1  ;;  %v1949_v22 = vadd.f32 %v1941_v8, %v3573_v10 }
 0x40a   : > { %v1935_v29 = vmul.f32 0.25, %v1920_v55  ;;  %v1968_v47 = vsel %vm780_vm1, %v1950_v39, -inf }
 0x40b   : > { %v1944_v36 = vadd.f32 %v1936_v61, %v771_v5  ;;  %1969 = vmax.xlane.f32.xlu1 %v1968_v47  ;;  %v1965_v3 = vsel %vm780_vm1, %v1949_v22, -inf }
 0x40c   : > { %v1943_v51 = vadd.f32 %v1935_v29, %v770_v57  ;;  %1960 = vmax.xlane.f32.xlu0 %v1959_v63 }
 0x40d   : > { %v1952_v0 = vadd.f32 %v1944_v36, %v3605_v13 }
 0x40e   : > { %v1951_v54 = vadd.f32 %v1943_v51, %v3598_v59 }
 0x40f   : > { %v1974_v11 = vsel %vm780_vm1, %v1952_v0, -inf }
 0x410   : > { %1975 = vmax.xlane.f32.xlu1 %v1974_v11  ;;  %1966 = vmax.xlane.f32.xlu0 %v1965_v3  ;;  %v1971_v4 = vsel %vm780_vm1, %v1951_v54, -inf }
 0x414   : > { %1972 = vmax.xlane.f32.xlu0 %v1971_v4 }
 0x490   : > { %v1958_v5 = vpop.xlane.xlu1 %1957 }
 0x491   : > { %v1978_v53 = vsub.f32 %v1946_v1, %v1958_v5  ;;  %v1955_v32 = vpop.xlane.xlu0 %1954 }
 0x492   : > { %v1977_v46 = vsub.f32 %v1945_v6, %v1955_v32 }
 0x493   : > { %v1987_v10 = vmul.f32 1.442695, %v1978_v53 }
 0x494   : > { %v1985_v57 = vmul.f32 1.442695, %v1977_v46 }
 0x495   : > { %3239 = vpow2.f32 %v1987_v10  ;;  %v1964_v62 = vpop.xlane.xlu0 %1963 }
 0x496   : > { %3241 = vpow2.f32 %v1985_v57  ;;  %v1980_v13 = vsub.f32 %v1948_v49, %v1964_v62 }
 0x498   : > { %v1991_v56 = vmul.f32 1.442695, %v1980_v13  ;;  %v1970_v48 = vpop.xlane.xlu1 %1969 }
 0x499   : > { %v1982_v18 = vsub.f32 %v1950_v39, %v1970_v48  ;;  %v1961_v24 = vpop.xlane.xlu0 %1960 }
 0x49a   : > { %3243 = vpow2.f32 %v1991_v56  ;;  %v1979_v59 = vsub.f32 %v1947_v40, %v1961_v24 }
 0x49b   : > { %v1995_v33 = vmul.f32 1.442695, %v1982_v18 }
 0x49c   : > { %v1989_v20 = vmul.f32 1.442695, %v1979_v59 }
 0x49d   : > { %3245 = vpow2.f32 %v1995_v33  ;;  %v1976_v42 = vpop.xlane.xlu1 %1975  ;;  %v1967_v30 = vpop.xlane.xlu0 %1966 }
 0x49e   : > { %3247 = vpow2.f32 %v1989_v20  ;;  %v1984_v1 = vsub.f32 %v1952_v0, %v1976_v42  ;;  %v1981_v6 = vsub.f32 %v1949_v22, %v1967_v30 }
 0x49f   : > { %v3740_v34 = vpop.eup %3239 }
 0x4a0   : > { %v3242_v26 = vpop.eup %3241  ;;  %v1999_v16 = vmul.f32 1.442695, %v1984_v1  ;;  %v1993_v35 = vmul.f32 1.442695, %v1981_v6  ;;  %v2004_v38 = vsel %vm780_vm1, %v3740_v34, 0.0 }
 0x4a1   : > { %2005 = vadd.xlane.f32.xlu1 %v2004_v38  ;;  %v1973_v49 = vpop.xlane.xlu0 %1972  ;;  %v2001_v45 = vsel %vm780_vm1, %v3242_v26, 0.0 }
 0x4a2   : > { %3249 = vpow2.f32 %v1999_v16  ;;  %v1983_v8 = vsub.f32 %v1951_v54, %v1973_v49  ;;  %2002 = vadd.xlane.f32.xlu0 %v2001_v45  ;;  %v2438_v45 = vld [vmem:[%s3850_s7 + $0x8] sm:$0xff] }
 0x4a3   : > { %3251 = vpow2.f32 %v1993_v35 }
 0x4a4   : > { %v3244_v37 = vpop.eup %3243  ;;  %v1997_v40 = vmul.f32 1.442695, %v1983_v8  ;;  %v2439_v8 = vld [vmem:[%s3850_s7 + $0x10] sm:$0xff] }
 0x4a5   : > { %v2010_v50 = vsel %vm780_vm1, %v3244_v37, 0.0 }
 0x4a6   : > { %3253 = vpow2.f32 %v1997_v40  ;;  %2011 = vadd.xlane.f32.xlu1 %v2010_v50  ;;  %v2440_v40 = vld [vmem:[%s3850_s7 + $0x18] sm:$0xff] }
 0x4a7   : > { %v3746_v39 = vpop.eup %3245  ;;  %v3149_v50 = vpack.c.bf16 %v2440_v40, %v2439_v8 }
 0x4a8   : > { %v3248_v61 = vpop.eup %3247  ;;  %v2016_v55 = vsel %vm780_vm1, %v3746_v39, 0.0 }
 0x4a9   : > { %v2007_v29 = vsel %vm780_vm1, %v3248_v61, 0.0 }
 0x4aa   : > { %2017 = vadd.xlane.f32.xlu1 %v2016_v55  ;;  %2008 = vadd.xlane.f32.xlu0 %v2007_v29 }
 0x4ac   : > { %v3751_v47 = vpop.eup %3249 }
 0x4ad   : > { %v3753_v36 = vpop.eup %3251  ;;  %v2022_v63 = vsel %vm780_vm1, %v3751_v47, 0.0 }
 0x4ae   : > { %2023 = vadd.xlane.f32.xlu1 %v2022_v63  ;;  %v2013_v22 = vsel %vm780_vm1, %v3753_v36, 0.0 }
 0x4af   : > { %2014 = vadd.xlane.f32.xlu0 %v2013_v22 }
 0x4b0   : > { %v3254_v51 = vpop.eup %3253 }
 0x4b1   : > { %v2019_v0 = vsel %vm780_vm1, %v3254_v51, 0.0 }
 0x4b3   : > { %2020 = vadd.xlane.f32.xlu0 %v2019_v0 }
 0x4bf   : > { %3193 = vrot.lane.b32.xlu1 %v3192_v17, %s3279_s24 }
 0x4c3   : > { %3198 = vrot.lane.b32.xlu1 %v3197_v25, %s3279_s24 }
 0x4c7   : > { %3203 = vrot.lane.b32.xlu1 %v3202_v28, %s3279_s24 }
 0x4c9   : > { %3188 = vrot.lane.b32.xlu0 %v3187_v12, %s3279_s24 }
 0x52e   : > { %v2006_v11 = vpop.xlane.xlu1 %2005 }
 0x52f   : > { %v2003_v3 = vpop.xlane.xlu0 %2002 }
 0x530   : > { %3255 = vrcp.f32 %v2003_v3 }
 0x533   : > { %v2012_v14 = vpop.xlane.xlu1 %2011 }
 0x534   : > { %3257 = vrcp.f32 %v2012_v14 }
 0x537   : > { %v2018_v15 = vpop.xlane.xlu1 %2017  ;;  %v2009_v17 = vpop.xlane.xlu0 %2008 }
 0x538   : > { %3259 = vrcp.f32 %v2009_v17 }
 0x539   : > { %3261 = vrcp.f32 %v2006_v11 }
 0x53a   : > { %v3256_v19 = vpop.eup %3255 }
 0x53b   : > { %v2024_v21 = vpop.xlane.xlu1 %2023  ;;  %v2033_v25 = vmul.f32 %v3256_v19, %v3242_v26 }
 0x53c   : > { %v2015_v54 = vpop.xlane.xlu0 %2014 }
 0x53d   : > { %2997 = vmatprep.mubr.msk.f32.mxu0 %vm780_vm1, %v2033_v25  ;;  %3263 = vrcp.f32 %v2015_v54 }
 0x53e   : > { %3265 = vrcp.f32 %v2024_v21  ;;  %v3258_v27 = vpop.eup %3257 }
 0x53f   : > { %v3194_v23 = vpop.permute.xlu1 %3193  ;;  %v2036_v13 = vmul.f32 %v3258_v27, %v3244_v37 }
 0x540   : > { %v3196_v7 = vunpack.i.h.bf16 %v3194_v23  ;;  %v3195_v9 = vunpack.i.l.bf16 %v3194_v23  ;;  %v2021_v12 = vpop.xlane.xlu0 %2020 }
 0x541   : > { %3267 = vrcp.f32 %v2021_v12 }
 0x542   : > { %3269 = vrcp.f32 %v2018_v15  ;;  %v3133_v28 = vpack.c.bf16 %v3196_v7, %v3195_v9  ;;  %v3260_v4 = vpop.eup %3259 }
 0x543   : > { %v3199_v5 = vpop.permute.xlu1 %3198  ;;  %v2035_v32 = vmul.f32 %v3260_v4, %v3248_v61  ;;  %v3262_v18 = vpop.eup %3261 }
 0x544   : > { %v3189_v53 = vpop.permute.xlu0 %3188  ;;  %3134 = vmatprep.subr.bf16.mxu1 %v3133_v28  ;;  %v3201_v46 = vunpack.i.h.bf16 %v3199_v5  ;;  %v3200_v10 = vunpack.i.l.bf16 %v3199_v5  ;;  %v2034_v6 = vmul.f32 %v3262_v18, %v3740_v34  ;;  %v2437_v34 = vld [vmem:[%s3850_s7] sm:$0xff] }
 0x545   : > { %v3191_v57 = vunpack.i.h.bf16 %v3189_v53  ;;  %v3190_v62 = vunpack.i.l.bf16 %v3189_v53  ;;  %3136 = vmatpush3.bf16.msra.mxu1 %v3133_v28  ;;  %3004 = vmatprep.mubr.msk.f32.mxu1 %vm780_vm1, %v2035_v32  ;;  %v3145_v37 = vpack.c.bf16 %v2438_v45, %v2437_v34 }
 0x546   : > { %v3137_v20 = vpack.c.bf16 %v3201_v46, %v3200_v10 }
 0x547   : > { %v3129_v56 = vpack.c.bf16 %v3191_v57, %v3190_v62  ;;  %v3204_v48 = vpop.permute.xlu1 %3203  ;;  %v3264_v33 = vpop.eup %3263 }
 0x548   : > { %v3206_v24 = vunpack.i.h.bf16 %v3204_v48  ;;  %v3205_v59 = vunpack.i.l.bf16 %v3204_v48  ;;  %3005 = vmatmul.mubr.msk.f32.vlgmr.msra.gmra.mrb[26].mxu1 %vm780_vm1, %v2036_v13  ;;  %v3266_v42 = vpop.eup %3265  ;;  %v2037_v16 = vmul.f32 %v3264_v33, %v3753_v36 }
 0x549   : > { %3130 = vmatprep.subr.bf16.mxu0 %v3129_v56  ;;  %v2040_v38 = vmul.f32 %v3266_v42, %v3751_v47 }
 0x54a   : > { %v3141_v30 = vpack.c.bf16 %v3206_v24, %v3205_v59  ;;  %3132 = vmatpush3.bf16.msra.mxu0 %v3129_v56 }
 0x54b   : > { %v3268_v1 = vpop.eup %3267  ;;  %3138 = vmatprep.subr.bf16.mxu0 %v3137_v20 }
 0x54c   : > { %v3270_v26 = vpop.eup %3269  ;;  %3142 = vmatprep.subr.bf16.mxu1 %v3141_v30  ;;  %v2039_v35 = vmul.f32 %v3268_v1, %v3254_v51 }
 0x54d   : > { %2998 = vmatmul.mubr.msk.f32.vlgmr.msra.gmra.mrb[22].mxu0 %vm780_vm1, %v2034_v6  ;;  %3144 = vmatpush3.bf16.msra.mxu1 %v3141_v30  ;;  %v2038_v49 = vmul.f32 %v3270_v26, %v3746_v39 }
 0x54e   : > { %3140 = vmatpush3.bf16.msra.mxu0 %v3137_v20  ;;  %3011 = vmatprep.mubr.msk.f32.mxu0 %vm780_vm1, %v2037_v16 }
 0x54f   : > { %3018 = vmatprep.mubr.msk.f32.mxu1 %vm780_vm1, %v2039_v35  ;;  %3146 = vmatprep.subr.bf16.mxu0 %v3145_v37 }
 0x550   : > { %3019 = vmatmul.mubr.msk.f32.vlgmr.msra.gmra.mrb[28].mxu1 %vm780_vm1, %v2040_v38 }
 0x551   : > { %3012 = vmatmul.mubr.msk.f32.vlgmr.msra.gmra.mrb[24].mxu0 %vm780_vm1, %v2038_v49 }
 0x552   : > { %3148 = vmatpush3.bf16.msra.mxu0 %v3145_v37 }
 0x553   : > { %3150 = vmatprep.subr.bf16.mxu0 %v3149_v50 }
 0x556   : > { %3152 = vmatpush3.bf16.msra.mxu0 %v3149_v50 }
 0x61b   : > { %v3006_v39 = vpop.f32.mrb[26].mxu1 }
 0x61c   : > { %v2210_v61 = vpop.f32.mrb[27].mxu1 }
 0x620   : > { %v2999_v55 = vpop.f32.mrb[22].mxu0 }
 0x621   : > { %2407 = vrot.lane.b32.xlu1 %v2999_v55, %s3280_s21  ;;  %v2121_v29 = vpop.f32.mrb[23].mxu0 }
 0x622   : > { %2405 = vrot.lane.b32.xlu0 %v2121_v29, %s3280_s21 }
 0x623   : > { %v3020_v47 = vpop.f32.mrb[28].mxu1 }
 0x624   : > { %v3013_v36 = vpop.f32.mrb[24].mxu0  ;;  %v2388_v63 = vpop.f32.mrb[29].mxu1 }
 0x625   : > { %2411 = vrot.lane.b32.xlu1 %v3006_v39, %s3280_s21  ;;  %v2299_v22 = vpop.f32.mrb[25].mxu0 }
 0x626   : > { %2409 = vrot.lane.b32.xlu0 %v2210_v61, %s3280_s21 }
 0x629   : > { %2415 = vrot.lane.b32.xlu1 %v3013_v36, %s3280_s21 }
 0x62a   : > { %2413 = vrot.lane.b32.xlu0 %v2299_v22, %s3280_s21 }
 0x62d   : > { %2419 = vrot.lane.b32.xlu1 %v3020_v47, %s3280_s21 }
 0x62e   : > { %2417 = vrot.lane.b32.xlu0 %v2388_v63, %s3280_s21 }
 0x693   : > { %v2408_v51 = vpop.permute.xlu1 %2407 }
 0x694   : > { %v2406_v0 = vpop.permute.xlu0 %2405  ;;  %v2430_v3 = vsel %vm780_vm1, %v3702_v41, %v2408_v51 }
 0x695   : > { %v2429_v11 = vsel %vm780_vm1, %v3704_v60, %v2406_v0 }
 0x696   : > { %3029 = vmatprep.mubr.msk.f32.mxu0 %vm406_vm0, %v2429_v11 }
 0x697   : > { %v2412_v14 = vpop.permute.xlu1 %2411  ;;  %3030 = vmatmul.mubr.msk.f32.vlgmr.msra.gmra.mrb[26].mxu0 %vm406_vm0, %v2430_v3 }
 0x698   : > { %v2410_v15 = vpop.permute.xlu0 %2409  ;;  %v2432_v19 = vsel %vm780_vm1, %v3706_v2, %v2412_v14 }
 0x699   : > { %v2431_v17 = vsel %vm780_vm1, %v3708_v44, %v2410_v15 }
 0x69a   : > { %3032 = vmatprep.mubr.msk.f32.mxu0 %vm406_vm0, %v2431_v17 }
 0x69b   : > { %3033 = vmatmul.mubr.msk.f32.gmra.mrb[28].mxu0 %vm406_vm0, %v2432_v19  ;;  %v2416_v60 = vpop.permute.xlu1 %2415 }
 0x69c   : > { %v2414_v21 = vpop.permute.xlu0 %2413  ;;  %v2434_v25 = vsel %vm780_vm1, %v3710_v52, %v2416_v60  ;;  %v2724_v52 = vld [vmem:[%s3851_s8] ss:$0 sm:$0xff] }
 0x69d   : > { %v2433_v41 = vsel %vm780_vm1, %v3712_v31, %v2414_v21 }
 0x69e   : > { %3035 = vmatprep.mubr.msk.f32.mxu0 %vm406_vm0, %v2433_v41 }
 0x69f   : > { %v2420_v54 = vpop.permute.xlu1 %2419  ;;  %3036 = vmatmul.mubr.msk.f32.gmra.mrb[30].mxu0 %vm406_vm0, %v2434_v25 }
 0x6a0   : > { %v2418_v44 = vpop.permute.xlu0 %2417  ;;  %v2436_v23 = vsel %vm780_vm1, %v3714_v43, %v2420_v54 }
 0x6a1   : > { %v2435_v2 = vsel %vm780_vm1, %v3716_v58, %v2418_v44 }
 0x6a2   : > { %3038 = vmatprep.mubr.msk.f32.mxu0 %vm406_vm0, %v2435_v2 }
 0x6a3   : > { %3039 = vmatmul.mubr.msk.f32.gmra.mrb[32].mxu0 %vm406_vm0, %v2436_v23 }
 0x76a   : > { %v3031_v31 = vpop.f32.mrb[26].mxu0 }
 0x76b   : > { %v2544_v7 = vadd.f32 %v3031_v31, %v2724_v52  ;;  %v2538_v9 = vpop.f32.mrb[27].mxu0 }
 0x76c   : > { %v2539_v58 = vadd.f32 %v2724_v52, %v2538_v9 }
 0x76d   : > { %2578 = vst.msk [vmem:[%s386_s26 + $0x8] sm:$0xff] %vm406_vm0, %v2544_v7 }
 0x76e   : > { %2577 = vst.msk [vmem:[%s386_s26] sm:$0xff] %vm406_vm0, %v2539_v58  ;;  %v3034_v43 = vpop.f32.mrb[28].mxu0 }
 0x76f   : > { %v2554_v12 = vadd.f32 %v3034_v43, %v2724_v52  ;;  %v2548_v27 = vpop.f32.mrb[29].mxu0 }
 0x770   : > { %v2549_v28 = vadd.f32 %v2724_v52, %v2548_v27 }
 0x771   : > { %2580 = vst.msk [vmem:[%s386_s26 + $0x18] sm:$0xff] %vm406_vm0, %v2554_v12 }
 0x772   : > { %2579 = vst.msk [vmem:[%s386_s26 + $0x10] sm:$0xff] %vm406_vm0, %v2549_v28  ;;  %v3037_v4 = vpop.f32.mrb[30].mxu0 }
 0x773   : > { %v2564_v5 = vadd.f32 %v3037_v4, %v2724_v52  ;;  %v2558_v53 = vpop.f32.mrb[31].mxu0 }
 0x774   : > { %v2559_v32 = vadd.f32 %v2724_v52, %v2558_v53 }
 0x775   : > { %2582 = vst.msk [vmem:[%s386_s26 + $0x28] sm:$0xff] %vm406_vm0, %v2564_v5 }
 0x776   : > { %2581 = vst.msk [vmem:[%s386_s26 + $0x20] sm:$0xff] %vm406_vm0, %v2559_v32  ;;  %v3040_v46 = vpop.f32.mrb[32].mxu0 }
 0x777   : > { %v2574_v10 = vadd.f32 %v3040_v46, %v2724_v52  ;;  %v2568_v57 = vpop.f32.mrb[33].mxu0 }
 0x778   : > { %v2569_v62 = vadd.f32 %v2724_v52, %v2568_v57 }
 0x779   : > { %2584 = vst.msk [vmem:[%s386_s26 + $0x38] sm:$0xff] %vm406_vm0, %v2574_v10 }
 0x77a   : > { %2583 = vst.msk [vmem:[%s386_s26 + $0x30] sm:$0xff] %vm406_vm0, %v2569_v62 }
 0x77b PF: > { %s21_s17 = sadd.s32 1, %s3277_s17  }
 0x77c   : > { %p18_p4 = scmp.ge.s32.totalorder %s21_s17, 4  }
 0x77e   :  { %20 = sbr.rel (!%p18_p4) target bundleno = 1 (0x1), region = 94 }

// kernel: _lambda_.16
= control target key start
LH: loop header
LB: loop body
LE: loop exit
PB: predicated region body
PF: predicated region fallthrough
CT: control target
= control target key end

     0   :  { %s537_s15 = smov 0   ;;  %s615_s0 = inlined_call_operand.vmem [shape: f32[32,128], index: 0, kind: input, shape index: {}]   ;;  %s616_s1 = inlined_call_operand.vmem [shape: f32[1,128], index: 1, kind: input, shape index: {}]   ;;  %s617_s2 = inlined_call_operand.vmem [shape: f32[1,128], index: 2, kind: input, shape index: {}]   ;;  %s618_s3 = inlined_call_operand.vmem [shape: f32[128,64], index: 3, kind: input, shape index: {}]   ;;  %s619_s4 = inlined_call_operand.vmem [shape: f32[32,64], index: 4, kind: output, shape index: {}]  }
   0x1 LB: > { %s394_s16 = sadd.s32 4294967295, %s510_s15   ;;  %p398_p0 = scmp.ge.s32.totalorder %s510_s15, 1  ;;  %s510_s15 = sphi %s537_s15, %s14_s15  }
   0x2   : > { %p163_p1 = scmp.lt.s32.totalorder %s510_s15, 3 }
   0x4   : > { %p164_p2 = pnand %p398_p0, %p163_p1 }
   0x5   : > { %s399_s17 = sshll.u32 (!%p164_p2), %s394_s16, 1  ;;  %v244_v2 = vld [vmem:[%s618_s3] sm:$0xff] (!%p164_p2)  ;;  %v245_v3 = vld [vmem:[%s618_s3 + $0x8] sm:$0xff] (!%p164_p2)  ;;  %v246_v4 = vld [vmem:[%s618_s3 + $0x10] sm:$0xff] (!%p164_p2)  ;;  %vm335_vm0 = vcmask (!%p164_p2), 523264  }
   0x6   : > { %167 = sbr.rel (%p164_p2) target bundleno = 546 (0x222), region = 36  ;;  %p190_p3 = scmp.lt.s32.totalorder (!%p164_p2), %s399_s17, 3  ;;  %v460_v5 = vpack.c.bf16 (!%p164_p2), %v245_v3, %v244_v2  ;;  %v247_v6 = vld [vmem:[%s618_s3 + $0x18] sm:$0xff] (!%p164_p2)  ;;  %v248_v16 = vld [vmem:[%s618_s3 + $0x20] sm:$0xff] (!%p164_p2)  ;;  %v249_v17 = vld [vmem:[%s618_s3 + $0x28] sm:$0xff] (!%p164_p2) }
   0x7   : > { %v464_v7 = vpack.c.bf16 (!%p164_p2), %v247_v6, %v246_v4  ;;  %v468_v18 = vpack.c.bf16 (!%p164_p2), %v249_v17, %v248_v16  ;;  %v250_v19 = vld [vmem:[%s618_s3 + $0x30] sm:$0xff] (!%p164_p2)  ;;  %v251_v20 = vld [vmem:[%s618_s3 + $0x38] sm:$0xff] (!%p164_p2)  ;;  %v252_v22 = vld [vmem:[%s618_s3 + $0x40] sm:$0xff] (!%p164_p2) }
   0x8   : > { %461 = vmatprep.subr.bf16.mxu0 (!%p164_p2), %v460_v5  ;;  %v472_v21 = vpack.c.bf16 (!%p164_p2), %v251_v20, %v250_v19  ;;  %v253_v23 = vld [vmem:[%s618_s3 + $0x48] sm:$0xff] (!%p164_p2)  ;;  %v254_v25 = vld [vmem:[%s618_s3 + $0x50] sm:$0xff] (!%p164_p2)  ;;  %v255_v26 = vld [vmem:[%s618_s3 + $0x58] sm:$0xff] (!%p164_p2) }
   0x9   : > { %463 = vmatpush3.bf16.msra.mxu0 (!%p164_p2), %v460_v5  ;;  %v476_v24 = vpack.c.bf16 (!%p164_p2), %v253_v23, %v252_v22  ;;  %v256_v27 = vld [vmem:[%s618_s3 + $0x60] sm:$0xff] (!%p164_p2)  ;;  %v480_v28 = vpack.c.bf16 (!%p164_p2), %v255_v26, %v254_v25  ;;  %v257_v29 = vld [vmem:[%s618_s3 + $0x68] sm:$0xff] (!%p164_p2)  ;;  %v258_v31 = vld [vmem:[%s618_s3 + $0x70] sm:$0xff] (!%p164_p2) }
   0xa   : > { %465 = vmatprep.subr.bf16.mxu0 (!%p164_p2), %v464_v7  ;;  %v484_v30 = vpack.c.bf16 (!%p164_p2), %v257_v29, %v256_v27  ;;  %v259_v32 = vld [vmem:[%s618_s3 + $0x78] sm:$0xff] (!%p164_p2)  ;;  %v403_v41 = vld [vmem:[%s616_s1] ss:$0 sm:$0xff] (!%p164_p2) }
   0xb   : > { %v488_v33 = vpack.c.bf16 (!%p164_p2), %v259_v32, %v258_v31  ;;  %v404_v43 = vld [vmem:[%s617_s2] ss:$0 sm:$0xff] (!%p164_p2) }
   0xd   : > { %s621_s17 = smov (!%p190_p3, %s399_s17), 3  ;;  %467 = vmatpush3.bf16.msra.mxu0 %v464_v7 }
   0xe   : > { %s400_s18 = sshll.u32 %s621_s17, 3  ;;  %469 = vmatprep.subr.bf16.mxu0 %v468_v18 }
   0xf   : > { %s193_s21 = scalar_lea.vmem %s615_s0, %s400_s18  ;;  %s199_s11 = scalar_lea.vmem %s619_s4, %s400_s18 }
  0x10   : > { %v201_v0 = vld [vmem:[%s193_s21] sm:$0xff]  ;;  %v202_v1 = vld [vmem:[%s193_s21 + $0x8] sm:$0xff] }
  0x11   : > { %205 = vadd.xlane.f32.xlu0 %v201_v0  ;;  %471 = vmatpush3.bf16.msra.mxu0 %v468_v18 }
  0x12   : > { %473 = vmatprep.subr.bf16.mxu0 %v472_v21 }
  0x15   : > { %207 = vadd.xlane.f32.xlu0 %v202_v1  ;;  %475 = vmatpush3.bf16.msra.mxu0 %v472_v21 }
  0x16   : > { %477 = vmatprep.subr.bf16.mxu0 %v476_v24 }
  0x19   : > { %479 = vmatpush3.bf16.msra.mxu0 %v476_v24 }
  0x1a   : > { %481 = vmatprep.subr.bf16.mxu0 %v480_v28 }
  0x1d   : > { %483 = vmatpush3.bf16.msra.mxu0 %v480_v28 }
  0x1e   : > { %485 = vmatprep.subr.bf16.mxu0 %v484_v30 }
  0x21   : > { %487 = vmatpush3.bf16.msra.mxu0 %v484_v30 }
  0x22   : > { %489 = vmatprep.subr.bf16.mxu0 %v488_v33 }
  0x25   : > { %491 = vmatpush3.bf16.msra.mxu0 %v488_v33 }
  0x9e   : > { %v206_v8 = vpop.xlane.xlu0 %205 }
  0x9f   : > { %v210_v9 = vmul.f32 0.0078125, %v206_v8 }
  0xa1   : > { %v212_v10 = vsub.f32 %v201_v0, %v210_v9 }
  0xa2   : > { %v208_v11 = vpop.xlane.xlu0 %207 }
  0xa3   : > { %v211_v12 = vmul.f32 0.0078125, %v208_v11  ;;  %v214_v13 = vmul.f32 %v212_v10, %v212_v10 }
  0xa5   : > { %v213_v14 = vsub.f32 %v202_v1, %v211_v12  ;;  %216 = vadd.xlane.f32.xlu1 %v214_v13 }
  0xa7   : > { %v215_v15 = vmul.f32 %v213_v14, %v213_v14 }
  0xa9   : > { %218 = vadd.xlane.f32.xlu1 %v215_v15 }
 0x132   : > { %v217_v34 = vpop.xlane.xlu1 %216 }
 0x133   : > { %v220_v35 = vmul.f32 0.0078125, %v217_v34 }
 0x135   : > { %v222_v36 = vadd.f32 1e-05, %v220_v35 }
 0x136   : > { %v219_v37 = vpop.xlane.xlu1 %218 }
 0x137   : > { %500 = vrsqrt.f32 %v222_v36  ;;  %v221_v38 = vmul.f32 0.0078125, %v219_v37 }
 0x139   : > { %v223_v39 = vadd.f32 1e-05, %v221_v38 }
 0x13b   : > { %502 = vrsqrt.f32 %v223_v39 }
 0x141   : > { %v501_v40 = vpop.eup %500 }
 0x142   : > { %v226_v42 = vmul.f32 %v501_v40, %v212_v10 }
 0x144   : > { %v234_v44 = vmul.f32 %v403_v41, %v226_v42 }
 0x145   : > { %v503_v45 = vpop.eup %502 }
 0x146   : > { %v227_v46 = vmul.f32 %v503_v45, %v213_v14  ;;  %v242_v47 = vadd.f32 %v404_v43, %v234_v44 }
 0x148   : > { %v235_v48 = vmul.f32 %v403_v41, %v227_v46  ;;  %457 = vmatprep.mubr.f32.mxu0 %v242_v47 }
 0x14a   : > { %v243_v49 = vadd.f32 %v404_v43, %v235_v48 }
 0x14c   : > { %458 = vmatmul.mubr.f32.vlgmr.msra.gmra.mrb[0].mxu0 %v243_v49 }
 0x21f   : > { %v459_v50 = vpop.f32.mrb[0].mxu0 }
 0x220   : > { %v326_v51 = vpop.f32.mrb[1].mxu0  ;;  %337 = vst.msk [vmem:[%s199_s11 + $0x8] sm:$0xff] %vm335_vm0, %v459_v50 }
 0x221   : > { %336 = vst.msk [vmem:[%s199_s11] sm:$0xff] %vm335_vm0, %v326_v51 }
 0x222 PF: > { %s14_s15 = sadd.s32 1, %s510_s15  }
 0x223   : > { %p11_p4 = scmp.ge.s32.totalorder %s14_s15, 4  }
 0x225   :  { %13 = sbr.rel (!%p11_p4) target bundleno = 1 (0x1), region = 66 }

// kernel: _lambda_.17
= control target key start
LH: loop header
LB: loop body
LE: loop exit
PB: predicated region body
PF: predicated region fallthrough
CT: control target
= control target key end

     0   :  { %s2143_s13 = smov 0   ;;  %s2422_s0 = inlined_call_operand.vmem [shape: f32[2,1,16,64], index: 0, kind: input, shape index: {}]   ;;  %s2423_s1 = inlined_call_operand.vmem [shape: f32[64,64], index: 1, kind: input, shape index: {}]   ;;  %s2424_s2 = inlined_call_operand.vmem [shape: f32[1,64], index: 2, kind: input, shape index: {}, may-alias: {2,4,6,8}]   ;;  %s2425_s3 = inlined_call_operand.vmem [shape: f32[64,64], index: 3, kind: input, shape index: {}]   ;;  %s2426_s4 = inlined_call_operand.vmem [shape: f32[1,64], index: 4, kind: input, shape index: {}, may-alias: {2,4,6,8}]   ;;  %s2427_s5 = inlined_call_operand.vmem [shape: f32[64,64], index: 5, kind: input, shape index: {}]   ;;  %s2428_s6 = inlined_call_operand.vmem [shape: f32[1,64], index: 6, kind: input, shape index: {}, may-alias: {2,4,6,8}]   ;;  %s2429_s7 = inlined_call_operand.vmem [shape: f32[64,64], index: 7, kind: input, shape index: {}]   ;;  %s2430_s8 = inlined_call_operand.vmem [shape: f32[1,64], index: 8, kind: input, shape index: {}, may-alias: {2,4,6,8}]   ;;  %s2431_s9 = inlined_call_operand.vmem [shape: f32[4,16,16], index: 9, kind: input, shape index: {}]   ;;  %s2432_s10 = inlined_call_operand.vmem [shape: f32[2,1,16,64], index: 10, kind: output, shape index: {}]  }
   0x1 LB: > { %s1641_s14 = sadd.s32 4294967295, %s2080_s13   ;;  %p1645_p0 = scmp.ge.s32.totalorder %s2080_s13, 1  ;;  %s2080_s13 = sphi %s2143_s13, %s20_s13  }
   0x2   : > { %p312_p1 = scmp.lt.s32.totalorder %s2080_s13, 3 }
   0x4   : > { %p313_p2 = pnand %p1645_p0, %p312_p1 }
   0x5   : > { %v459_v0 = vld [vmem:[%s2425_s3] sm:$0xff] (!%p313_p2)  ;;  %v460_v1 = vld [vmem:[%s2425_s3 + $0x8] sm:$0xff] (!%p313_p2)  ;;  %v461_v2 = vld [vmem:[%s2425_s3 + $0x10] sm:$0xff] (!%p313_p2)  ;;  %p350_p3 = scmp.lt.s32.totalorder (!%p313_p2), %s1641_s14, 1  ;;  %vm377_vm0 = vcmask (!%p313_p2), 523264   ;;  %vm647_vm1 = vcmask (!%p313_p2), 130048  }
   0x6   : > { %316 = sbr.rel (%p313_p2) target bundleno = 2439 (0x987), region = 60  ;;  %v1910_v3 = vpack.c.bf16 (!%p313_p2), %v460_v1, %v459_v0  ;;  %v462_v4 = vld [vmem:[%s2425_s3 + $0x18] sm:$0xff] (!%p313_p2)  ;;  %v362_v5 = vld [vmem:[%s2423_s1] sm:$0xff] (!%p313_p2)  ;;  %v363_v6 = vld [vmem:[%s2423_s1 + $0x8] sm:$0xff] (!%p313_p2)  ;;  %s2082_s19 = smov (!%p313_p2), 96   ;;  %vm1482_vm3 = vcmask (!%p313_p2), 261120  }
   0x7   : > { %v1914_v7 = vpack.c.bf16 (!%p313_p2), %v462_v4, %v461_v2  ;;  %v1894_v8 = vpack.c.bf16 (!%p313_p2), %v363_v6, %v362_v5  ;;  %v463_v9 = vld [vmem:[%s2425_s3 + $0x20] sm:$0xff] (!%p313_p2)  ;;  %v464_v10 = vld [vmem:[%s2425_s3 + $0x28] sm:$0xff] (!%p313_p2)  ;;  %v364_v11 = vld [vmem:[%s2423_s1 + $0x10] sm:$0xff] (!%p313_p2)  ;;  %s2083_s20 = smov (!%p313_p2), 112   ;;  %s2084_s11 = smov (!%p313_p2), 80   ;;  %vm1485_vm4 = vcmask (!%p313_p2), 392192  }
   0x8   : > { %1911 = vmatprep.subr.bf16.mxu1 (!%p313_p2), %v1910_v3  ;;  %v365_v12 = vld [vmem:[%s2423_s1 + $0x18] sm:$0xff] (!%p313_p2)  ;;  %v366_v14 = vld [vmem:[%s2423_s1 + $0x20] sm:$0xff] (!%p313_p2)  ;;  %v367_v15 = vld [vmem:[%s2423_s1 + $0x28] sm:$0xff] (!%p313_p2)  ;;  %v1918_v16 = vpack.c.bf16 (!%p313_p2), %v464_v10, %v463_v9  ;;  %s2087_s25 = smov (!%p313_p2), 48  }
   0x9   : > { %1913 = vmatpush3.bf16.msra.mxu1 (!%p313_p2), %v1910_v3  ;;  %1895 = vmatprep.subr.bf16.mxu0 (!%p313_p2), %v1894_v8  ;;  %v1898_v13 = vpack.c.bf16 (!%p313_p2), %v365_v12, %v364_v11  ;;  %v465_v17 = vld [vmem:[%s2425_s3 + $0x30] sm:$0xff] (!%p313_p2)  ;;  %v466_v18 = vld [vmem:[%s2425_s3 + $0x38] sm:$0xff] (!%p313_p2)  ;;  %v1902_v20 = vpack.c.bf16 (!%p313_p2), %v367_v15, %v366_v14  ;;  %v549_v26 = vld [vmem:[%s2427_s5] sm:$0xff] (!%p313_p2) }
   0xa   : > { %1915 = vmatprep.subr.bf16.mxu1 (!%p313_p2), %v1914_v7  ;;  %1897 = vmatpush3.bf16.msra.mxu0 (!%p313_p2), %v1894_v8  ;;  %v368_v21 = vld [vmem:[%s2423_s1 + $0x30] sm:$0xff] (!%p313_p2)  ;;  %v369_v22 = vld [vmem:[%s2423_s1 + $0x38] sm:$0xff] (!%p313_p2)  ;;  %v1922_v23 = vpack.c.bf16 (!%p313_p2), %v466_v18, %v465_v17  ;;  %v550_v27 = vld [vmem:[%s2427_s5 + $0x8] sm:$0xff] (!%p313_p2) }
   0xb   : > { %1899 = vmatprep.subr.bf16.mxu0 (!%p313_p2), %v1898_v13  ;;  %v1906_v24 = vpack.c.bf16 (!%p313_p2), %v369_v22, %v368_v21  ;;  %v551_v28 = vld [vmem:[%s2427_s5 + $0x10] sm:$0xff] (!%p313_p2)  ;;  %v1926_v29 = vpack.c.bf16 (!%p313_p2), %v550_v27, %v549_v26  ;;  %v552_v30 = vld [vmem:[%s2427_s5 + $0x18] sm:$0xff] (!%p313_p2)  ;;  %v1653_v31 = vld [vmem:[%s2426_s4] ss:$0 sm:$0xff] (!%p313_p2) }
   0xc   : > { %v1930_v32 = vpack.c.bf16 (!%p313_p2), %v552_v30, %v551_v28  ;;  %v553_v33 = vld [vmem:[%s2427_s5 + $0x20] sm:$0xff] (!%p313_p2)  ;;  %v554_v34 = vld [vmem:[%s2427_s5 + $0x28] sm:$0xff] (!%p313_p2)  ;;  %v555_v43 = vld [vmem:[%s2427_s5 + $0x30] sm:$0xff] (!%p313_p2) }
   0xd   : > { %s2436_s14 = smov (!%p350_p3, %s1641_s14), 1  ;;  %1917 = vmatpush3.bf16.msra.mxu1 %v1914_v7  ;;  %v1650_v36 = vld [vmem:[%s2424_s2] ss:$0 sm:$0xff]  ;;  %v1934_v40 = vpack.c.bf16 %v554_v34, %v553_v33  ;;  %v556_v44 = vld [vmem:[%s2427_s5 + $0x38] sm:$0xff]  ;;  %vm2244_vm2 = vmpackc.low %vm647_vm1, %vm647_vm1 }
   0xe   : > { %s1688_s17 = sshll.u32 %s2436_s14, 4  ;;  %1919 = vmatprep.subr.bf16.mxu1 %v1918_v16  ;;  %1901 = vmatpush3.bf16.msra.mxu0 %v1898_v13  ;;  %v1938_v49 = vpack.c.bf16 %v556_v44, %v555_v43  ;;  %v639_v53 = vld [vmem:[%s2431_s9] sm:$0xff]  ;;  %v640_v56 = vld [vmem:[%s2431_s9 + $0x8] sm:$0xff]  ;;  %v646_v45 = vld [vmem:[%s2431_s9 + $0x38] sm:$0xff] }
   0xf   : > { %s354_s24 = scalar_lea.vmem %s2422_s0, %s1688_s17  ;;  %1903 = vmatprep.subr.bf16.mxu0 %v1902_v20  ;;  %v1656_v62 = vld [vmem:[%s2428_s6] ss:$0 sm:$0xff]  ;;  %s359_s29 = scalar_lea.vmem %s2432_s10, %s1688_s17 }
  0x10   : > { %v360_v19 = vld [vmem:[%s354_s24] sm:$0xff]  ;;  %v361_v25 = vld [vmem:[%s354_s24 + $0x8] sm:$0xff]  ;;  %s2085_s24 = smov 32  }
  0x11   : > { %1797 = vmatprep.mubr.msk.f32.mxu1 %vm377_vm0, %v360_v19  ;;  %1778 = vmatprep.mubr.msk.f32.mxu0 %vm377_vm0, %v360_v19 }
  0x12   : > { %1921 = vmatpush3.bf16.msra.mxu1 %v1918_v16  ;;  %1905 = vmatpush3.bf16.msra.mxu0 %v1902_v20 }
  0x13   : > { %1923 = vmatprep.subr.bf16.mxu1 %v1922_v23  ;;  %1907 = vmatprep.subr.bf16.mxu0 %v1906_v24 }
  0x16   : > { %1925 = vmatpush3.bf16.msra.mxu1 %v1922_v23  ;;  %1909 = vmatpush3.bf16.msra.mxu0 %v1906_v24 }
  0x17   : > { %1927 = vmatprep.subr.bf16.mxu0 %v1926_v29 }
  0x19   : > { %1798 = vmatmul.mubr.msk.f32.vlgmr.msra.gmra.mrb[0].mxu1 %vm377_vm0, %v361_v25  ;;  %1779 = vmatmul.mubr.msk.f32.vlgmr.msra.gmra.mrb[0].mxu0 %vm377_vm0, %v361_v25 }
  0x1a   : > { %1816 = vmatprep.mubr.msk.f32.mxu0 %vm377_vm0, %v360_v19  ;;  %1929 = vmatpush3.bf16.msra.mxu0 %v1926_v29 }
  0x1b   : > { %1931 = vmatprep.subr.bf16.mxu0 %v1930_v32 }
  0x1e   : > { %1933 = vmatpush3.bf16.msra.mxu0 %v1930_v32 }
  0x1f   : > { %1935 = vmatprep.subr.bf16.mxu0 %v1934_v40 }
  0x22   : > { %1937 = vmatpush3.bf16.msra.mxu0 %v1934_v40 }
  0x23   : > { %1939 = vmatprep.subr.bf16.mxu0 %v1938_v49 }
  0x26   : > { %1941 = vmatpush3.bf16.msra.mxu0 %v1938_v49  ;;  %v642_v49 = vld [vmem:[%s2431_s9 + $0x18] sm:$0xff] }
  0x29   : > { %1817 = vmatmul.mubr.msk.f32.vlgmr.msra.gmra.mrb[2].mxu0 %vm377_vm0, %v361_v25 }
  0xec   : > { %v1799_v35 = vpop.f32.mrb[0].mxu1  ;;  %v1780_v39 = vpop.f32.mrb[0].mxu0 }
  0xed   : > { %v546_v37 = vadd.f32 %v1799_v35, %v1653_v31  ;;  %v540_v38 = vpop.f32.mrb[1].mxu1  ;;  %v450_v42 = vpop.f32.mrb[1].mxu0  ;;  %v2262_v50 = vadd.f32 %v1780_v39, %v1650_v36  ;;  %v643_v39 = vld [vmem:[%s2431_s9 + $0x20] sm:$0xff] }
  0xee   : > { %v541_v41 = vadd.f32 %v1653_v31, %v540_v38  ;;  %v2248_v46 = vadd.f32 %v1650_v36, %v450_v42  ;;  %v644_v36 = vld [vmem:[%s2431_s9 + $0x28] sm:$0xff] }
  0xf0   : > { %v2250_v47 = vpack.i.bf16 %v546_v37, %v541_v41  ;;  %v1942_v48 = vpack.c.bf16 %v546_v37, %v541_v41  ;;  %1823 = vmatprep.mubr.msk.f32.mxu1 %vm647_vm1, %v2248_v46 }
  0xf2   : > { %2018 = vrot.lane.b32.xlu1 %v2250_v47, %s2082_s19  ;;  %1944 = vmatprep.subr.msk.bf16.mxu1 %vm2244_vm2, %v1942_v48 }
  0xf3   : > { %1947 = vmatpush3.bf16.xpose.msk.msra.mxu1 %vm2244_vm2, %v1942_v48 }
  0xf6   : > { %842 = vrot.lane.b32.xlu1 %v2248_v46, %s2083_s20 }
  0xfa   : > { %1824 = vmatmul.mubr.msk.f32.vlgmr.msra.gmra.mrb[2].mxu1 %vm647_vm1, %v2262_v50 }
  0xfc   : > { %v1818_v61 = vpop.f32.mrb[2].mxu0 }
  0xfd   : > { %v630_v63 = vpop.f32.mrb[3].mxu0  ;;  %v2278_v0 = vadd.f32 %v1818_v61, %v1656_v62 }
  0xfe   : > { %v2280_v1 = vadd.f32 %v1656_v62, %v630_v63 }
 0x100   : > { %v1948_v2 = vpack.c.bf16 %v2278_v0, %v2280_v1 }
 0x102   : > { %1949 = vmatprep.subr.bf16.mxu1 %v1948_v2 }
 0x103   : > { %1951 = vmatpush3.bf16.msra.mxu1 %v1948_v2 }
 0x164   : > { %v2019_v17 = vpop.permute.xlu1 %2018 }
 0x165   : > { %v2021_v23 = vunpack.i.h.bf16 %v2019_v17  ;;  %v2020_v24 = vunpack.i.l.bf16 %v2019_v17 }
 0x167   : > { %v1962_v27 = vpack.c.bf16 %v2021_v23, %v2020_v24 }
 0x168   : > { %v843_v18 = vpop.permute.xlu1 %842 }
 0x1cd   : > { %v1825_v51 = vpop.f32.mrb[2].mxu1 }
 0x1ce   : > { %v726_v52 = vpop.f32.mrb[3].mxu1  ;;  %v736_v54 = vmul.f32 0.25, %v1825_v51 }
 0x1cf   : > { %v735_v55 = vmul.f32 0.25, %v726_v52 }
 0x1d0   : > { %v738_v59 = vadd.f32 %v736_v54, %v640_v56 }
 0x1d1   : > { %v737_v57 = vadd.f32 %v735_v55, %v639_v53 }
 0x1d2   : > { %v742_v60 = vsel %vm647_vm1, %v738_v59, -inf }
 0x1d3   : > { %v739_v58 = vsel %vm647_vm1, %v737_v57, -inf }
 0x1d4   : > { %740 = vmax.xlane.f32.xlu0 %v739_v58 }
 0x1d8   : > { %743 = vmax.xlane.f32.xlu0 %v742_v60  ;;  %v2334_v60 = vpack.i.bf16 %v2278_v0, %v2280_v1 }
 0x1ee   : > { %2013 = vrot.lane.b32.xlu0 %v2250_v47, %s2083_s20 }
 0x1f2   : > { %1048 = vrot.lane.b32.xlu0 %v2248_v46, %s2082_s19 }
 0x261   : > { %v741_v3 = vpop.xlane.xlu0 %740 }
 0x262   : > { %v745_v4 = vsub.f32 %v737_v57, %v741_v3 }
 0x264   : > { %v747_v7 = vmul.f32 1.442695, %v745_v4 }
 0x265   : > { %v744_v5 = vpop.xlane.xlu0 %743 }
 0x266   : > { %v746_v6 = vsub.f32 %v738_v59, %v744_v5 }
 0x268   : > { %v749_v8 = vmul.f32 1.442695, %v746_v6  ;;  %v641_v6 = vld [vmem:[%s2431_s9 + $0x10] sm:$0xff] }
 0x269   : > { %v2014_v9 = vpop.permute.xlu0 %2013 }
 0x26a   : > { %2042 = vpow2.f32 %v749_v8  ;;  %v2016_v10 = vunpack.i.h.bf16 %v2014_v9  ;;  %v2015_v11 = vunpack.i.l.bf16 %v2014_v9 }
 0x26b   : > { %2044 = vpow2.f32 %v747_v7 }
 0x26c   : > { %v1952_v12 = vpack.c.bf16 %v2016_v10, %v2015_v11 }
 0x26d   : > { %v1049_v29 = vpop.permute.xlu0 %1048 }
 0x26e   : > { %1954 = vmatprep.subr.msk.bf16.mxu1 %vm2244_vm2, %v1952_v12 }
 0x274   : > { %v2043_v13 = vpop.eup %2042 }
 0x275   : > { %v754_v14 = vsel %vm647_vm1, %v2043_v13, 0.0  ;;  %v2045_v15 = vpop.eup %2044 }
 0x276   : > { %755 = vadd.xlane.f32.xlu1 %v754_v14  ;;  %v751_v16 = vsel %vm647_vm1, %v2045_v15, 0.0 }
 0x27a   : > { %752 = vadd.xlane.f32.xlu1 %v751_v16 }
 0x28b   : > { %844 = vrot.lane.b32.xlu1 %v2262_v50, %s2083_s20 }
 0x28f   : > { %1050 = vrot.lane.b32.xlu1 %v2262_v50, %s2082_s19 }
 0x303   : > { %v756_v19 = vpop.xlane.xlu1 %755 }
 0x304   : > { %2046 = vrcp.f32 %v756_v19 }
 0x307   : > { %v753_v20 = vpop.xlane.xlu1 %752 }
 0x308   : > { %2048 = vrcp.f32 %v753_v20 }
 0x30b   : > { %v845_v28 = vpop.permute.xlu1 %844 }
 0x30e   : > { %v2047_v21 = vpop.eup %2046 }
 0x30f   : > { %v760_v26 = vmul.f32 %v2047_v21, %v2043_v13  ;;  %v1051_v30 = vpop.permute.xlu1 %1050 }
 0x312   : > { %v2049_v22 = vpop.eup %2048 }
 0x313   : > { %v759_v25 = vmul.f32 %v2049_v22, %v2045_v15 }
 0x315   : > { %1830 = vmatprep.mubr.msk.f32.mxu1 %vm647_vm1, %v759_v25 }
 0x316   : > { %1831 = vmatmul.mubr.msk.f32.vlgmr.msra.gmra.mrb[4].mxu1 %vm647_vm1, %v760_v26 }
 0x317   : > { %1957 = vmatpush3.bf16.xpose.msk.msra.mxu1 %vm2244_vm2, %v1952_v12  ;;  %1837 = vmatprep.mubr.msk.f32.mxu1 %vm647_vm1, %v843_v18 }
 0x318   : > { %1964 = vmatprep.subr.msk.bf16.mxu1 %vm2244_vm2, %v1962_v27 }
 0x31e   : > { %1838 = vmatmul.mubr.msk.f32.vlgmr.msra.gmra.mrb[6].mxu1 %vm647_vm1, %v845_v28  ;;  %v645_v28 = vld [vmem:[%s2431_s9 + $0x30] sm:$0xff] }
 0x31f   : > { %1967 = vmatpush3.bf16.xpose.msk.msra.mxu1 %vm2244_vm2, %v1962_v27  ;;  %1851 = vmatprep.mubr.msk.f32.mxu1 %vm647_vm1, %v1049_v29 }
 0x326   : > { %1852 = vmatmul.mubr.msk.f32.vlgmr.msra.gmra.mrb[8].mxu1 %vm647_vm1, %v1051_v30 }
 0x3e9   : > { %v2308_v31 = vpop.f32.mrb[4].mxu1 }
 0x3ea   : > { %v2310_v32 = vpop.f32.mrb[5].mxu1 }
 0x3f1   : > { %v1839_v33 = vpop.f32.mrb[6].mxu1 }
 0x3f2   : > { %v924_v34 = vpop.f32.mrb[7].mxu1  ;;  %v934_v48 = vmul.f32 0.25, %v1839_v33 }
 0x3f3   : > { %v933_v5 = vmul.f32 0.25, %v924_v34 }
 0x3f4   : > { %v936_v51 = vadd.f32 %v934_v48, %v642_v49 }
 0x3f5   : > { %v935_v7 = vadd.f32 %v933_v5, %v641_v6 }
 0x3f6   : > { %v940_v52 = vsel %vm647_vm1, %v936_v51, -inf }
 0x3f7   : > { %v937_v8 = vsel %vm647_vm1, %v935_v7, -inf }
 0x3f9   : > { %v1853_v35 = vpop.f32.mrb[8].mxu1 }
 0x3fa   : > { %v1140_v37 = vmul.f32 0.25, %v1853_v35  ;;  %v1130_v38 = vpop.f32.mrb[9].mxu1 }
 0x3fb   : > { %v1139_v40 = vmul.f32 0.25, %v1130_v38 }
 0x3fc   : > { %v1142_v41 = vadd.f32 %v1140_v37, %v644_v36 }
 0x3fd   : > { %v1141_v42 = vadd.f32 %v1139_v40, %v643_v39 }
 0x3fe   : > { %v1146_v43 = vsel %vm647_vm1, %v1142_v41, -inf }
 0x3ff   : > { %1147 = vmax.xlane.f32.xlu1 %v1146_v43  ;;  %v1143_v44 = vsel %vm647_vm1, %v1141_v42, -inf }
 0x400   : > { %1144 = vmax.xlane.f32.xlu0 %v1143_v44 }
 0x410   : > { %2028 = vrot.lane.b32.xlu1 %v2250_v47, %s2084_s11 }
 0x414   : > { %1252 = vrot.lane.b32.xlu1 %v2248_v46, %s2084_s11 }
 0x418   : > { %1254 = vrot.lane.b32.xlu1 %v2262_v50, %s2084_s11 }
 0x43c   : > { %941 = vmax.xlane.f32.xlu1 %v940_v52 }
 0x48c   : > { %v1148_v53 = vpop.xlane.xlu1 %1147 }
 0x48d   : > { %v1150_v54 = vsub.f32 %v1142_v41, %v1148_v53  ;;  %v1145_v55 = vpop.xlane.xlu0 %1144 }
 0x48e   : > { %v1149_v56 = vsub.f32 %v1141_v42, %v1145_v55 }
 0x48f   : > { %v1153_v47 = vmul.f32 1.442695, %v1150_v54 }
 0x490   : > { %v1151_v57 = vmul.f32 1.442695, %v1149_v56  ;;  %v2029_v61 = vpop.permute.xlu1 %2028 }
 0x491   : > { %2050 = vpow2.f32 %v1153_v47  ;;  %v2031_v12 = vunpack.i.h.bf16 %v2029_v61  ;;  %v2030_v13 = vunpack.i.l.bf16 %v2029_v61 }
 0x492   : > { %2052 = vpow2.f32 %v1151_v57 }
 0x493   : > { %v1972_v17 = vpack.c.bf16 %v2031_v12, %v2030_v13  ;;  %v1492_v13 = vld [vmem:[%s2429_s7 + $0x20] sm:$0xff] }
 0x494   : > { %v1253_v62 = vpop.permute.xlu1 %1252 }
 0x498   : > { %v1255_v63 = vpop.permute.xlu1 %1254 }
 0x49b   : > { %v2051_v46 = vpop.eup %2050 }
 0x49c   : > { %v1158_v50 = vsel %vm647_vm1, %v2051_v46, 0.0  ;;  %v2053_v58 = vpop.eup %2052 }
 0x49d   : > { %1159 = vadd.xlane.f32.xlu0 %v1158_v50  ;;  %v1155_v59 = vsel %vm647_vm1, %v2053_v58, 0.0 }
 0x4a1   : > { %1156 = vadd.xlane.f32.xlu0 %v1155_v59 }
 0x4b7   : > { %2023 = vrot.lane.b32.xlu0 %v2334_v60, %s2082_s19 }
 0x4c9   : > { %v942_v2 = vpop.xlane.xlu1 %941 }
 0x4ca   : > { %v944_v3 = vsub.f32 %v936_v51, %v942_v2 }
 0x4cc   : > { %v947_v4 = vmul.f32 1.442695, %v944_v3 }
 0x4ce   : > { %2054 = vpow2.f32 %v947_v4 }
 0x4d6   : > { %938 = vmax.xlane.f32.xlu0 %v937_v8 }
 0x4d8   : > { %v2342_v0 = vpop.eup %2054 }
 0x4d9   : > { %v952_v1 = vsel %vm647_vm1, %v2342_v0, 0.0 }
 0x4da   : > { %953 = vadd.xlane.f32.xlu1 %v952_v1  ;;  %v1488_v1 = vld [vmem:[%s2429_s7] sm:$0xff] }
 0x52a   : > { %v1160_v9 = vpop.xlane.xlu0 %1159 }
 0x52b   : > { %2056 = vrcp.f32 %v1160_v9 }
 0x52e   : > { %v1157_v10 = vpop.xlane.xlu0 %1156 }
 0x52f   : > { %2058 = vrcp.f32 %v1157_v10  ;;  %v1490_v10 = vld [vmem:[%s2429_s7 + $0x10] sm:$0xff] }
 0x532   : > { %v2024_v11 = vpop.permute.xlu0 %2023 }
 0x533   : > { %v2026_v14 = vunpack.i.h.bf16 %v2024_v11  ;;  %v2025_v15 = vunpack.i.l.bf16 %v2024_v11  ;;  %v1491_v11 = vld [vmem:[%s2429_s7 + $0x18] sm:$0xff] }
 0x534   : > { %v1986_v12 = vpack.c.bf16 %v1491_v11, %v1490_v10 }
 0x535   : > { %v1968_v16 = vpack.c.bf16 %v2026_v14, %v2025_v15  ;;  %v2057_v18 = vpop.eup %2056  ;;  %v1493_v14 = vld [vmem:[%s2429_s7 + $0x28] sm:$0xff] }
 0x536   : > { %v1164_v21 = vmul.f32 %v2057_v18, %v2051_v46  ;;  %v1990_v15 = vpack.c.bf16 %v1493_v14, %v1492_v13 }
 0x537   : > { %1969 = vmatprep.subr.bf16.mxu1 %v1968_v16 }
 0x538   : > { %1971 = vmatpush3.bf16.msra.mxu1 %v1968_v16  ;;  %v1494_v16 = vld [vmem:[%s2429_s7 + $0x30] sm:$0xff] }
 0x539   : > { %v2059_v19 = vpop.eup %2058  ;;  %1974 = vmatprep.subr.msk.bf16.mxu1 %vm2244_vm2, %v1972_v17 }
 0x53a   : > { %v1163_v20 = vmul.f32 %v2059_v19, %v2053_v58 }
 0x53c   : > { %1858 = vmatprep.mubr.msk.f32.mxu1 %vm647_vm1, %v1163_v20 }
 0x53d   : > { %1859 = vmatmul.mubr.msk.f32.vlgmr.msra.gmra.mrb[10].mxu1 %vm647_vm1, %v1164_v21 }
 0x53e   : > { %1865 = vmatprep.mubr.msk.f32.mxu1 %vm647_vm1, %v1253_v62 }
 0x541   : > { %1977 = vmatpush3.bf16.xpose.msk.msra.mxu1 %vm2244_vm2, %v1972_v17  ;;  %v1495_v17 = vld [vmem:[%s2429_s7 + $0x38] sm:$0xff] }
 0x542   : > { %v1994_v18 = vpack.c.bf16 %v1495_v17, %v1494_v16 }
 0x548   : > { %1866 = vmatmul.mubr.msk.f32.vlgmr.msra.gmra.mrb[12].mxu1 %vm647_vm1, %v1255_v63 }
 0x563   : > { %v939_v23 = vpop.xlane.xlu0 %938 }
 0x564   : > { %v943_v25 = vsub.f32 %v935_v7, %v939_v23 }
 0x566   : > { %v945_v26 = vmul.f32 1.442695, %v943_v25 }
 0x567   : > { %v954_v47 = vpop.xlane.xlu1 %953 }
 0x568   : > { %2060 = vpow2.f32 %v945_v26 }
 0x572   : > { %v2061_v38 = vpop.eup %2060 }
 0x573   : > { %v949_v39 = vsel %vm647_vm1, %v2061_v38, 0.0 }
 0x610   : > { %v2354_v22 = vpop.f32.mrb[10].mxu1 }
 0x611   : > { %v1243_v24 = vpop.f32.mrb[11].mxu1 }
 0x61b   : > { %v1867_v27 = vpop.f32.mrb[12].mxu1 }
 0x61c   : > { %v1334_v29 = vpop.f32.mrb[13].mxu1  ;;  %v1344_v30 = vmul.f32 0.25, %v1867_v27 }
 0x61d   : > { %v1343_v33 = vmul.f32 0.25, %v1334_v29 }
 0x61e   : > { %v1346_v36 = vadd.f32 %v1344_v30, %v646_v45 }
 0x61f   : > { %v1345_v34 = vadd.f32 %v1343_v33, %v645_v28 }
 0x620   : > { %v1350_v37 = vsel %vm647_vm1, %v1346_v36, -inf }
 0x621   : > { %v1347_v35 = vsel %vm647_vm1, %v1345_v34, -inf }
 0x622   : > { %1348 = vmax.xlane.f32.xlu0 %v1347_v35 }
 0x626   : > { %1351 = vmax.xlane.f32.xlu0 %v1350_v37 }
 0x62a   : > { %950 = vadd.xlane.f32.xlu0 %v949_v39 }
 0x6af   : > { %v1349_v40 = vpop.xlane.xlu0 %1348 }
 0x6b0   : > { %v1353_v41 = vsub.f32 %v1345_v34, %v1349_v40 }
 0x6b2   : > { %v1355_v42 = vmul.f32 1.442695, %v1353_v41 }
 0x6b3   : > { %v1352_v43 = vpop.xlane.xlu0 %1351 }
 0x6b4   : > { %2062 = vpow2.f32 %v1355_v42  ;;  %v1354_v44 = vsub.f32 %v1346_v36, %v1352_v43 }
 0x6b6   : > { %v1357_v48 = vmul.f32 1.442695, %v1354_v44 }
 0x6b7   : > { %v951_v49 = vpop.xlane.xlu0 %950 }
 0x6b8   : > { %2064 = vpow2.f32 %v1357_v48 }
 0x6b9   : > { %2066 = vrcp.f32 %v951_v49 }
 0x6ba   : > { %2068 = vrcp.f32 %v954_v47 }
 0x6be   : > { %v2063_v51 = vpop.eup %2062 }
 0x6bf   : > { %v1359_v52 = vsel %vm647_vm1, %v2063_v51, 0.0 }
 0x6c0   : > { %1360 = vadd.xlane.f32.xlu0 %v1359_v52 }
 0x6c2   : > { %v2065_v53 = vpop.eup %2064 }
 0x6c3   : > { %v2067_v54 = vpop.eup %2066  ;;  %v1362_v55 = vsel %vm647_vm1, %v2065_v53, 0.0 }
 0x6c4   : > { %1363 = vadd.xlane.f32.xlu1 %v1362_v55  ;;  %v957_v56 = vmul.f32 %v2067_v54, %v2061_v38  ;;  %v2069_v62 = vpop.eup %2068 }
 0x6c5   : > { %v958_v4 = vmul.f32 %v2069_v62, %v2342_v0  ;;  %v1489_v0 = vld [vmem:[%s2429_s7 + $0x8] sm:$0xff] }
 0x6c6   : > { %1844 = vmatprep.mubr.msk.f32.mxu0 %vm647_vm1, %v957_v56  ;;  %v1982_v9 = vpack.c.bf16 %v1489_v0, %v1488_v1 }
 0x6d5   : > { %2038 = vrot.lane.b32.xlu1 %v2334_v60, %s2084_s11 }
 0x6d6   : > { %2033 = vrot.lane.b32.xlu0 %v2334_v60, %s2083_s20  ;;  %s2086_s20 = smov 16  }
 0x6da   : > { %1466 = vrot.lane.b32.xlu0 %v1243_v24, %s2085_s24 }
 0x74d   : > { %v1361_v57 = vpop.xlane.xlu0 %1360 }
 0x74e   : > { %2070 = vrcp.f32 %v1361_v57 }
 0x751   : > { %v1364_v46 = vpop.xlane.xlu1 %1363  ;;  %v2034_v50 = vpop.permute.xlu0 %2033 }
 0x752   : > { %2072 = vrcp.f32 %v1364_v46  ;;  %v2036_v58 = vunpack.i.h.bf16 %v2034_v50  ;;  %v2035_v59 = vunpack.i.l.bf16 %v2034_v50 }
 0x754   : > { %v1958_v61 = vpack.c.bf16 %v2036_v58, %v2035_v59 }
 0x755   : > { %v2039_v63 = vpop.permute.xlu1 %2038  ;;  %v1467_v25 = vpop.permute.xlu0 %1466 }
 0x756   : > { %v2041_v2 = vunpack.i.h.bf16 %v2039_v63  ;;  %v2040_v3 = vunpack.i.l.bf16 %v2039_v63  ;;  %1959 = vmatprep.subr.bf16.mxu0 %v1958_v61 }
 0x757   : > { %1961 = vmatpush3.bf16.msra.mxu0 %v1958_v61 }
 0x758   : > { %v2071_v60 = vpop.eup %2070  ;;  %v1978_v5 = vpack.c.bf16 %v2041_v2, %v2040_v3 }
 0x759   : > { %v1367_v6 = vmul.f32 %v2071_v60, %v2063_v51 }
 0x75a   : > { %1845 = vmatmul.mubr.msk.f32.vlgmr.msra.gmra.mrb[4].mxu0 %vm647_vm1, %v958_v4  ;;  %1979 = vmatprep.subr.bf16.mxu0 %v1978_v5 }
 0x75b   : > { %1981 = vmatpush3.bf16.msra.mxu0 %v1978_v5  ;;  %1872 = vmatprep.mubr.msk.f32.mxu0 %vm647_vm1, %v1367_v6 }
 0x75c   : > { %v2073_v7 = vpop.eup %2072  ;;  %1983 = vmatprep.subr.bf16.mxu0 %v1982_v9 }
 0x75d   : > { %v1368_v8 = vmul.f32 %v2073_v7, %v2065_v53 }
 0x75f   : > { %1873 = vmatmul.mubr.msk.f32.vlgmr.msra.gmra.mrb[6].mxu0 %vm647_vm1, %v1368_v8 }
 0x760   : > { %1985 = vmatpush3.bf16.msra.mxu0 %v1982_v9 }
 0x761   : > { %1987 = vmatprep.subr.bf16.mxu0 %v1986_v12 }
 0x764   : > { %1989 = vmatpush3.bf16.msra.mxu0 %v1986_v12 }
 0x765   : > { %1991 = vmatprep.subr.bf16.mxu0 %v1990_v15 }
 0x768   : > { %1993 = vmatpush3.bf16.msra.mxu0 %v1990_v15 }
 0x769   : > { %1995 = vmatprep.subr.bf16.mxu0 %v1994_v18 }
 0x76c   : > { %1997 = vmatpush3.bf16.msra.mxu0 %v1994_v18 }
 0x82d   : > { %v1846_v19 = vpop.f32.mrb[4].mxu0 }
 0x82e   : > { %v1039_v20 = vpop.f32.mrb[5].mxu0 }
 0x82f   : > { %1458 = vrot.lane.b32.xlu1 %v1039_v20, %s2086_s20 }
 0x832   : > { %v1874_v21 = vpop.f32.mrb[6].mxu0 }
 0x833   : > { %1460 = vrot.lane.b32.xlu1 %v1846_v19, %s2086_s20  ;;  %v1447_v23 = vpop.f32.mrb[7].mxu0 }
 0x834   : > { %1474 = vrot.lane.b32.xlu0 %v1447_v23, %s2087_s25 }
 0x837   : > { %1468 = vrot.lane.b32.xlu1 %v2354_v22, %s2085_s24 }
 0x83b   : > { %1476 = vrot.lane.b32.xlu1 %v1874_v21, %s2087_s25 }
 0x8a1   : > { %v1459_v24 = vpop.permute.xlu1 %1458 }
 0x8a2   : > { %v1480_v26 = vsel %vm647_vm1, %v2310_v32, %v1459_v24  ;;  %v1683_v32 = vld [vmem:[%s2430_s8] ss:$0 sm:$0xff] }
 0x8a3   : > { %v1483_v28 = vsel %vm1482_vm3, %v1480_v26, %v1467_v25 }
 0x8a5   : > { %v1461_v27 = vpop.permute.xlu1 %1460 }
 0x8a6   : > { %v1475_v29 = vpop.permute.xlu0 %1474  ;;  %v1481_v45 = vsel %vm647_vm1, %v2308_v31, %v1461_v27 }
 0x8a7   : > { %v1486_v30 = vsel %vm1485_vm4, %v1483_v28, %v1475_v29 }
 0x8a8   : > { %1891 = vmatprep.mubr.msk.f32.mxu0 %vm377_vm0, %v1486_v30 }
 0x8a9   : > { %v1469_v33 = vpop.permute.xlu1 %1468 }
 0x8aa   : > { %v1484_v22 = vsel %vm1482_vm3, %v1481_v45, %v1469_v33 }
 0x8ad   : > { %v1477_v34 = vpop.permute.xlu1 %1476 }
 0x8ae   : > { %v1487_v35 = vsel %vm1485_vm4, %v1484_v22, %v1477_v34 }
 0x8af   : > { %1892 = vmatmul.mubr.msk.f32.vlgmr.msra.gmra.mrb[8].mxu0 %vm377_vm0, %v1487_v35 }
 0x982   : > { %v1893_v36 = vpop.f32.mrb[8].mxu0 }
 0x983   : > { %v1581_v37 = vadd.f32 %v1893_v36, %v1683_v32  ;;  %v1575_v38 = vpop.f32.mrb[9].mxu0 }
 0x984   : > { %v1576_v39 = vadd.f32 %v1683_v32, %v1575_v38 }
 0x985   : > { %1585 = vst.msk [vmem:[%s359_s29 + $0x8] sm:$0xff] %vm377_vm0, %v1581_v37 }
 0x986   : > { %1584 = vst.msk [vmem:[%s359_s29] sm:$0xff] %vm377_vm0, %v1576_v39 }
 0x987 PF: > { %s20_s13 = sadd.s32 1, %s2080_s13  }
 0x988   : > { %p17_p4 = scmp.ge.s32.totalorder %s20_s13, 4  }
 0x98a   :  { %19 = sbr.rel (!%p17_p4) target bundleno = 1 (0x1), region = 90 }

// kernel: _lambda_.18
= control target key start
LH: loop header
LB: loop body
LE: loop exit
PB: predicated region body
PF: predicated region fallthrough
CT: control target
= control target key end

     0   :  { %s925_s27 = smov 0   ;;  %s1052_s0 = inlined_call_operand.vmem [shape: f32[32,64], index: 0, kind: input, shape index: {}]   ;;  %s1053_s1 = inlined_call_operand.vmem [shape: f32[32,64], index: 1, kind: input, shape index: {}]   ;;  %s1054_s2 = inlined_call_operand.vmem [shape: f32[1,64], index: 2, kind: input, shape index: {}]   ;;  %s1055_s3 = inlined_call_operand.vmem [shape: f32[1,64], index: 3, kind: input, shape index: {}, may-alias: {3,7}]   ;;  %s1056_s4 = inlined_call_operand.vmem [shape: f32[64,128], index: 4, kind: input, shape index: {}]   ;;  %s1057_s5 = inlined_call_operand.vmem [shape: f32[1,128], index: 5, kind: input, shape index: {}]   ;;  %s1058_s6 = inlined_call_operand.vmem [shape: f32[128,64], index: 6, kind: input, shape index: {}]   ;;  %s1059_s7 = inlined_call_operand.vmem [shape: f32[1,64], index: 7, kind: input, shape index: {}, may-alias: {3,7}]   ;;  %s1060_s8 = inlined_call_operand.vmem [shape: f32[32,64], index: 8, kind: output, shape index: {}]  }
   0x1 LB: > { %s703_s28 = sadd.s32 4294967295, %s878_s27   ;;  %p707_p0 = scmp.ge.s32.totalorder %s878_s27, 1  ;;  %s878_s27 = sphi %s925_s27, %s18_s27  }
   0x2   : > { %p274_p1 = scmp.lt.s32.totalorder %s878_s27, 3 }
   0x4   : > { %p275_p2 = pnand %p707_p0, %p274_p1 }
   0x5   : > { %s708_s29 = sshll.u32 (!%p275_p2), %s703_s28, 1  ;;  %vm339_vm0 = vcmask (!%p275_p2), 523264   ;;  %v383_v18 = vld [vmem:[%s1056_s4] sm:$0xff] (!%p275_p2)  ;;  %v384_v19 = vld [vmem:[%s1056_s4 + $0x8] sm:$0xff] (!%p275_p2)  ;;  %v385_v21 = vld [vmem:[%s1056_s4 + $0x10] sm:$0xff] (!%p275_p2) }
   0x6   : > { %278 = sbr.rel (%p275_p2) target bundleno = 819 (0x333), region = 52  ;;  %p314_p3 = scmp.lt.s32.totalorder (!%p275_p2), %s708_s29, 3  ;;  %v804_v20 = vpack.c.bf16 (!%p275_p2), %v384_v19, %v383_v18  ;;  %v386_v22 = vld [vmem:[%s1056_s4 + $0x18] sm:$0xff] (!%p275_p2)  ;;  %v387_v23 = vld [vmem:[%s1056_s4 + $0x20] sm:$0xff] (!%p275_p2)  ;;  %v388_v25 = vld [vmem:[%s1056_s4 + $0x28] sm:$0xff] (!%p275_p2) }
   0x7   : > { %v808_v24 = vpack.c.bf16 (!%p275_p2), %v386_v22, %v385_v21  ;;  %v812_v26 = vpack.c.bf16 (!%p275_p2), %v388_v25, %v387_v23  ;;  %v389_v27 = vld [vmem:[%s1056_s4 + $0x30] sm:$0xff] (!%p275_p2)  ;;  %v390_v28 = vld [vmem:[%s1056_s4 + $0x38] sm:$0xff] (!%p275_p2)  ;;  %v714_v37 = vld [vmem:[%s1054_s2] ss:$0 sm:$0xff] (!%p275_p2) }
   0x8   : > { %805 = vmatprep.subr.bf16.mxu0 (!%p275_p2), %v804_v20  ;;  %v816_v29 = vpack.c.bf16 (!%p275_p2), %v390_v28, %v389_v27  ;;  %v715_v39 = vld [vmem:[%s1055_s3] ss:$0 sm:$0xff] (!%p275_p2)  ;;  %v534_v47 = vld [vmem:[%s1058_s6 + $0x8] sm:$0xff] (!%p275_p2)  ;;  %v535_v48 = vld [vmem:[%s1058_s6 + $0x10] sm:$0xff] (!%p275_p2) }
   0x9   : > { %807 = vmatpush3.bf16.msra.mxu0 (!%p275_p2), %v804_v20  ;;  %v533_v46 = vld [vmem:[%s1058_s6] sm:$0xff] (!%p275_p2)  ;;  %v536_v50 = vld [vmem:[%s1058_s6 + $0x18] sm:$0xff] (!%p275_p2)  ;;  %v538_v53 = vld [vmem:[%s1058_s6 + $0x28] sm:$0xff] (!%p275_p2) }
   0xa   : > { %809 = vmatprep.subr.bf16.mxu0 (!%p275_p2), %v808_v24  ;;  %v820_v49 = vpack.c.bf16 (!%p275_p2), %v534_v47, %v533_v46  ;;  %v824_v51 = vpack.c.bf16 (!%p275_p2), %v536_v50, %v535_v48  ;;  %v537_v52 = vld [vmem:[%s1058_s6 + $0x20] sm:$0xff] (!%p275_p2)  ;;  %v539_v55 = vld [vmem:[%s1058_s6 + $0x30] sm:$0xff] (!%p275_p2)  ;;  %v540_v56 = vld [vmem:[%s1058_s6 + $0x38] sm:$0xff] (!%p275_p2) }
   0xb   : > { %v828_v54 = vpack.c.bf16 (!%p275_p2), %v538_v53, %v537_v52  ;;  %v832_v57 = vpack.c.bf16 (!%p275_p2), %v540_v56, %v539_v55  ;;  %v541_v58 = vld [vmem:[%s1058_s6 + $0x40] sm:$0xff] (!%p275_p2)  ;;  %v542_v59 = vld [vmem:[%s1058_s6 + $0x48] sm:$0xff] (!%p275_p2)  ;;  %v543_v61 = vld [vmem:[%s1058_s6 + $0x50] sm:$0xff] (!%p275_p2) }
   0xc   : > { %821 = vmatprep.subr.bf16.mxu1 (!%p275_p2), %v820_v49  ;;  %v836_v60 = vpack.c.bf16 (!%p275_p2), %v542_v59, %v541_v58  ;;  %v544_v62 = vld [vmem:[%s1058_s6 + $0x58] sm:$0xff] (!%p275_p2) }
   0xd   : > { %s1062_s29 = smov (!%p314_p3, %s708_s29), 3  ;;  %811 = vmatpush3.bf16.msra.mxu0 %v808_v24  ;;  %823 = vmatpush3.bf16.msra.mxu1 %v820_v49  ;;  %v840_v63 = vpack.c.bf16 %v544_v62, %v543_v61 }
   0xe   : > { %s933_s30 = sshll.u32 %s1062_s29, 3  ;;  %813 = vmatprep.subr.bf16.mxu0 %v812_v26  ;;  %825 = vmatprep.subr.bf16.mxu1 %v824_v51 }
   0xf   : > { %s317_s11 = scalar_lea.vmem %s1052_s0, %s933_s30  ;;  %s323_s14 = scalar_lea.vmem %s1053_s1, %s933_s30 }
  0x10   : > { %v331_v0 = vld [vmem:[%s317_s11] sm:$0xff]  ;;  %v332_v2 = vld [vmem:[%s317_s11 + $0x8] sm:$0xff]  ;;  %s329_s13 = scalar_lea.vmem %s1060_s8, %s933_s30 }
  0x11   : > { %v333_v1 = vld [vmem:[%s323_s14] sm:$0xff]  ;;  %v334_v4 = vld [vmem:[%s323_s14 + $0x8] sm:$0xff]  ;;  %815 = vmatpush3.bf16.msra.mxu0 %v812_v26  ;;  %827 = vmatpush3.bf16.msra.mxu1 %v824_v51 }
  0x12   : > { %v943_v3 = vadd.f32 %v333_v1, %v331_v0  ;;  %v945_v5 = vadd.f32 %v334_v4, %v332_v2  ;;  %817 = vmatprep.subr.bf16.mxu0 %v816_v29  ;;  %829 = vmatprep.subr.bf16.mxu1 %v828_v54  ;;  %v545_v0 = vld [vmem:[%s1058_s6 + $0x60] sm:$0xff]  ;;  %v546_v1 = vld [vmem:[%s1058_s6 + $0x68] sm:$0xff]  ;;  %v547_v4 = vld [vmem:[%s1058_s6 + $0x70] sm:$0xff] }
  0x13   : > { %v844_v2 = vpack.c.bf16 %v546_v1, %v545_v0 }
  0x14   : > { %v340_v6 = vsel %vm339_vm0, %v943_v3, 0.0  ;;  %v343_v7 = vsel %vm339_vm0, %v945_v5, 0.0 }
  0x15   : > { %341 = vadd.xlane.f32.xlu0 %v340_v6  ;;  %819 = vmatpush3.bf16.msra.mxu0 %v816_v29  ;;  %v548_v6 = vld [vmem:[%s1058_s6 + $0x78] sm:$0xff] }
  0x16   : > { %831 = vmatpush3.bf16.msra.mxu1 %v828_v54 }
  0x17   : > { %833 = vmatprep.subr.bf16.mxu1 %v832_v57 }
  0x19   : > { %344 = vadd.xlane.f32.xlu0 %v343_v7  ;;  %v848_v7 = vpack.c.bf16 %v548_v6, %v547_v4 }
  0x1a   : > { %835 = vmatpush3.bf16.msra.mxu1 %v832_v57 }
  0x1b   : > { %837 = vmatprep.subr.bf16.mxu1 %v836_v60 }
  0x1e   : > { %839 = vmatpush3.bf16.msra.mxu1 %v836_v60 }
  0x1f   : > { %841 = vmatprep.subr.bf16.mxu1 %v840_v63 }
  0x22   : > { %843 = vmatpush3.bf16.msra.mxu1 %v840_v63  ;;  %v719_v63 = vld [vmem:[%s1059_s7] ss:$0 sm:$0xff] }
  0x23   : > { %845 = vmatprep.subr.bf16.mxu1 %v844_v2 }
  0x26   : > { %847 = vmatpush3.bf16.msra.mxu1 %v844_v2 }
  0x27   : > { %849 = vmatprep.subr.bf16.mxu1 %v848_v7 }
  0x2a   : > { %851 = vmatpush3.bf16.msra.mxu1 %v848_v7 }
  0xa2   : > { %v342_v8 = vpop.xlane.xlu0 %341 }
  0xa3   : > { %v347_v9 = vmul.f32 0.015625, %v342_v8  ;;  %v716_v8 = vld [vmem:[%s1057_s5] ss:$0 sm:$0xff] }
  0xa5   : > { %v349_v10 = vsub.f32 %v943_v3, %v347_v9 }
  0xa6   : > { %v345_v11 = vpop.xlane.xlu0 %344 }
  0xa7   : > { %v348_v12 = vmul.f32 0.015625, %v345_v11  ;;  %v351_v13 = vmul.f32 %v349_v10, %v349_v10 }
  0xa9   : > { %v350_v14 = vsub.f32 %v945_v5, %v348_v12  ;;  %v353_v15 = vsel %vm339_vm0, %v351_v13, 0.0 }
  0xaa   : > { %354 = vadd.xlane.f32.xlu1 %v353_v15 }
  0xab   : > { %v352_v16 = vmul.f32 %v350_v14, %v350_v14 }
  0xad   : > { %v356_v17 = vsel %vm339_vm0, %v352_v16, 0.0 }
  0xae   : > { %357 = vadd.xlane.f32.xlu1 %v356_v17 }
 0x137   : > { %v355_v30 = vpop.xlane.xlu1 %354 }
 0x138   : > { %v359_v31 = vmul.f32 0.015625, %v355_v30 }
 0x13a   : > { %v361_v32 = vadd.f32 1e-05, %v359_v31 }
 0x13b   : > { %v358_v33 = vpop.xlane.xlu1 %357 }
 0x13c   : > { %860 = vrsqrt.f32 %v361_v32  ;;  %v360_v34 = vmul.f32 0.015625, %v358_v33 }
 0x13e   : > { %v362_v35 = vadd.f32 1e-05, %v360_v34 }
 0x140   : > { %862 = vrsqrt.f32 %v362_v35 }
 0x146   : > { %v861_v36 = vpop.eup %860 }
 0x147   : > { %v365_v38 = vmul.f32 %v861_v36, %v349_v10 }
 0x149   : > { %v373_v40 = vmul.f32 %v714_v37, %v365_v38 }
 0x14a   : > { %v863_v41 = vpop.eup %862 }
 0x14b   : > { %v366_v42 = vmul.f32 %v863_v41, %v350_v14  ;;  %v381_v43 = vadd.f32 %v715_v39, %v373_v40 }
 0x14d   : > { %v374_v44 = vmul.f32 %v714_v37, %v366_v42  ;;  %766 = vmatprep.mubr.msk.f32.mxu0 %vm339_vm0, %v381_v43 }
 0x14f   : > { %v382_v45 = vadd.f32 %v715_v39, %v374_v44 }
 0x151   : > { %767 = vmatmul.mubr.msk.f32.vlgmr.msra.gmra.mrb[0].mxu0 %vm339_vm0, %v382_v45 }
 0x224   : > { %v768_v9 = vpop.f32.mrb[0].mxu0 }
 0x225   : > { %v476_v10 = vadd.f32 %v768_v9, %v716_v8  ;;  %v470_v11 = vpop.f32.mrb[1].mxu0 }
 0x226   : > { %v471_v12 = vadd.f32 %v716_v8, %v470_v11 }
 0x227   : > { %v482_v13 = vmul.f32 0.70710677, %v476_v10  ;;  %v480_v60 = vmul.f32 0.5, %v476_v10 }
 0x228   : > { %v481_v14 = vmul.f32 0.70710677, %v471_v12  ;;  %v479_v58 = vmul.f32 0.5, %v471_v12 }
 0x229   : > { %v484_v15 = vand.u32 2147483647, %v482_v13  ;;  %vm524_vm1 = vcmp.ge.f32.partialorder %v482_v13, 0.0 }
 0x22a   : > { %v483_v16 = vand.u32 2147483647, %v481_v14  ;;  %vm523_vm2 = vcmp.ge.f32.partialorder %v481_v14, 0.0 }
 0x22b   : > { %v486_v17 = vmul.f32 0.3275911, %v484_v15  ;;  %v512_v21 = vsub.f32 0.0, %v484_v15 }
 0x22c   : > { %v485_v18 = vmul.f32 0.3275911, %v483_v16  ;;  %v511_v22 = vsub.f32 0.0, %v483_v16 }
 0x22d   : > { %v488_v19 = vadd.f32 1.0, %v486_v17  ;;  %v514_v24 = vmul.f32 %v512_v21, %v484_v15 }
 0x22e   : > { %v487_v20 = vadd.f32 1.0, %v485_v18  ;;  %v513_v26 = vmul.f32 %v511_v22, %v483_v16 }
 0x22f   : > { %864 = vrcp.f32 %v488_v19  ;;  %v517_v30 = vmul.f32 1.442695, %v514_v24 }
 0x230   : > { %866 = vrcp.f32 %v487_v20  ;;  %v515_v32 = vmul.f32 1.442695, %v513_v26 }
 0x231   : > { %868 = vpow2.f32 %v517_v30 }
 0x232   : > { %870 = vpow2.f32 %v515_v32 }
 0x239   : > { %v865_v23 = vpop.eup %864 }
 0x23a   : > { %v867_v25 = vpop.eup %866  ;;  %v494_v27 = vmul.f32 1.0614054, %v865_v23 }
 0x23b   : > { %v493_v28 = vmul.f32 1.0614054, %v867_v25  ;;  %v869_v46 = vpop.eup %868 }
 0x23c   : > { %v496_v29 = vadd.f32 -1.4531521, %v494_v27  ;;  %v871_v48 = vpop.eup %870 }
 0x23d   : > { %v495_v31 = vadd.f32 -1.4531521, %v493_v28 }
 0x23e   : > { %v498_v33 = vmul.f32 %v865_v23, %v496_v29 }
 0x23f   : > { %v497_v34 = vmul.f32 %v867_v25, %v495_v31 }
 0x240   : > { %v500_v35 = vadd.f32 1.4214138, %v498_v33 }
 0x241   : > { %v499_v36 = vadd.f32 1.4214138, %v497_v34 }
 0x242   : > { %v502_v37 = vmul.f32 %v865_v23, %v500_v35 }
 0x243   : > { %v501_v38 = vmul.f32 %v867_v25, %v499_v36 }
 0x244   : > { %v504_v39 = vadd.f32 -0.28449672, %v502_v37 }
 0x245   : > { %v503_v40 = vadd.f32 -0.28449672, %v501_v38 }
 0x246   : > { %v506_v41 = vmul.f32 %v865_v23, %v504_v39 }
 0x247   : > { %v505_v42 = vmul.f32 %v867_v25, %v503_v40 }
 0x248   : > { %v508_v43 = vadd.f32 0.2548296, %v506_v41 }
 0x249   : > { %v507_v44 = vadd.f32 0.2548296, %v505_v42 }
 0x24a   : > { %v510_v45 = vmul.f32 %v865_v23, %v508_v43 }
 0x24b   : > { %v509_v47 = vmul.f32 %v867_v25, %v507_v44 }
 0x24c   : > { %v520_v49 = vmul.f32 %v869_v46, %v510_v45 }
 0x24d   : > { %v519_v50 = vmul.f32 %v871_v48, %v509_v47 }
 0x24e   : > { %v522_v51 = vsub.f32 1.0, %v520_v49 }
 0x24f   : > { %v521_v52 = vsub.f32 1.0, %v519_v50 }
 0x250   : > { %v526_v53 = vsub.f32 0.0, %v522_v51 }
 0x251   : > { %v525_v54 = vsub.f32 0.0, %v521_v52 }
 0x252   : > { %v528_v55 = vsel %vm524_vm1, %v522_v51, %v526_v53 }
 0x253   : > { %v527_v56 = vsel %vm523_vm2, %v521_v52, %v525_v54  ;;  %v530_v57 = vadd.f32 1.0, %v528_v55 }
 0x254   : > { %v529_v59 = vadd.f32 1.0, %v527_v56 }
 0x255   : > { %v532_v62 = vmul.f32 %v530_v57, %v480_v60 }
 0x256   : > { %v531_v61 = vmul.f32 %v529_v59, %v479_v58 }
 0x258   : > { %801 = vmatprep.mubr.f32.mxu1 %v531_v61 }
 0x259   : > { %802 = vmatmul.mubr.f32.vlgmr.msra.gmra.mrb[0].mxu1 %v532_v62 }
 0x32c   : > { %v803_v0 = vpop.f32.mrb[0].mxu1 }
 0x32d   : > { %v628_v1 = vadd.f32 %v803_v0, %v719_v63  ;;  %v622_v2 = vpop.f32.mrb[1].mxu1 }
 0x32e   : > { %v623_v4 = vadd.f32 %v719_v63, %v622_v2 }
 0x32f   : > { %v632_v7 = vadd.f32 %v628_v1, %v945_v5 }
 0x330   : > { %v631_v6 = vadd.f32 %v623_v4, %v943_v3 }
 0x331   : > { %634 = vst.msk [vmem:[%s329_s13 + $0x8] sm:$0xff] %vm339_vm0, %v632_v7 }
 0x332   : > { %633 = vst.msk [vmem:[%s329_s13] sm:$0xff] %vm339_vm0, %v631_v6 }
 0x333 PF: > { %s18_s27 = sadd.s32 1, %s878_s27  }
 0x334   : > { %p15_p4 = scmp.ge.s32.totalorder %s18_s27, 4  }
 0x336   :  { %17 = sbr.rel (!%p15_p4) target bundleno = 1 (0x1), region = 85 }

// kernel: _lambda_.21
= control target key start
LH: loop header
LB: loop body
LE: loop exit
PB: predicated region body
PF: predicated region fallthrough
CT: control target
= control target key end

     0   :  { %10 = vsyncpa [#allocation3], 0  ;;  %s770_s0 = inlined_call_operand.vmem [shape: f32[2,16,64], index: 0, kind: input, shape index: {}]   ;;  %s771_s1 = inlined_call_operand.vmem [shape: f32[1,64], index: 1, kind: input, shape index: {}]   ;;  %s772_s2 = inlined_call_operand.vmem [shape: f32[1,64], index: 2, kind: input, shape index: {}]   ;;  %s773_s3 = inlined_call_operand.vmem [shape: f32[64,10], index: 3, kind: input, shape index: {}]   ;;  %s774_s4 = inlined_call_operand.vmem [shape: f32[1,10], index: 4, kind: input, shape index: {}]   ;;  %s775_s5 = inlined_call_operand.hbm [shape: f32[2,1,10], index: 5, kind: output, shape index: {}]  }
   0x1   :  { %12 = vsyncpa [#allocation3 + $0x1], 0  ;;  %s630_s18 = smov 0   ;;  %s632_s19 = smov 0  }
   0x2   :  { %s634_s20 = smov 0   ;;  %s636_s21 = smov 0  }
   0x3 LB: > { %s651_s22 = sadd.s32 4294967295, %s594_s21   ;;  %s433_s23 = sadd.s32 4294967294, %s594_s21   ;;  %s594_s21 = sphi %s636_s21, %s781_s21   ;;  %s590_s20 = sphi %s634_s20, %s780_s20   ;;  %s586_s19 = sphi %s632_s19, %s779_s19   ;;  %s582_s18 = sphi %s630_s18, %s778_s18  }
   0x4   : > { %s655_s24 = sadd.s32 1, %s594_s21   ;;  %s135_s25 = sadd.s32 1, %s590_s20 }
   0x5   : > { %s132_s26 = ssub.s32 %s594_s21, %s655_s24  ;;  %p145_p0 = scmp.ne.s32.totalorder %s590_s20, %s586_s19 }
   0x6   : > { %p133_p1 = scmp.eq.s32.totalorder %s132_s26, 0  ;;  %p146_p2 = scmp.eq.s32.totalorder %s651_s22, 1 }
   0x7   : > { %p151_p3 = scmp.ne.s32.totalorder %s586_s19, %s582_s18  ;;  %p152_p4 = scmp.eq.s32.totalorder %s433_s23, 1 }
   0x8   : > { %s666_s27 = scalar_select %p133_p1, %s590_s20, %s135_s25  }
   0x9   : > { %p668_p5 = por %p146_p2, %p145_p0  ;;  %p672_p6 = por %p152_p4, %p151_p3 }
   0xa   : > { %p436_p7 = scmp.ge.s32.totalorder %s594_s21, 1  ;;  %p190_p8 = scmp.lt.s32.totalorder %s594_s21, 3 }
   0xc   : > { %p191_p9 = pnand %p436_p7, %p190_p8 }
   0xd   : > { %p217_p10 = scmp.lt.s32.totalorder (!%p191_p9), %s651_s22, 1  ;;  %vm226_vm0 = vcmask (!%p191_p9), 523264   ;;  %v281_v14 = vld [vmem:[%s773_s3] sm:$0xff] (!%p191_p9)  ;;  %v282_v15 = vld [vmem:[%s773_s3 + $0x8] sm:$0xff] (!%p191_p9)  ;;  %v283_v16 = vld [vmem:[%s773_s3 + $0x10] sm:$0xff] (!%p191_p9)  ;;  %v596_v17 = vmov (!%p191_p9), 0.0|0.0  }
   0xe   : > { %194 = sbr.rel (%p191_p9) target bundleno = 588 (0x24c), region = 40  ;;  %474 = vmatprep.subr.bf16.mxu0 (!%p191_p9), %v596_v17  ;;  %v475_v18 = vpack.c.bf16 (!%p191_p9), %v282_v15, %v281_v14  ;;  %v284_v19 = vld [vmem:[%s773_s3 + $0x18] sm:$0xff] (!%p191_p9)  ;;  %vm597_vm1 = vmmov (!%p191_p9), 0   ;;  %v598_v20 = vmov (!%p191_p9), 0.0   ;;  %v285_v22 = vld [vmem:[%s773_s3 + $0x20] sm:$0xff] (!%p191_p9)  ;;  %v286_v23 = vld [vmem:[%s773_s3 + $0x28] sm:$0xff] (!%p191_p9) }
   0xf   : > { %471 = vmatprep.mubr.msk.f32.mxu0 (!%p191_p9), %vm597_vm1, %v598_v20  ;;  %v478_v21 = vpack.c.bf16 (!%p191_p9), %v284_v19, %v283_v16  ;;  %v481_v24 = vpack.c.bf16 (!%p191_p9), %v286_v23, %v285_v22  ;;  %v287_v25 = vld [vmem:[%s773_s3 + $0x30] sm:$0xff] (!%p191_p9)  ;;  %v288_v26 = vld [vmem:[%s773_s3 + $0x38] sm:$0xff] (!%p191_p9)  ;;  %v439_v35 = vld [vmem:[%s771_s1] ss:$0 sm:$0xff] (!%p191_p9)  ;;  %s215_s14 = sand.u32 (!%p191_p9), 1, %s586_s19   ;;  %s442_s17 = sshll.u32 (!%p191_p9), %s651_s22, 4 }
  0x10   : > { %476 = vmatpush3.bf16.msra.mxu0 (!%p191_p9), %v475_v18  ;;  %v484_v27 = vpack.c.bf16 (!%p191_p9), %v288_v26, %v287_v25  ;;  %v440_v39 = vld [vmem:[%s772_s2] ss:$0 sm:$0xff] (!%p191_p9)  ;;  %s216_s23 = scalar_lea.vmem (!%p191_p9), [#allocation2], %s215_s14  ;;  %vm363_vm2 = vcmask (!%p191_p9), 73728   ;;  %s366_s7 = scalar_lea.sflag (!%p191_p9), [#allocation3], %s215_s14 }
  0x11   : > { %477 = vmatprep.subr.bf16.mxu0 (!%p191_p9), %v596_v17  ;;  %v289_v54 = vld [vmem:[%s774_s4] sm:$0x1] (!%p191_p9)  ;;  %s378_s25 = sshll.u32 (!%p191_p9), %s216_s23, 4  ;;  %s730_s25 = int_to_ptr.vmem [resolvable:$true] %s378_s25 }
  0x12   : > { %s532_s8 = scalar_lea.vmem (!%p191_p9), %s730_s25, 16 }
  0x13   : > { %p533_p11 = scmp.ne.s32.totalorder (!%p191_p9), %s730_s25, %s532_s8 }
  0x14   : > { %479 = vmatpush3.bf16.msra.mxu0 (!%p191_p9), %v478_v21 }
  0x15   : > { %s218_s30 = scalar_select %p217_p10, %s651_s22, 1  ;;  %480 = vmatprep.subr.bf16.mxu0 %v596_v17 }
  0x16   : > { %p534_p12 = pnand %p533_p11, %p668_p5  ;;  %s599_s22 = smov [#allocation2]  }
  0x17   : > { %s445_s6 = sshll.u32 %s218_s30, 4 }
  0x18   : > { %s221_s9 = scalar_lea.vmem %s770_s0, %s445_s6  ;;  %482 = vmatpush3.bf16.msra.mxu0 %v481_v24  ;;  %s728_s6 = scalar_lea.hbm %s775_s5, %s442_s17 }
  0x19   : > { %v222_v0 = vld [vmem:[%s221_s9] sm:$0xff]  ;;  %v223_v1 = vld [vmem:[%s221_s9 + $0x8] sm:$0xff]  ;;  %483 = vmatprep.subr.bf16.mxu0 %v596_v17  ;;  %p535_p13 = pneg %p534_p12  ;;  %s536_s9 = sshll.u32 %s599_s22, 4  ;;  %s537_s9 = int_to_ptr.vmem [resolvable:$false] %s536_s9 }
  0x1a   : > { %v227_v2 = vsel %vm226_vm0, %v222_v0, 0.0  ;;  %v230_v3 = vsel %vm226_vm0, %v223_v1, 0.0  ;;  %s538_s10 = scalar_lea.vmem %s537_s9, 32  ;;  %p539_p0 = scmp.lt.s32.totalorder %s730_s25, %s537_s9 }
  0x1b   : > { %228 = vadd.xlane.f32.xlu0 %v227_v2  ;;  %p540_p1 = scmp.lt.s32.totalorder %s538_s10, %s532_s8 }
  0x1c   : > { %485 = vmatpush3.bf16.msra.mxu0 %v484_v27 }
  0x1d   : > { %p541_p2 = por %p540_p1, %p539_p0 }
  0x1f   : > { %231 = vadd.xlane.f32.xlu0 %v230_v3  ;;  %p542_p3 = pnand %p541_p2, %p535_p13 }
  0xa8   : > { %v229_v4 = vpop.xlane.xlu0 %228 }
  0xa9   : > { %v234_v5 = vmul.f32 0.015625, %v229_v4 }
  0xab   : > { %v236_v6 = vsub.f32 %v222_v0, %v234_v5 }
  0xac   : > { %v232_v7 = vpop.xlane.xlu0 %231 }
  0xad   : > { %v235_v8 = vmul.f32 0.015625, %v232_v7  ;;  %v238_v9 = vmul.f32 %v236_v6, %v236_v6 }
  0xaf   : > { %v237_v10 = vsub.f32 %v223_v1, %v235_v8  ;;  %v240_v11 = vsel %vm226_vm0, %v238_v9, 0.0 }
  0xb0   : > { %241 = vadd.xlane.f32.xlu1 %v240_v11 }
  0xb1   : > { %v239_v12 = vmul.f32 %v237_v10, %v237_v10 }
  0xb3   : > { %v243_v13 = vsel %vm226_vm0, %v239_v12, 0.0 }
  0xb4   : > { %244 = vadd.xlane.f32.xlu1 %v243_v13 }
 0x13d   : > { %v242_v28 = vpop.xlane.xlu1 %241 }
 0x13e   : > { %v246_v29 = vmul.f32 0.015625, %v242_v28 }
 0x140   : > { %v248_v30 = vadd.f32 1e-05, %v246_v29 }
 0x141   : > { %v245_v31 = vpop.xlane.xlu1 %244 }
 0x142   : > { %528 = vrsqrt.f32 %v248_v30  ;;  %v247_v32 = vmul.f32 0.015625, %v245_v31 }
 0x144   : > { %v249_v33 = vadd.f32 1e-05, %v247_v32 }
 0x146   : > { %530 = vrsqrt.f32 %v249_v33 }
 0x14c   : > { %v529_v34 = vpop.eup %528 }
 0x14d   : > { %v252_v36 = vmul.f32 %v529_v34, %v236_v6 }
 0x14f   : > { %v260_v37 = vmul.f32 %v439_v35, %v252_v36 }
 0x150   : > { %v531_v38 = vpop.eup %530 }
 0x151   : > { %v253_v40 = vmul.f32 %v531_v38, %v237_v10  ;;  %v268_v41 = vadd.f32 %v440_v39, %v260_v37 }
 0x153   : > { %v261_v42 = vmul.f32 %v439_v35, %v253_v40  ;;  %v270_v44 = vsel %vm226_vm0, %v268_v41, 0.0 }
 0x155   : > { %v269_v43 = vadd.f32 %v440_v39, %v261_v42 }
 0x157   : > { %v271_v45 = vsel %vm226_vm0, %v269_v43, 0.0 }
 0x158   : > { %v272_v46 = vadd.f32 %v271_v45, %v270_v44 }
 0x15a   : > { %v273_v47 = vrot.slane %v272_v46, 4 }
 0x15c   : > { %v274_v48 = vadd.f32 %v273_v47, %v272_v46 }
 0x15e   : > { %v275_v49 = vrot.slane %v274_v48, 2 }
 0x160   : > { %v276_v50 = vadd.f32 %v275_v49, %v274_v48 }
 0x162   : > { %v277_v51 = vrot.slane %v276_v50, 1 }
 0x164   : > { %v278_v52 = vadd.f32 %v277_v51, %v276_v50 }
 0x166   : > { %v280_v53 = vmul.f32 0.0625, %v278_v52 }
 0x168   : > { %472 = vmatmul.mubr.msk.f32.vlgmr.msra.gmra.mrb[0].mxu0 %vm226_vm0, %v280_v53 }
 0x23b   : > { %v359_v55 = vpop.f32.mrb[0].mxu0 }
 0x23c   : > { %v360_v56 = vadd.f32 %v359_v55, %v289_v54  ;;  %v473_v57 = vpop.f32.mrb[1].mxu0 }
 0x23e   : > { %364 = vst.msk [vmem:[%s216_s23] sm:$0x1] %vm363_vm2, %v360_v56 }
 0x23f   : > { %545 = shalt.err (!%p542_p3)
}
 0x240   : > { %s546_s11 = scalar_lea.hbm %s728_s6, 16  ;;  %s550_s14 = scalar_lea.hbm %s775_s5, 32 }
 0x241   : > { %p547_p4 = scmp.ne.s32.totalorder %s728_s6, %s546_s11  ;;  %p551_p9 = scmp.lt.u32.totalorder %s728_s6, %s775_s5 }
 0x242   : > { %p552_p10 = scmp.lt.u32.totalorder %s550_s14, %s546_s11  ;;  %p554_p12 = scmp.lt.u32.totalorder %s546_s11, %s728_s6 }
 0x243   : > { %p548_p7 = pnand %p547_p4, %p668_p5 }
 0x244   : > { %p553_p11 = por %p552_p10, %p551_p9 }
 0x245   : > { %p549_p8 = pneg %p548_p7 }
 0x246   : > { %p555_p13 = por %p554_p12, %p553_p11 }
 0x248   : > { %p556_p0 = pnand %p555_p13, %p549_p8 }
 0x24a   : > { %559 = shalt.err (!%p556_p0)
}
 0x24b   : > { %486 = dma.vmem_to_hbm [thread:$0]  (%p668_p5), %s730_s25, 16, %s728_s6, %s366_s7  }
 0x24c PF: > { %p492_p1 = scmp.ge.s32.totalorder %s594_s21, 2  ;;  %s390_s17 = sand.u32 1, %s582_s18  }
 0x24d   : > { %s391_s23 = scalar_lea.sflag [#allocation3], %s390_s17 }
 0x24e   : > { %p489_p2 = pnand %p492_p1, %p672_p6 }
 0x250   : > { %577 = dma.done.wait (!%p489_p2), %s391_s23, 16  }
 0x251   : > { %579 = vsyncadd (!%p489_p2), %s391_s23, 4294967280  ;;  %p15_p3 = scmp.ge.s32.totalorder %s655_s24, 4   ;;  %s778_s18 = smov %s586_s19 }
 0x252   : > { %s779_s19 = smov %s590_s20  ;;  %s780_s20 = smov %s666_s27 }
 0x253   : > { %s781_s21 = smov %s655_s24  ;;  %17 = sbr.rel (!%p15_p3) target bundleno = 3 (0x3), region = 75 }
 0x25a   :  { %395 = vsyncpa [#allocation3], 1 }
 0x25b   :  { %397 = vsyncpa [#allocation3 + $0x1], 1 }

</bundles_post_ra>
